<compile_context>
chip_gen: v7x
topology: tpu7x:2x2x1
jax: 0.10.0
libtpu: 0.0.40
codegen_flags: <defaults>
</compile_context>

<pallas_src>
import functools

import jax
import jax.numpy as jnp
from jax.experimental import pallas as pl
from jax.experimental.pallas import tpu as pltpu


# ---------------------------------------------------------------------------
# Fused Pallas kernel: convs + FC stack + dueling head, single invocation
# ---------------------------------------------------------------------------

def _fused_dueling_kernel(*refs, n_conv, n_mid, shifts, lane_n, block_stride, batch):
    """refs = (x, [conv_w_taps, conv_b]*n_conv, fc_flat_w(HBM), fc_flat_b,
               [mid_w, mid_b]*n_mid, head_w, head_b, out, fc_flat_w_vmem, dma_sem)

    Layout: activations are [channels, batch*block_stride]; lane index inside an
    image block is (input_width * h + w), so every conv tap is a pure lane shift.
    """
    x_ref = refs[0]
    conv_refs = refs[1:1 + 2 * n_conv]
    i0 = 1 + 2 * n_conv
    wflat_hbm = refs[i0]
    bflat_ref = refs[i0 + 1]
    mid_refs = refs[i0 + 2:i0 + 2 + 2 * n_mid]
    i1 = i0 + 2 + 2 * n_mid
    wq_ref, bq_ref, o_ref = refs[i1], refs[i1 + 1], refs[i1 + 2]
    wflat_vmem, dma_sem = refs[i1 + 3], refs[i1 + 4]

    # Start the big first-FC weight fetch now; it overlaps with the conv phase.
    wf_copy = pltpu.make_async_copy(wflat_hbm, wflat_vmem, dma_sem.at[0])
    wf_copy.start()

    P = block_stride

    # ---- conv stack: shift-and-accumulate, channels on sublanes --------------
    act = x_ref[...]                                        # [C_in, B*P] f32
    for li in range(n_conv):
        w_taps = conv_refs[2 * li]                          # [kh*kw, cout, cin]
        b_vec = conv_refs[2 * li + 1][...]                  # [cout, 1]
        cout = w_taps.shape[1]
        width = (batch - 1) * P + lane_n[li + 1]
        acc = jnp.zeros((cout, width), jnp.float32)
        for t, s in enumerate(shifts[li]):
            acc = acc + jnp.dot(w_taps[t], act[:, s:s + width],
                                preferred_element_type=jnp.float32)
        act = jnp.maximum(acc + b_vec, 0.0)                 # lane-dense [cout, width]

    y = act.astype(wflat_vmem.dtype)                        # bf16 for the bf16 FC weight
    n_last = lane_n[n_conv]
    c_last = wflat_vmem.shape[0]

    wf_copy.wait()

    # ---- first FC: flatten folded into per-channel weight slabs --------------
    # (zero weight rows cover the lane-padding junk; batch stacked on GEMM rows)
    acc = None
    for c in range(c_last):
        rows = jnp.concatenate(
            [y[c:c + 1, b * P:b * P + n_last] for b in range(batch)], axis=0)
        term = jnp.dot(rows, wflat_vmem[c], preferred_element_type=jnp.float32)
        acc = term if acc is None else acc + term
    h = jnp.maximum(acc + bflat_ref[...], 0.0)              # [B, hidden]

    # ---- remaining hidden FC layers (none in the default config) -------------
    for mi in range(n_mid):
        w = mid_refs[2 * mi][...]
        bb = mid_refs[2 * mi + 1][...]
        h = jnp.maximum(jnp.dot(h, w, preferred_element_type=jnp.float32) + bb, 0.0)

    # ---- dueling head: adv/value weights and V + (A - mean A) folded offline --
    q = jnp.dot(h, wq_ref[...], preferred_element_type=jnp.float32) + bq_ref[...]
    o_ref[...] = q.astype(o_ref.dtype)


# ---------------------------------------------------------------------------
# Wrapper: input prep + single pallas_call
# ---------------------------------------------------------------------------

def _prep_input(x_nchw, block_stride):
    """[B, C, H, W] -> [C, B*block_stride] with lane = b*block + W*h + w (zero padded)."""
    B, C, H, W = x_nchw.shape
    x_l = x_nchw.reshape(B, C, H * W)
    x_l = jnp.pad(x_l, ((0, 0), (0, 0), (0, block_stride - H * W)))
    return jnp.transpose(x_l, (1, 0, 2)).reshape(C, B * block_stride)


def nnq_dueling_forward(x_nchw, packed, *, meta):
    """Pallas-backed forward, mirroring NNQ_Dueling.forward (input is NCHW)."""
    B = x_nchw.shape[0]
    lane_n = meta["lane_n"]
    block = lane_n[0]
    x_l = _prep_input(x_nchw, block)

    vmem = pl.BlockSpec(memory_space=pltpu.MemorySpace.VMEM)
    operands, in_specs = [x_l], [vmem]
    for w, b in zip(packed["conv_w"], packed["conv_b"]):
        operands += [w, b]
        in_specs += [vmem, vmem]
    # Big flatten-FC weight stays in HBM (pl.ANY) and is DMA'd manually in-kernel.
    operands += [packed["fc_flat_w"], packed["fc_flat_b"]]
    in_specs += [pl.BlockSpec(memory_space=pl.ANY), vmem]
    for w, b in zip(packed["mid_w"], packed["mid_b"]):
        operands += [w, b]
        in_specs += [vmem, vmem]
    operands += [packed["head_w"], packed["head_b"]]
    in_specs += [vmem, vmem]

    kernel = functools.partial(
        _fused_dueling_kernel,
        n_conv=meta["n_conv"], n_mid=meta["n_mid"], shifts=meta["shifts"],
        lane_n=lane_n, block_stride=block, batch=B)

    return pl.pallas_call(
        kernel,
        out_shape=jax.ShapeDtypeStruct((B, meta["n_actions"]), jnp.float32),
        in_specs=in_specs,
        out_specs=pl.BlockSpec(memory_space=pltpu.MemorySpace.VMEM),
        scratch_shapes=[
            pltpu.VMEM(packed["fc_flat_w"].shape, packed["fc_flat_w"].dtype),
            pltpu.SemaphoreType.DMA((1,)),
        ],
    )(*operands)


# ---------------------------------------------------------------------------
# One-time parameter packing (torch layouts -> kernel layouts)
# ---------------------------------------------------------------------------

def make_params(key, channels_in, channels_out, kernels, linear_in, linear_out):
    """Deterministic synthetic parameters in torch layouts (same shapes as the module)."""
    params = {"convs": [], "fcs": [], "fc_v": None}
    for i in range(len(channels_in)):
        key, kw_, kb_ = jax.random.split(key, 3)
        fan_in = channels_in[i] * kernels[i] * kernels[i]
        w = jax.random.normal(
            kw_, (channels_out[i], channels_in[i], kernels[i], kernels[i]),
            jnp.float32) * (1.0 / jnp.sqrt(fan_in))
        b = jax.random.normal(kb_, (channels_out[i],), jnp.float32) * 0.01
        params["convs"].append((w, b))
    for i in range(len(linear_in)):
        key, kw_, kb_ = jax.random.split(key, 3)
        w = jax.random.normal(kw_, (linear_out[i], linear_in[i]),
                              jnp.float32) * (1.0 / jnp.sqrt(linear_in[i]))
        b = jax.random.normal(kb_, (linear_out[i],), jnp.float32) * 0.01
        params["fcs"].append((w, b))
    key, kw_, kb_ = jax.random.split(key, 3)
    wv = jax.random.normal(kw_, (1, linear_in[-1]),
                           jnp.float32) * (1.0 / jnp.sqrt(linear_in[-1]))
    bv = jax.random.normal(kb_, (1,), jnp.float32) * 0.01
    params["fc_v"] = (wv, bv)
    return params


def pack_params(params, input_hw):
    """Repack torch-layout params for the fused lane-layout kernel (runs once)."""
    H, W = input_hw
    stride = W                                  # lane stride inside an image block
    convs, fcs = params["convs"], params["fcs"]
    n_conv = len(convs)
    # TODO(synk): support len(fcs) == 1 (dueling head directly after flatten) if needed.
    assert len(fcs) >= 2, "expects at least one hidden FC before the dueling head"

    # Spatial extents after each stride-1 VALID conv.
    hs, ws = [H], [W]
    for (w, _) in convs:
        hs.append(hs[-1] - w.shape[2] + 1)
        ws.append(ws[-1] - w.shape[3] + 1)

    # Lane extents per activation, back-computed so every tap-shifted slice fits.
    maxshift = [stride * (w.shape[2] - 1) + (w.shape[3] - 1) for (w, _) in convs]
    lane_n = [0] * (n_conv + 1)
    lane_n[n_conv] = hs[n_conv] * stride
    for i in range(n_conv - 1, 0, -1):
        lane_n[i] = max(lane_n[i + 1] + maxshift[i], stride * (hs[i] - 1) + ws[i])
    lane_n[0] = max(H * W, lane_n[1] + maxshift[0])

    packed = {"conv_w": [], "conv_b": []}
    shifts = []
    for (w, b) in convs:
        kh, kw = w.shape[2], w.shape[3]
        packed["conv_w"].append(
            jnp.transpose(w, (2, 3, 0, 1)).reshape(kh * kw, w.shape[0], w.shape[1]))
        packed["conv_b"].append(b.reshape(-1, 1))
        shifts.append(tuple(stride * di + dj for di in range(kh) for dj in range(kw)))

    c_last, h_last, w_last = convs[-1][0].shape[0], hs[-1], ws[-1]

    # First FC: permute torch's NCHW-flatten rows into per-channel [lane, hidden]
    # slabs (lane = stride*h + w); the lane-padding rows are zero.  Stored in bf16.
    w0, b0 = fcs[0]
    hid0 = w0.shape[0]
    wf = w0.reshape(hid0, c_last, h_last, w_last)
    wf = jnp.transpose(wf, (1, 2, 3, 0))                       # [C, H, W, hid]
    wf = jnp.pad(wf, ((0, 0), (0, 0), (0, stride - w_last), (0, 0)))
    packed["fc_flat_w"] = wf.reshape(c_last, h_last * stride, hid0).astype(jnp.bfloat16)
    packed["fc_flat_b"] = b0.reshape(1, -1)

    packed["mid_w"] = [fcs[i][0].T for i in range(1, len(fcs) - 1)]
    packed["mid_b"] = [fcs[i][1].reshape(1, -1) for i in range(1, len(fcs) - 1)]

    # Dueling head: [Wa | Wv] and Q = V + (A - mean(A)) folded into one matmul.
    wa, ba = fcs[-1]
    wv, bv = params["fc_v"]
    n_act = wa.shape[0]
    comb = jnp.concatenate(
        [jnp.eye(n_act, dtype=jnp.float32) - 1.0 / n_act,
         jnp.ones((1, n_act), jnp.float32)], axis=0)           # [A+1, A]
    head_w = jnp.concatenate([wa.T, wv.T], axis=1)             # [hid, A+1]
    head_b = jnp.concatenate([ba, bv])                         # [A+1]
    hi = jax.lax.Precision.HIGHEST
    packed["head_w"] = jnp.dot(head_w, comb, precision=hi)     # [hid, A]
    packed["head_b"] = jnp.dot(head_b, comb, precision=hi).reshape(1, -1)

    meta = {"n_conv": n_conv, "n_mid": len(fcs) - 2,
            "shifts": tuple(shifts), "lane_n": tuple(int(v) for v in lane_n),
            "n_actions": int(n_act)}
    return packed, meta


# ---------------------------------------------------------------------------
# Pure-JAX reference (torch layouts / NCHW), for correctness check
# ---------------------------------------------------------------------------

def nnq_dueling_reference(x, params):
    out = x
    for (w, b) in params["convs"]:
        out = jax.lax.conv_general_dilated(
            out, w, window_strides=(1, 1), padding="VALID",
            dimension_numbers=("NCHW", "OIHW", "NCHW"))
        out = jnp.maximum(out + b[None, :, None, None], 0.0)
    out = out.reshape(out.shape[0], -1)
    n = len(params["fcs"])
    out_v = out_a = None
    for i, (w, b) in enumerate(params["fcs"]):
        if i != n - 1:
            out = jnp.maximum(out @ w.T + b[None, :], 0.0)
        else:
            wv, bv = params["fc_v"]
            out_v = out @ wv.T + bv[None, :]
            out_a = out @ w.T + b[None, :]
    return out_v + (out_a - out_a.mean(axis=1, keepdims=True))


# ---------------------------------------------------------------------------
# Main
# ---------------------------------------------------------------------------

if __name__ == "__main__":
    # convs: 4->8 (3x3), 8->16 (3x3), stride 1, no padding
    # input [2, 4, 16, 16] -> [2, 8, 14, 14] -> [2, 16, 12, 12]
    # flatten 2304 -> fc 2304->128 (ReLU) -> dueling {adv 128->6, val 128->1}
    channels_in = [4, 8]
    channels_out = [8, 16]
    kernels = [3, 3]
    linear_in = [2304, 128]
    linear_out = [128, 6]

    key = jax.random.PRNGKey(0)
    key, xkey, pkey = jax.random.split(key, 3)
    x = jax.random.normal(xkey, (2, 4, 16, 16), jnp.float32)

    params = make_params(pkey, channels_in, channels_out, kernels,
                         linear_in, linear_out)
    packed, meta = pack_params(params, (16, 16))

    fwd = jax.jit(functools.partial(nnq_dueling_forward, meta=meta))
    q = jax.block_until_ready(fwd(x, packed))

    q_ref = nnq_dueling_reference(x, params)
    assert q.shape == (2, linear_out[-1]), q.shape
    # Tolerance covers bf16 first-FC weight storage and MXU default-precision behaviour.
    max_err = float(jnp.max(jnp.abs(q - q_ref)))
    assert jnp.allclose(q, q_ref, atol=2e-2, rtol=2e-2), (
        f"mismatch vs reference: max abs err = {max_err}")

    print("KERNEL_OK")
</pallas_src>

<mosaic_0001>
module attributes {stable_mosaic.version = 11 : i64} {
  func.func @_fused_dueling_kernel(%arg0: memref<4x520xf32, #tpu.memory_space<vmem>>, %arg1: memref<9x8x4xf32, #tpu.memory_space<vmem>>, %arg2: memref<8x1xf32, #tpu.memory_space<vmem>>, %arg3: memref<9x16x8xf32, #tpu.memory_space<vmem>>, %arg4: memref<16x1xf32, #tpu.memory_space<vmem>>, %arg5: memref<16x192x128xbf16, #tpu.memory_space<any>>, %arg6: memref<1x128xf32, #tpu.memory_space<vmem>>, %arg7: memref<128x6xf32, #tpu.memory_space<vmem>>, %arg8: memref<1x6xf32, #tpu.memory_space<vmem>>, %arg9: memref<2x6xf32, #tpu.memory_space<vmem>>, %arg10: memref<16x192x128xbf16, #tpu.memory_space<vmem>>, %arg11: memref<1x!tpu.dma_semaphore, #tpu.memory_space<semaphore_mem>>) attributes {dimension_semantics = [], scalar_prefetch = 0 : i64, scratch_operands = 2 : i64, tpu.core_type = #tpu.core_type<tc>} {
    %c0_i32 = arith.constant 0 : i32
    %0 = tpu.memref_slice %arg11[%c0_i32] : memref<1x!tpu.dma_semaphore, #tpu.memory_space<semaphore_mem>> -> memref<1x!tpu.dma_semaphore, #tpu.memory_space<semaphore_mem>>
    %1 = tpu.memref_squeeze %0 : memref<1x!tpu.dma_semaphore, #tpu.memory_space<semaphore_mem>> -> memref<!tpu.dma_semaphore, #tpu.memory_space<semaphore_mem>>
    tpu.enqueue_dma source(%arg5 : memref<16x192x128xbf16, #tpu.memory_space<any>>) target(%arg10 : memref<16x192x128xbf16, #tpu.memory_space<vmem>>) target_semaphore(%1 : memref<!tpu.dma_semaphore, #tpu.memory_space<semaphore_mem>>)
    %c0 = arith.constant 0 : index
    %c0_0 = arith.constant 0 : index
    %2 = vector.load %arg0[%c0, %c0_0] : memref<4x520xf32, #tpu.memory_space<vmem>>, vector<4x520xf32>
    %c0_1 = arith.constant 0 : index
    %c0_2 = arith.constant 0 : index
    %3 = vector.load %arg2[%c0_1, %c0_2] : memref<8x1xf32, #tpu.memory_space<vmem>>, vector<8x1xf32>
    %cst = arith.constant 0.000000e+00 : f32
    %4 = vector.broadcast %cst : f32 to vector<8x486xf32>
    %c0_3 = arith.constant 0 : index
    %c0_4 = arith.constant 0 : index
    %c0_5 = arith.constant 0 : index
    %5 = vector.load %arg1[%c0_3, %c0_4, %c0_5] : memref<9x8x4xf32, #tpu.memory_space<vmem>>, vector<1x8x4xf32>
    %6 = vector.shape_cast %5 : vector<1x8x4xf32> to vector<8x4xf32>
    %7 = vector.extract_strided_slice %2 {offsets = [0, 0], sizes = [4, 486], strides = [1, 1]} : vector<4x520xf32> to vector<4x486xf32>
    %cst_6 = arith.constant dense<0.000000e+00> : vector<8x486xf32>
    %8 = tpu.matmul %6, %7, %cst_6 {dimension_numbers = #tpu.dot_dimension_numbers<[1], [0], [0], [1], [0, 0, 1, 1], [], []>} : vector<8x4xf32>, vector<4x486xf32>, vector<8x486xf32> -> vector<8x486xf32>
    %9 = arith.addf %4, %8 : vector<8x486xf32>
    %c1 = arith.constant 1 : index
    %c0_7 = arith.constant 0 : index
    %c0_8 = arith.constant 0 : index
    %10 = vector.load %arg1[%c1, %c0_7, %c0_8] : memref<9x8x4xf32, #tpu.memory_space<vmem>>, vector<1x8x4xf32>
    %11 = vector.shape_cast %10 : vector<1x8x4xf32> to vector<8x4xf32>
    %12 = vector.extract_strided_slice %2 {offsets = [0, 1], sizes = [4, 486], strides = [1, 1]} : vector<4x520xf32> to vector<4x486xf32>
    %cst_9 = arith.constant dense<0.000000e+00> : vector<8x486xf32>
    %13 = tpu.matmul %11, %12, %cst_9 {dimension_numbers = #tpu.dot_dimension_numbers<[1], [0], [0], [1], [0, 0, 1, 1], [], []>} : vector<8x4xf32>, vector<4x486xf32>, vector<8x486xf32> -> vector<8x486xf32>
    %14 = arith.addf %9, %13 : vector<8x486xf32>
    %c2 = arith.constant 2 : index
    %c0_10 = arith.constant 0 : index
    %c0_11 = arith.constant 0 : index
    %15 = vector.load %arg1[%c2, %c0_10, %c0_11] : memref<9x8x4xf32, #tpu.memory_space<vmem>>, vector<1x8x4xf32>
    %16 = vector.shape_cast %15 : vector<1x8x4xf32> to vector<8x4xf32>
    %17 = vector.extract_strided_slice %2 {offsets = [0, 2], sizes = [4, 486], strides = [1, 1]} : vector<4x520xf32> to vector<4x486xf32>
    %cst_12 = arith.constant dense<0.000000e+00> : vector<8x486xf32>
    %18 = tpu.matmul %16, %17, %cst_12 {dimension_numbers = #tpu.dot_dimension_numbers<[1], [0], [0], [1], [0, 0, 1, 1], [], []>} : vector<8x4xf32>, vector<4x486xf32>, vector<8x486xf32> -> vector<8x486xf32>
    %19 = arith.addf %14, %18 : vector<8x486xf32>
    %c3 = arith.constant 3 : index
    %c0_13 = arith.constant 0 : index
    %c0_14 = arith.constant 0 : index
    %20 = vector.load %arg1[%c3, %c0_13, %c0_14] : memref<9x8x4xf32, #tpu.memory_space<vmem>>, vector<1x8x4xf32>
    %21 = vector.shape_cast %20 : vector<1x8x4xf32> to vector<8x4xf32>
    %22 = vector.extract_strided_slice %2 {offsets = [0, 16], sizes = [4, 486], strides = [1, 1]} : vector<4x520xf32> to vector<4x486xf32>
    %cst_15 = arith.constant dense<0.000000e+00> : vector<8x486xf32>
    %23 = tpu.matmul %21, %22, %cst_15 {dimension_numbers = #tpu.dot_dimension_numbers<[1], [0], [0], [1], [0, 0, 1, 1], [], []>} : vector<8x4xf32>, vector<4x486xf32>, vector<8x486xf32> -> vector<8x486xf32>
    %24 = arith.addf %19, %23 : vector<8x486xf32>
    %c4 = arith.constant 4 : index
    %c0_16 = arith.constant 0 : index
    %c0_17 = arith.constant 0 : index
    %25 = vector.load %arg1[%c4, %c0_16, %c0_17] : memref<9x8x4xf32, #tpu.memory_space<vmem>>, vector<1x8x4xf32>
    %26 = vector.shape_cast %25 : vector<1x8x4xf32> to vector<8x4xf32>
    %27 = vector.extract_strided_slice %2 {offsets = [0, 17], sizes = [4, 486], strides = [1, 1]} : vector<4x520xf32> to vector<4x486xf32>
    %cst_18 = arith.constant dense<0.000000e+00> : vector<8x486xf32>
    %28 = tpu.matmul %26, %27, %cst_18 {dimension_numbers = #tpu.dot_dimension_numbers<[1], [0], [0], [1], [0, 0, 1, 1], [], []>} : vector<8x4xf32>, vector<4x486xf32>, vector<8x486xf32> -> vector<8x486xf32>
    %29 = arith.addf %24, %28 : vector<8x486xf32>
    %c5 = arith.constant 5 : index
    %c0_19 = arith.constant 0 : index
    %c0_20 = arith.constant 0 : index
    %30 = vector.load %arg1[%c5, %c0_19, %c0_20] : memref<9x8x4xf32, #tpu.memory_space<vmem>>, vector<1x8x4xf32>
    %31 = vector.shape_cast %30 : vector<1x8x4xf32> to vector<8x4xf32>
    %32 = vector.extract_strided_slice %2 {offsets = [0, 18], sizes = [4, 486], strides = [1, 1]} : vector<4x520xf32> to vector<4x486xf32>
    %cst_21 = arith.constant dense<0.000000e+00> : vector<8x486xf32>
    %33 = tpu.matmul %31, %32, %cst_21 {dimension_numbers = #tpu.dot_dimension_numbers<[1], [0], [0], [1], [0, 0, 1, 1], [], []>} : vector<8x4xf32>, vector<4x486xf32>, vector<8x486xf32> -> vector<8x486xf32>
    %34 = arith.addf %29, %33 : vector<8x486xf32>
    %c6 = arith.constant 6 : index
    %c0_22 = arith.constant 0 : index
    %c0_23 = arith.constant 0 : index
    %35 = vector.load %arg1[%c6, %c0_22, %c0_23] : memref<9x8x4xf32, #tpu.memory_space<vmem>>, vector<1x8x4xf32>
    %36 = vector.shape_cast %35 : vector<1x8x4xf32> to vector<8x4xf32>
    %37 = vector.extract_strided_slice %2 {offsets = [0, 32], sizes = [4, 486], strides = [1, 1]} : vector<4x520xf32> to vector<4x486xf32>
    %cst_24 = arith.constant dense<0.000000e+00> : vector<8x486xf32>
    %38 = tpu.matmul %36, %37, %cst_24 {dimension_numbers = #tpu.dot_dimension_numbers<[1], [0], [0], [1], [0, 0, 1, 1], [], []>} : vector<8x4xf32>, vector<4x486xf32>, vector<8x486xf32> -> vector<8x486xf32>
    %39 = arith.addf %34, %38 : vector<8x486xf32>
    %c7 = arith.constant 7 : index
    %c0_25 = arith.constant 0 : index
    %c0_26 = arith.constant 0 : index
    %40 = vector.load %arg1[%c7, %c0_25, %c0_26] : memref<9x8x4xf32, #tpu.memory_space<vmem>>, vector<1x8x4xf32>
    %41 = vector.shape_cast %40 : vector<1x8x4xf32> to vector<8x4xf32>
    %42 = vector.extract_strided_slice %2 {offsets = [0, 33], sizes = [4, 486], strides = [1, 1]} : vector<4x520xf32> to vector<4x486xf32>
    %cst_27 = arith.constant dense<0.000000e+00> : vector<8x486xf32>
    %43 = tpu.matmul %41, %42, %cst_27 {dimension_numbers = #tpu.dot_dimension_numbers<[1], [0], [0], [1], [0, 0, 1, 1], [], []>} : vector<8x4xf32>, vector<4x486xf32>, vector<8x486xf32> -> vector<8x486xf32>
    %44 = arith.addf %39, %43 : vector<8x486xf32>
    %c8 = arith.constant 8 : index
    %c0_28 = arith.constant 0 : index
    %c0_29 = arith.constant 0 : index
    %45 = vector.load %arg1[%c8, %c0_28, %c0_29] : memref<9x8x4xf32, #tpu.memory_space<vmem>>, vector<1x8x4xf32>
    %46 = vector.shape_cast %45 : vector<1x8x4xf32> to vector<8x4xf32>
    %47 = vector.extract_strided_slice %2 {offsets = [0, 34], sizes = [4, 486], strides = [1, 1]} : vector<4x520xf32> to vector<4x486xf32>
    %cst_30 = arith.constant dense<0.000000e+00> : vector<8x486xf32>
    %48 = tpu.matmul %46, %47, %cst_30 {dimension_numbers = #tpu.dot_dimension_numbers<[1], [0], [0], [1], [0, 0, 1, 1], [], []>} : vector<8x4xf32>, vector<4x486xf32>, vector<8x486xf32> -> vector<8x486xf32>
    %49 = arith.addf %44, %48 : vector<8x486xf32>
    %50 = vector.broadcast %3 : vector<8x1xf32> to vector<8x486xf32>
    %51 = arith.addf %49, %50 : vector<8x486xf32>
    %cst_31 = arith.constant 0.000000e+00 : f32
    %52 = vector.broadcast %cst_31 : f32 to vector<8x486xf32>
    %53 = arith.maximumf %51, %52 : vector<8x486xf32>
    %c0_32 = arith.constant 0 : index
    %c0_33 = arith.constant 0 : index
    %54 = vector.load %arg4[%c0_32, %c0_33] : memref<16x1xf32, #tpu.memory_space<vmem>>, vector<16x1xf32>
    %cst_34 = arith.constant 0.000000e+00 : f32
    %55 = vector.broadcast %cst_34 : f32 to vector<16x452xf32>
    %c0_35 = arith.constant 0 : index
    %c0_36 = arith.constant 0 : index
    %c0_37 = arith.constant 0 : index
    %56 = vector.load %arg3[%c0_35, %c0_36, %c0_37] : memref<9x16x8xf32, #tpu.memory_space<vmem>>, vector<1x16x8xf32>
    %57 = vector.shape_cast %56 : vector<1x16x8xf32> to vector<16x8xf32>
    %58 = vector.extract_strided_slice %53 {offsets = [0, 0], sizes = [8, 452], strides = [1, 1]} : vector<8x486xf32> to vector<8x452xf32>
    %cst_38 = arith.constant dense<0.000000e+00> : vector<16x452xf32>
    %59 = tpu.matmul %57, %58, %cst_38 {dimension_numbers = #tpu.dot_dimension_numbers<[1], [0], [0], [1], [0, 0, 1, 1], [], []>} : vector<16x8xf32>, vector<8x452xf32>, vector<16x452xf32> -> vector<16x452xf32>
    %60 = arith.addf %55, %59 : vector<16x452xf32>
    %c1_39 = arith.constant 1 : index
    %c0_40 = arith.constant 0 : index
    %c0_41 = arith.constant 0 : index
    %61 = vector.load %arg3[%c1_39, %c0_40, %c0_41] : memref<9x16x8xf32, #tpu.memory_space<vmem>>, vector<1x16x8xf32>
    %62 = vector.shape_cast %61 : vector<1x16x8xf32> to vector<16x8xf32>
    %63 = vector.extract_strided_slice %53 {offsets = [0, 1], sizes = [8, 452], strides = [1, 1]} : vector<8x486xf32> to vector<8x452xf32>
    %cst_42 = arith.constant dense<0.000000e+00> : vector<16x452xf32>
    %64 = tpu.matmul %62, %63, %cst_42 {dimension_numbers = #tpu.dot_dimension_numbers<[1], [0], [0], [1], [0, 0, 1, 1], [], []>} : vector<16x8xf32>, vector<8x452xf32>, vector<16x452xf32> -> vector<16x452xf32>
    %65 = arith.addf %60, %64 : vector<16x452xf32>
    %c2_43 = arith.constant 2 : index
    %c0_44 = arith.constant 0 : index
    %c0_45 = arith.constant 0 : index
    %66 = vector.load %arg3[%c2_43, %c0_44, %c0_45] : memref<9x16x8xf32, #tpu.memory_space<vmem>>, vector<1x16x8xf32>
    %67 = vector.shape_cast %66 : vector<1x16x8xf32> to vector<16x8xf32>
    %68 = vector.extract_strided_slice %53 {offsets = [0, 2], sizes = [8, 452], strides = [1, 1]} : vector<8x486xf32> to vector<8x452xf32>
    %cst_46 = arith.constant dense<0.000000e+00> : vector<16x452xf32>
    %69 = tpu.matmul %67, %68, %cst_46 {dimension_numbers = #tpu.dot_dimension_numbers<[1], [0], [0], [1], [0, 0, 1, 1], [], []>} : vector<16x8xf32>, vector<8x452xf32>, vector<16x452xf32> -> vector<16x452xf32>
    %70 = arith.addf %65, %69 : vector<16x452xf32>
    %c3_47 = arith.constant 3 : index
    %c0_48 = arith.constant 0 : index
    %c0_49 = arith.constant 0 : index
    %71 = vector.load %arg3[%c3_47, %c0_48, %c0_49] : memref<9x16x8xf32, #tpu.memory_space<vmem>>, vector<1x16x8xf32>
    %72 = vector.shape_cast %71 : vector<1x16x8xf32> to vector<16x8xf32>
    %73 = vector.extract_strided_slice %53 {offsets = [0, 16], sizes = [8, 452], strides = [1, 1]} : vector<8x486xf32> to vector<8x452xf32>
    %cst_50 = arith.constant dense<0.000000e+00> : vector<16x452xf32>
    %74 = tpu.matmul %72, %73, %cst_50 {dimension_numbers = #tpu.dot_dimension_numbers<[1], [0], [0], [1], [0, 0, 1, 1], [], []>} : vector<16x8xf32>, vector<8x452xf32>, vector<16x452xf32> -> vector<16x452xf32>
    %75 = arith.addf %70, %74 : vector<16x452xf32>
    %c4_51 = arith.constant 4 : index
    %c0_52 = arith.constant 0 : index
    %c0_53 = arith.constant 0 : index
    %76 = vector.load %arg3[%c4_51, %c0_52, %c0_53] : memref<9x16x8xf32, #tpu.memory_space<vmem>>, vector<1x16x8xf32>
    %77 = vector.shape_cast %76 : vector<1x16x8xf32> to vector<16x8xf32>
    %78 = vector.extract_strided_slice %53 {offsets = [0, 17], sizes = [8, 452], strides = [1, 1]} : vector<8x486xf32> to vector<8x452xf32>
    %cst_54 = arith.constant dense<0.000000e+00> : vector<16x452xf32>
    %79 = tpu.matmul %77, %78, %cst_54 {dimension_numbers = #tpu.dot_dimension_numbers<[1], [0], [0], [1], [0, 0, 1, 1], [], []>} : vector<16x8xf32>, vector<8x452xf32>, vector<16x452xf32> -> vector<16x452xf32>
    %80 = arith.addf %75, %79 : vector<16x452xf32>
    %c5_55 = arith.constant 5 : index
    %c0_56 = arith.constant 0 : index
    %c0_57 = arith.constant 0 : index
    %81 = vector.load %arg3[%c5_55, %c0_56, %c0_57] : memref<9x16x8xf32, #tpu.memory_space<vmem>>, vector<1x16x8xf32>
    %82 = vector.shape_cast %81 : vector<1x16x8xf32> to vector<16x8xf32>
    %83 = vector.extract_strided_slice %53 {offsets = [0, 18], sizes = [8, 452], strides = [1, 1]} : vector<8x486xf32> to vector<8x452xf32>
    %cst_58 = arith.constant dense<0.000000e+00> : vector<16x452xf32>
    %84 = tpu.matmul %82, %83, %cst_58 {dimension_numbers = #tpu.dot_dimension_numbers<[1], [0], [0], [1], [0, 0, 1, 1], [], []>} : vector<16x8xf32>, vector<8x452xf32>, vector<16x452xf32> -> vector<16x452xf32>
    %85 = arith.addf %80, %84 : vector<16x452xf32>
    %c6_59 = arith.constant 6 : index
    %c0_60 = arith.constant 0 : index
    %c0_61 = arith.constant 0 : index
    %86 = vector.load %arg3[%c6_59, %c0_60, %c0_61] : memref<9x16x8xf32, #tpu.memory_space<vmem>>, vector<1x16x8xf32>
    %87 = vector.shape_cast %86 : vector<1x16x8xf32> to vector<16x8xf32>
    %88 = vector.extract_strided_slice %53 {offsets = [0, 32], sizes = [8, 452], strides = [1, 1]} : vector<8x486xf32> to vector<8x452xf32>
    %cst_62 = arith.constant dense<0.000000e+00> : vector<16x452xf32>
    %89 = tpu.matmul %87, %88, %cst_62 {dimension_numbers = #tpu.dot_dimension_numbers<[1], [0], [0], [1], [0, 0, 1, 1], [], []>} : vector<16x8xf32>, vector<8x452xf32>, vector<16x452xf32> -> vector<16x452xf32>
    %90 = arith.addf %85, %89 : vector<16x452xf32>
    %c7_63 = arith.constant 7 : index
    %c0_64 = arith.constant 0 : index
    %c0_65 = arith.constant 0 : index
    %91 = vector.load %arg3[%c7_63, %c0_64, %c0_65] : memref<9x16x8xf32, #tpu.memory_space<vmem>>, vector<1x16x8xf32>
    %92 = vector.shape_cast %91 : vector<1x16x8xf32> to vector<16x8xf32>
    %93 = vector.extract_strided_slice %53 {offsets = [0, 33], sizes = [8, 452], strides = [1, 1]} : vector<8x486xf32> to vector<8x452xf32>
    %cst_66 = arith.constant dense<0.000000e+00> : vector<16x452xf32>
    %94 = tpu.matmul %92, %93, %cst_66 {dimension_numbers = #tpu.dot_dimension_numbers<[1], [0], [0], [1], [0, 0, 1, 1], [], []>} : vector<16x8xf32>, vector<8x452xf32>, vector<16x452xf32> -> vector<16x452xf32>
    %95 = arith.addf %90, %94 : vector<16x452xf32>
    %c8_67 = arith.constant 8 : index
    %c0_68 = arith.constant 0 : index
    %c0_69 = arith.constant 0 : index
    %96 = vector.load %arg3[%c8_67, %c0_68, %c0_69] : memref<9x16x8xf32, #tpu.memory_space<vmem>>, vector<1x16x8xf32>
    %97 = vector.shape_cast %96 : vector<1x16x8xf32> to vector<16x8xf32>
    %98 = vector.extract_strided_slice %53 {offsets = [0, 34], sizes = [8, 452], strides = [1, 1]} : vector<8x486xf32> to vector<8x452xf32>
    %cst_70 = arith.constant dense<0.000000e+00> : vector<16x452xf32>
    %99 = tpu.matmul %97, %98, %cst_70 {dimension_numbers = #tpu.dot_dimension_numbers<[1], [0], [0], [1], [0, 0, 1, 1], [], []>} : vector<16x8xf32>, vector<8x452xf32>, vector<16x452xf32> -> vector<16x452xf32>
    %100 = arith.addf %95, %99 : vector<16x452xf32>
    %101 = vector.broadcast %54 : vector<16x1xf32> to vector<16x452xf32>
    %102 = arith.addf %100, %101 : vector<16x452xf32>
    %cst_71 = arith.constant 0.000000e+00 : f32
    %103 = vector.broadcast %cst_71 : f32 to vector<16x452xf32>
    %104 = arith.maximumf %102, %103 : vector<16x452xf32>
    %105 = arith.truncf %104 : vector<16x452xf32> to vector<16x452xbf16>
    %c0_i32_72 = arith.constant 0 : i32
    %106 = tpu.memref_slice %arg11[%c0_i32_72] : memref<1x!tpu.dma_semaphore, #tpu.memory_space<semaphore_mem>> -> memref<1x!tpu.dma_semaphore, #tpu.memory_space<semaphore_mem>>
    %107 = tpu.memref_squeeze %106 : memref<1x!tpu.dma_semaphore, #tpu.memory_space<semaphore_mem>> -> memref<!tpu.dma_semaphore, #tpu.memory_space<semaphore_mem>>
    tpu.wait_dma2 semaphore(%107 : memref<!tpu.dma_semaphore, #tpu.memory_space<semaphore_mem>>) src(%arg5 : memref<16x192x128xbf16, #tpu.memory_space<any>>) dst(%arg10 : memref<16x192x128xbf16, #tpu.memory_space<vmem>>)
    %108 = vector.extract_strided_slice %105 {offsets = [0, 0], sizes = [1, 192], strides = [1, 1]} : vector<16x452xbf16> to vector<1x192xbf16>
    %109 = vector.extract_strided_slice %105 {offsets = [0, 260], sizes = [1, 192], strides = [1, 1]} : vector<16x452xbf16> to vector<1x192xbf16>
    %110 = tpu.concatenate %108, %109 in 0 : vector<1x192xbf16>, vector<1x192xbf16> -> vector<2x192xbf16>
    %c0_73 = arith.constant 0 : index
    %c0_74 = arith.constant 0 : index
    %c0_75 = arith.constant 0 : index
    %111 = vector.load %arg10[%c0_73, %c0_74, %c0_75] : memref<16x192x128xbf16, #tpu.memory_space<vmem>>, vector<1x192x128xbf16>
    %112 = vector.shape_cast %111 : vector<1x192x128xbf16> to vector<192x128xbf16>
    %cst_76 = arith.constant dense<0.000000e+00> : vector<2x128xf32>
    %113 = tpu.matmul %110, %112, %cst_76 {dimension_numbers = #tpu.dot_dimension_numbers<[1], [0], [0], [1], [0, 0, 1, 1], [], []>} : vector<2x192xbf16>, vector<192x128xbf16>, vector<2x128xf32> -> vector<2x128xf32>
    %114 = vector.extract_strided_slice %105 {offsets = [1, 0], sizes = [1, 192], strides = [1, 1]} : vector<16x452xbf16> to vector<1x192xbf16>
    %115 = vector.extract_strided_slice %105 {offsets = [1, 260], sizes = [1, 192], strides = [1, 1]} : vector<16x452xbf16> to vector<1x192xbf16>
    %116 = tpu.concatenate %114, %115 in 0 : vector<1x192xbf16>, vector<1x192xbf16> -> vector<2x192xbf16>
    %c1_77 = arith.constant 1 : index
    %c0_78 = arith.constant 0 : index
    %c0_79 = arith.constant 0 : index
    %117 = vector.load %arg10[%c1_77, %c0_78, %c0_79] : memref<16x192x128xbf16, #tpu.memory_space<vmem>>, vector<1x192x128xbf16>
    %118 = vector.shape_cast %117 : vector<1x192x128xbf16> to vector<192x128xbf16>
    %cst_80 = arith.constant dense<0.000000e+00> : vector<2x128xf32>
    %119 = tpu.matmul %116, %118, %cst_80 {dimension_numbers = #tpu.dot_dimension_numbers<[1], [0], [0], [1], [0, 0, 1, 1], [], []>} : vector<2x192xbf16>, vector<192x128xbf16>, vector<2x128xf32> -> vector<2x128xf32>
    %120 = arith.addf %113, %119 : vector<2x128xf32>
    %121 = vector.extract_strided_slice %105 {offsets = [2, 0], sizes = [1, 192], strides = [1, 1]} : vector<16x452xbf16> to vector<1x192xbf16>
    %122 = vector.extract_strided_slice %105 {offsets = [2, 260], sizes = [1, 192], strides = [1, 1]} : vector<16x452xbf16> to vector<1x192xbf16>
    %123 = tpu.concatenate %121, %122 in 0 : vector<1x192xbf16>, vector<1x192xbf16> -> vector<2x192xbf16>
    %c2_81 = arith.constant 2 : index
    %c0_82 = arith.constant 0 : index
    %c0_83 = arith.constant 0 : index
    %124 = vector.load %arg10[%c2_81, %c0_82, %c0_83] : memref<16x192x128xbf16, #tpu.memory_space<vmem>>, vector<1x192x128xbf16>
    %125 = vector.shape_cast %124 : vector<1x192x128xbf16> to vector<192x128xbf16>
    %cst_84 = arith.constant dense<0.000000e+00> : vector<2x128xf32>
    %126 = tpu.matmul %123, %125, %cst_84 {dimension_numbers = #tpu.dot_dimension_numbers<[1], [0], [0], [1], [0, 0, 1, 1], [], []>} : vector<2x192xbf16>, vector<192x128xbf16>, vector<2x128xf32> -> vector<2x128xf32>
    %127 = arith.addf %120, %126 : vector<2x128xf32>
    %128 = vector.extract_strided_slice %105 {offsets = [3, 0], sizes = [1, 192], strides = [1, 1]} : vector<16x452xbf16> to vector<1x192xbf16>
    %129 = vector.extract_strided_slice %105 {offsets = [3, 260], sizes = [1, 192], strides = [1, 1]} : vector<16x452xbf16> to vector<1x192xbf16>
    %130 = tpu.concatenate %128, %129 in 0 : vector<1x192xbf16>, vector<1x192xbf16> -> vector<2x192xbf16>
    %c3_85 = arith.constant 3 : index
    %c0_86 = arith.constant 0 : index
    %c0_87 = arith.constant 0 : index
    %131 = vector.load %arg10[%c3_85, %c0_86, %c0_87] : memref<16x192x128xbf16, #tpu.memory_space<vmem>>, vector<1x192x128xbf16>
    %132 = vector.shape_cast %131 : vector<1x192x128xbf16> to vector<192x128xbf16>
    %cst_88 = arith.constant dense<0.000000e+00> : vector<2x128xf32>
    %133 = tpu.matmul %130, %132, %cst_88 {dimension_numbers = #tpu.dot_dimension_numbers<[1], [0], [0], [1], [0, 0, 1, 1], [], []>} : vector<2x192xbf16>, vector<192x128xbf16>, vector<2x128xf32> -> vector<2x128xf32>
    %134 = arith.addf %127, %133 : vector<2x128xf32>
    %135 = vector.extract_strided_slice %105 {offsets = [4, 0], sizes = [1, 192], strides = [1, 1]} : vector<16x452xbf16> to vector<1x192xbf16>
    %136 = vector.extract_strided_slice %105 {offsets = [4, 260], sizes = [1, 192], strides = [1, 1]} : vector<16x452xbf16> to vector<1x192xbf16>
    %137 = tpu.concatenate %135, %136 in 0 : vector<1x192xbf16>, vector<1x192xbf16> -> vector<2x192xbf16>
    %c4_89 = arith.constant 4 : index
    %c0_90 = arith.constant 0 : index
    %c0_91 = arith.constant 0 : index
    %138 = vector.load %arg10[%c4_89, %c0_90, %c0_91] : memref<16x192x128xbf16, #tpu.memory_space<vmem>>, vector<1x192x128xbf16>
    %139 = vector.shape_cast %138 : vector<1x192x128xbf16> to vector<192x128xbf16>
    %cst_92 = arith.constant dense<0.000000e+00> : vector<2x128xf32>
    %140 = tpu.matmul %137, %139, %cst_92 {dimension_numbers = #tpu.dot_dimension_numbers<[1], [0], [0], [1], [0, 0, 1, 1], [], []>} : vector<2x192xbf16>, vector<192x128xbf16>, vector<2x128xf32> -> vector<2x128xf32>
    %141 = arith.addf %134, %140 : vector<2x128xf32>
    %142 = vector.extract_strided_slice %105 {offsets = [5, 0], sizes = [1, 192], strides = [1, 1]} : vector<16x452xbf16> to vector<1x192xbf16>
    %143 = vector.extract_strided_slice %105 {offsets = [5, 260], sizes = [1, 192], strides = [1, 1]} : vector<16x452xbf16> to vector<1x192xbf16>
    %144 = tpu.concatenate %142, %143 in 0 : vector<1x192xbf16>, vector<1x192xbf16> -> vector<2x192xbf16>
    %c5_93 = arith.constant 5 : index
    %c0_94 = arith.constant 0 : index
    %c0_95 = arith.constant 0 : index
    %145 = vector.load %arg10[%c5_93, %c0_94, %c0_95] : memref<16x192x128xbf16, #tpu.memory_space<vmem>>, vector<1x192x128xbf16>
    %146 = vector.shape_cast %145 : vector<1x192x128xbf16> to vector<192x128xbf16>
    %cst_96 = arith.constant dense<0.000000e+00> : vector<2x128xf32>
    %147 = tpu.matmul %144, %146, %cst_96 {dimension_numbers = #tpu.dot_dimension_numbers<[1], [0], [0], [1], [0, 0, 1, 1], [], []>} : vector<2x192xbf16>, vector<192x128xbf16>, vector<2x128xf32> -> vector<2x128xf32>
    %148 = arith.addf %141, %147 : vector<2x128xf32>
    %149 = vector.extract_strided_slice %105 {offsets = [6, 0], sizes = [1, 192], strides = [1, 1]} : vector<16x452xbf16> to vector<1x192xbf16>
    %150 = vector.extract_strided_slice %105 {offsets = [6, 260], sizes = [1, 192], strides = [1, 1]} : vector<16x452xbf16> to vector<1x192xbf16>
    %151 = tpu.concatenate %149, %150 in 0 : vector<1x192xbf16>, vector<1x192xbf16> -> vector<2x192xbf16>
    %c6_97 = arith.constant 6 : index
    %c0_98 = arith.constant 0 : index
    %c0_99 = arith.constant 0 : index
    %152 = vector.load %arg10[%c6_97, %c0_98, %c0_99] : memref<16x192x128xbf16, #tpu.memory_space<vmem>>, vector<1x192x128xbf16>
    %153 = vector.shape_cast %152 : vector<1x192x128xbf16> to vector<192x128xbf16>
    %cst_100 = arith.constant dense<0.000000e+00> : vector<2x128xf32>
    %154 = tpu.matmul %151, %153, %cst_100 {dimension_numbers = #tpu.dot_dimension_numbers<[1], [0], [0], [1], [0, 0, 1, 1], [], []>} : vector<2x192xbf16>, vector<192x128xbf16>, vector<2x128xf32> -> vector<2x128xf32>
    %155 = arith.addf %148, %154 : vector<2x128xf32>
    %156 = vector.extract_strided_slice %105 {offsets = [7, 0], sizes = [1, 192], strides = [1, 1]} : vector<16x452xbf16> to vector<1x192xbf16>
    %157 = vector.extract_strided_slice %105 {offsets = [7, 260], sizes = [1, 192], strides = [1, 1]} : vector<16x452xbf16> to vector<1x192xbf16>
    %158 = tpu.concatenate %156, %157 in 0 : vector<1x192xbf16>, vector<1x192xbf16> -> vector<2x192xbf16>
    %c7_101 = arith.constant 7 : index
    %c0_102 = arith.constant 0 : index
    %c0_103 = arith.constant 0 : index
    %159 = vector.load %arg10[%c7_101, %c0_102, %c0_103] : memref<16x192x128xbf16, #tpu.memory_space<vmem>>, vector<1x192x128xbf16>
    %160 = vector.shape_cast %159 : vector<1x192x128xbf16> to vector<192x128xbf16>
    %cst_104 = arith.constant dense<0.000000e+00> : vector<2x128xf32>
    %161 = tpu.matmul %158, %160, %cst_104 {dimension_numbers = #tpu.dot_dimension_numbers<[1], [0], [0], [1], [0, 0, 1, 1], [], []>} : vector<2x192xbf16>, vector<192x128xbf16>, vector<2x128xf32> -> vector<2x128xf32>
    %162 = arith.addf %155, %161 : vector<2x128xf32>
    %163 = vector.extract_strided_slice %105 {offsets = [8, 0], sizes = [1, 192], strides = [1, 1]} : vector<16x452xbf16> to vector<1x192xbf16>
    %164 = vector.extract_strided_slice %105 {offsets = [8, 260], sizes = [1, 192], strides = [1, 1]} : vector<16x452xbf16> to vector<1x192xbf16>
    %165 = tpu.concatenate %163, %164 in 0 : vector<1x192xbf16>, vector<1x192xbf16> -> vector<2x192xbf16>
    %c8_105 = arith.constant 8 : index
    %c0_106 = arith.constant 0 : index
    %c0_107 = arith.constant 0 : index
    %166 = vector.load %arg10[%c8_105, %c0_106, %c0_107] : memref<16x192x128xbf16, #tpu.memory_space<vmem>>, vector<1x192x128xbf16>
    %167 = vector.shape_cast %166 : vector<1x192x128xbf16> to vector<192x128xbf16>
    %cst_108 = arith.constant dense<0.000000e+00> : vector<2x128xf32>
    %168 = tpu.matmul %165, %167, %cst_108 {dimension_numbers = #tpu.dot_dimension_numbers<[1], [0], [0], [1], [0, 0, 1, 1], [], []>} : vector<2x192xbf16>, vector<192x128xbf16>, vector<2x128xf32> -> vector<2x128xf32>
    %169 = arith.addf %162, %168 : vector<2x128xf32>
    %170 = vector.extract_strided_slice %105 {offsets = [9, 0], sizes = [1, 192], strides = [1, 1]} : vector<16x452xbf16> to vector<1x192xbf16>
    %171 = vector.extract_strided_slice %105 {offsets = [9, 260], sizes = [1, 192], strides = [1, 1]} : vector<16x452xbf16> to vector<1x192xbf16>
    %172 = tpu.concatenate %170, %171 in 0 : vector<1x192xbf16>, vector<1x192xbf16> -> vector<2x192xbf16>
    %c9 = arith.constant 9 : index
    %c0_109 = arith.constant 0 : index
    %c0_110 = arith.constant 0 : index
    %173 = vector.load %arg10[%c9, %c0_109, %c0_110] : memref<16x192x128xbf16, #tpu.memory_space<vmem>>, vector<1x192x128xbf16>
    %174 = vector.shape_cast %173 : vector<1x192x128xbf16> to vector<192x128xbf16>
    %cst_111 = arith.constant dense<0.000000e+00> : vector<2x128xf32>
    %175 = tpu.matmul %172, %174, %cst_111 {dimension_numbers = #tpu.dot_dimension_numbers<[1], [0], [0], [1], [0, 0, 1, 1], [], []>} : vector<2x192xbf16>, vector<192x128xbf16>, vector<2x128xf32> -> vector<2x128xf32>
    %176 = arith.addf %169, %175 : vector<2x128xf32>
    %177 = vector.extract_strided_slice %105 {offsets = [10, 0], sizes = [1, 192], strides = [1, 1]} : vector<16x452xbf16> to vector<1x192xbf16>
    %178 = vector.extract_strided_slice %105 {offsets = [10, 260], sizes = [1, 192], strides = [1, 1]} : vector<16x452xbf16> to vector<1x192xbf16>
    %179 = tpu.concatenate %177, %178 in 0 : vector<1x192xbf16>, vector<1x192xbf16> -> vector<2x192xbf16>
    %c10 = arith.constant 10 : index
    %c0_112 = arith.constant 0 : index
    %c0_113 = arith.constant 0 : index
    %180 = vector.load %arg10[%c10, %c0_112, %c0_113] : memref<16x192x128xbf16, #tpu.memory_space<vmem>>, vector<1x192x128xbf16>
    %181 = vector.shape_cast %180 : vector<1x192x128xbf16> to vector<192x128xbf16>
    %cst_114 = arith.constant dense<0.000000e+00> : vector<2x128xf32>
    %182 = tpu.matmul %179, %181, %cst_114 {dimension_numbers = #tpu.dot_dimension_numbers<[1], [0], [0], [1], [0, 0, 1, 1], [], []>} : vector<2x192xbf16>, vector<192x128xbf16>, vector<2x128xf32> -> vector<2x128xf32>
    %183 = arith.addf %176, %182 : vector<2x128xf32>
    %184 = vector.extract_strided_slice %105 {offsets = [11, 0], sizes = [1, 192], strides = [1, 1]} : vector<16x452xbf16> to vector<1x192xbf16>
    %185 = vector.extract_strided_slice %105 {offsets = [11, 260], sizes = [1, 192], strides = [1, 1]} : vector<16x452xbf16> to vector<1x192xbf16>
    %186 = tpu.concatenate %184, %185 in 0 : vector<1x192xbf16>, vector<1x192xbf16> -> vector<2x192xbf16>
    %c11 = arith.constant 11 : index
    %c0_115 = arith.constant 0 : index
    %c0_116 = arith.constant 0 : index
    %187 = vector.load %arg10[%c11, %c0_115, %c0_116] : memref<16x192x128xbf16, #tpu.memory_space<vmem>>, vector<1x192x128xbf16>
    %188 = vector.shape_cast %187 : vector<1x192x128xbf16> to vector<192x128xbf16>
    %cst_117 = arith.constant dense<0.000000e+00> : vector<2x128xf32>
    %189 = tpu.matmul %186, %188, %cst_117 {dimension_numbers = #tpu.dot_dimension_numbers<[1], [0], [0], [1], [0, 0, 1, 1], [], []>} : vector<2x192xbf16>, vector<192x128xbf16>, vector<2x128xf32> -> vector<2x128xf32>
    %190 = arith.addf %183, %189 : vector<2x128xf32>
    %191 = vector.extract_strided_slice %105 {offsets = [12, 0], sizes = [1, 192], strides = [1, 1]} : vector<16x452xbf16> to vector<1x192xbf16>
    %192 = vector.extract_strided_slice %105 {offsets = [12, 260], sizes = [1, 192], strides = [1, 1]} : vector<16x452xbf16> to vector<1x192xbf16>
    %193 = tpu.concatenate %191, %192 in 0 : vector<1x192xbf16>, vector<1x192xbf16> -> vector<2x192xbf16>
    %c12 = arith.constant 12 : index
    %c0_118 = arith.constant 0 : index
    %c0_119 = arith.constant 0 : index
    %194 = vector.load %arg10[%c12, %c0_118, %c0_119] : memref<16x192x128xbf16, #tpu.memory_space<vmem>>, vector<1x192x128xbf16>
    %195 = vector.shape_cast %194 : vector<1x192x128xbf16> to vector<192x128xbf16>
    %cst_120 = arith.constant dense<0.000000e+00> : vector<2x128xf32>
    %196 = tpu.matmul %193, %195, %cst_120 {dimension_numbers = #tpu.dot_dimension_numbers<[1], [0], [0], [1], [0, 0, 1, 1], [], []>} : vector<2x192xbf16>, vector<192x128xbf16>, vector<2x128xf32> -> vector<2x128xf32>
    %197 = arith.addf %190, %196 : vector<2x128xf32>
    %198 = vector.extract_strided_slice %105 {offsets = [13, 0], sizes = [1, 192], strides = [1, 1]} : vector<16x452xbf16> to vector<1x192xbf16>
    %199 = vector.extract_strided_slice %105 {offsets = [13, 260], sizes = [1, 192], strides = [1, 1]} : vector<16x452xbf16> to vector<1x192xbf16>
    %200 = tpu.concatenate %198, %199 in 0 : vector<1x192xbf16>, vector<1x192xbf16> -> vector<2x192xbf16>
    %c13 = arith.constant 13 : index
    %c0_121 = arith.constant 0 : index
    %c0_122 = arith.constant 0 : index
    %201 = vector.load %arg10[%c13, %c0_121, %c0_122] : memref<16x192x128xbf16, #tpu.memory_space<vmem>>, vector<1x192x128xbf16>
    %202 = vector.shape_cast %201 : vector<1x192x128xbf16> to vector<192x128xbf16>
    %cst_123 = arith.constant dense<0.000000e+00> : vector<2x128xf32>
    %203 = tpu.matmul %200, %202, %cst_123 {dimension_numbers = #tpu.dot_dimension_numbers<[1], [0], [0], [1], [0, 0, 1, 1], [], []>} : vector<2x192xbf16>, vector<192x128xbf16>, vector<2x128xf32> -> vector<2x128xf32>
    %204 = arith.addf %197, %203 : vector<2x128xf32>
    %205 = vector.extract_strided_slice %105 {offsets = [14, 0], sizes = [1, 192], strides = [1, 1]} : vector<16x452xbf16> to vector<1x192xbf16>
    %206 = vector.extract_strided_slice %105 {offsets = [14, 260], sizes = [1, 192], strides = [1, 1]} : vector<16x452xbf16> to vector<1x192xbf16>
    %207 = tpu.concatenate %205, %206 in 0 : vector<1x192xbf16>, vector<1x192xbf16> -> vector<2x192xbf16>
    %c14 = arith.constant 14 : index
    %c0_124 = arith.constant 0 : index
    %c0_125 = arith.constant 0 : index
    %208 = vector.load %arg10[%c14, %c0_124, %c0_125] : memref<16x192x128xbf16, #tpu.memory_space<vmem>>, vector<1x192x128xbf16>
    %209 = vector.shape_cast %208 : vector<1x192x128xbf16> to vector<192x128xbf16>
    %cst_126 = arith.constant dense<0.000000e+00> : vector<2x128xf32>
    %210 = tpu.matmul %207, %209, %cst_126 {dimension_numbers = #tpu.dot_dimension_numbers<[1], [0], [0], [1], [0, 0, 1, 1], [], []>} : vector<2x192xbf16>, vector<192x128xbf16>, vector<2x128xf32> -> vector<2x128xf32>
    %211 = arith.addf %204, %210 : vector<2x128xf32>
    %212 = vector.extract_strided_slice %105 {offsets = [15, 0], sizes = [1, 192], strides = [1, 1]} : vector<16x452xbf16> to vector<1x192xbf16>
    %213 = vector.extract_strided_slice %105 {offsets = [15, 260], sizes = [1, 192], strides = [1, 1]} : vector<16x452xbf16> to vector<1x192xbf16>
    %214 = tpu.concatenate %212, %213 in 0 : vector<1x192xbf16>, vector<1x192xbf16> -> vector<2x192xbf16>
    %c15 = arith.constant 15 : index
    %c0_127 = arith.constant 0 : index
    %c0_128 = arith.constant 0 : index
    %215 = vector.load %arg10[%c15, %c0_127, %c0_128] : memref<16x192x128xbf16, #tpu.memory_space<vmem>>, vector<1x192x128xbf16>
    %216 = vector.shape_cast %215 : vector<1x192x128xbf16> to vector<192x128xbf16>
    %cst_129 = arith.constant dense<0.000000e+00> : vector<2x128xf32>
    %217 = tpu.matmul %214, %216, %cst_129 {dimension_numbers = #tpu.dot_dimension_numbers<[1], [0], [0], [1], [0, 0, 1, 1], [], []>} : vector<2x192xbf16>, vector<192x128xbf16>, vector<2x128xf32> -> vector<2x128xf32>
    %218 = arith.addf %211, %217 : vector<2x128xf32>
    %c0_130 = arith.constant 0 : index
    %c0_131 = arith.constant 0 : index
    %219 = vector.load %arg6[%c0_130, %c0_131] : memref<1x128xf32, #tpu.memory_space<vmem>>, vector<1x128xf32>
    %220 = vector.broadcast %219 : vector<1x128xf32> to vector<2x128xf32>
    %221 = arith.addf %218, %220 : vector<2x128xf32>
    %cst_132 = arith.constant 0.000000e+00 : f32
    %222 = vector.broadcast %cst_132 : f32 to vector<2x128xf32>
    %223 = arith.maximumf %221, %222 : vector<2x128xf32>
    %c0_133 = arith.constant 0 : index
    %c0_134 = arith.constant 0 : index
    %224 = vector.load %arg7[%c0_133, %c0_134] : memref<128x6xf32, #tpu.memory_space<vmem>>, vector<128x6xf32>
    %cst_135 = arith.constant dense<0.000000e+00> : vector<2x6xf32>
    %225 = tpu.matmul %223, %224, %cst_135 {dimension_numbers = #tpu.dot_dimension_numbers<[1], [0], [0], [1], [0, 0, 1, 1], [], []>} : vector<2x128xf32>, vector<128x6xf32>, vector<2x6xf32> -> vector<2x6xf32>
    %c0_136 = arith.constant 0 : index
    %c0_137 = arith.constant 0 : index
    %226 = vector.load %arg8[%c0_136, %c0_137] : memref<1x6xf32, #tpu.memory_space<vmem>>, vector<1x6xf32>
    %227 = vector.broadcast %226 : vector<1x6xf32> to vector<2x6xf32>
    %228 = arith.addf %225, %227 : vector<2x6xf32>
    %c0_138 = arith.constant 0 : index
    %c0_139 = arith.constant 0 : index
    %229 = vector.load %arg9[%c0_138, %c0_139] : memref<2x6xf32, #tpu.memory_space<vmem>>, vector<2x6xf32>
    tpu.vector_store %arg9[%c0_138, %c0_139], %228 {strides = array<i32>} : memref<2x6xf32, #tpu.memory_space<vmem>>, vector<2x6xf32>,
    return
  }
}

</mosaic_0001>

<bundles_post_ra>
// kernel: nnq_dueling_forward.1
= control target key start
LH: loop header
LB: loop body
LE: loop exit
PB: predicated region body
PF: predicated region fallthrough
CT: control target
= control target key end

     0   :  { %s4974_s13 = smov 127   ;;  %vm70_vm0 = vcmask 1043456   ;;  %v4975_v4 = vmov 0.0   ;;  %s6018_s0 = inlined_call_operand.vmem [shape: f32[4,520], index: 0, kind: input, shape index: {}]   ;;  %s6019_s1 = inlined_call_operand.vmem [shape: f32[9,8,4], index: 1, kind: input, shape index: {}]   ;;  %s6020_s2 = inlined_call_operand.vmem [shape: f32[8,1], index: 2, kind: input, shape index: {}]   ;;  %s6021_s3 = inlined_call_operand.vmem [shape: f32[9,16,8], index: 3, kind: input, shape index: {}]   ;;  %s6022_s4 = inlined_call_operand.vmem [shape: f32[16,1], index: 4, kind: input, shape index: {}]   ;;  %s6023_s5 = inlined_call_operand.hbm [shape: bf16[16,192,128], index: 5, kind: input, shape index: {}]   ;;  %s6024_s6 = inlined_call_operand.vmem [shape: f32[1,128], index: 6, kind: input, shape index: {}]   ;;  %s6025_s7 = inlined_call_operand.vmem [shape: f32[128,6], index: 7, kind: input, shape index: {}]   ;;  %s6026_s8 = inlined_call_operand.vmem [shape: f32[1,6], index: 8, kind: input, shape index: {}]   ;;  %s6027_s9 = inlined_call_operand.hbm [shape: f32[2,6], index: 9, kind: output, shape index: {}]  }
   0x1   :  { %v43_v0 = vld [vmem:[%s6018_s0] sm:$0xff]  ;;  %v5045_v1 = vld [vmem:[%s6018_s0 + $0x8] sm:$0xff]  ;;  %143 = vmatprep.mubr.f32.mxu1 %v4975_v4 }
   0x2   :  { %54 = vrot.lane.b32.xlu1 %v43_v0, %s4974_s13  ;;  %v52_v2 = vcombine.high %v43_v0, %v43_v0  ;;  %v5050_v3 = vcombine.high %v5045_v1, %v5045_v1  ;;  %v5057_v5 = vld [vmem:[%s6019_s1] sm:$0xff] }
   0x4   :  { %56 = vrot.lane.b32.xlu0 %v52_v2, %s4974_s13 }
   0x5   :  { %14 = vsyncpa [#allocation5], 0  ;;  %4569 = vmatprep.subr.msk.mxu0 %vm70_vm0, %v52_v2  ;;  %296 = vmatprep.mubr.f32.mxu0 %v4975_v4  ;;  %vm66_vm1 = vcmask 31744   ;;  %s4976_s16 = smov 126   ;;  %s4977_s17 = smov 112   ;;  %v4983_v7 = vmov 0  }
   0x6   :  { %60 = vrot.lane.b32.xlu1 %v5050_v3, %s4974_s13  ;;  %4570 = vmatpush1.msk.msra.mxu0 %vm70_vm0, %v43_v0  ;;  %s4978_s18 = smov 111   ;;  %s4979_s19 = smov 110   ;;  %v45_v6 = vld [vmem:[%s6018_s0 + $0x10] sm:$0xf]  ;;  %v46_v8 = vld [vmem:[%s6020_s2] sm:$0xff]  ;;  %vm62_vm2 = vcmask 1039360  }
   0x7   :  { %4571 = vmatmul.mubr.msk.f32.vlgmr.msra.gmra.mrb[0].mxu0 %vm66_vm1, %v5057_v5  ;;  %s4980_s20 = smov 96   ;;  %s4981_s23 = smov 95   ;;  %4882 = vset.pattern.permute.xlu1 %v4983_v7  ;;  %v4562_v14 = vld [vmem:[%s6019_s1 + $0x8] sm:$0xff]  ;;  %vm384_vm3 = vcmask 1031168   ;;  %v4575_v22 = vld [vmem:[%s6019_s1 + $0x10] sm:$0xff]  ;;  %vm555_vm4 = vcmask 916480  }
   0x8   :  { %58 = vrot.lane.b32.xlu0 %v5045_v1, %s4974_s13  ;;  %463 = vmatprep.mubr.f32.mxu0 %v4975_v4  ;;  %s4982_s24 = smov 94   ;;  %v4582_v30 = vld [vmem:[%s6019_s1 + $0x18] sm:$0xff]  ;;  %vm726_vm5 = vcmask 908288   ;;  %v4589_v38 = vld [vmem:[%s6019_s1 + $0x20] sm:$0xff]  ;;  %vm897_vm6 = vcmask 900096   ;;  %v4596_v46 = vld [vmem:[%s6019_s1 + $0x28] sm:$0xff] }
   0x9   :  { %4883 = vset.pattern.permute.xlu0 %v4983_v7  ;;  %vm1071_vm7 = vcmask 785408   ;;  %v4603_v54 = vld [vmem:[%s6019_s1 + $0x30] sm:$0xff]  ;;  %vm1245_vm8 = vcmask 777216   ;;  %vm1419_vm9 = vcmask 769024   ;;  %vm1620_vm10 = vcmask 64512   ;;  %s4926_s14 = scalar_lea.hbm %s6023_s5, 24576 }
   0xa   :  { %380 = vrot.lane.b32.xlu1 %v5045_v1, %s4976_s16  ;;  %p4927_p0 = scmp.ne.s32.totalorder %s6023_s5, %s4926_s14  ;;  %p4930_p1 = scmp.lt.u32.totalorder %s4926_s14, %s6023_s5 }
   0xc   :  { %378 = vrot.lane.b32.xlu0 %v52_v2, %s4976_s16  ;;  %p4932_p2 = pnand %p4930_p1, %p4927_p0 }
   0xe   :  { %382 = vrot.lane.b32.xlu1 %v5050_v3, %s4976_s16 }
  0x10   :  { %376 = vrot.lane.b32.xlu0 %v43_v0, %s4976_s16 }
  0x12   :  { %551 = vrot.lane.b32.xlu1 %v5045_v1, %s4977_s17 }
  0x14   :  { %549 = vrot.lane.b32.xlu0 %v52_v2, %s4977_s17 }
  0x16   :  { %553 = vrot.lane.b32.xlu1 %v5050_v3, %s4977_s17 }
  0x18   :  { %547 = vrot.lane.b32.xlu0 %v43_v0, %s4977_s17 }
  0x1a   :  { %722 = vrot.lane.b32.xlu1 %v5045_v1, %s4978_s18 }
  0x1c   :  { %720 = vrot.lane.b32.xlu0 %v52_v2, %s4978_s18 }
  0x1e   :  { %724 = vrot.lane.b32.xlu1 %v5050_v3, %s4978_s18 }
  0x20   :  { %718 = vrot.lane.b32.xlu0 %v43_v0, %s4978_s18 }
  0x22   :  { %893 = vrot.lane.b32.xlu1 %v5045_v1, %s4979_s19 }
  0x24   :  { %891 = vrot.lane.b32.xlu0 %v52_v2, %s4979_s19 }
  0x26   :  { %895 = vrot.lane.b32.xlu1 %v5050_v3, %s4979_s19 }
  0x28   :  { %889 = vrot.lane.b32.xlu0 %v43_v0, %s4979_s19 }
  0x2a   :  { %1065 = vrot.lane.b32.xlu1 %v5045_v1, %s4980_s20 }
  0x2c   :  { %1063 = vrot.lane.b32.xlu0 %v52_v2, %s4980_s20 }
  0x2e   :  { %1067 = vrot.lane.b32.xlu1 %v5050_v3, %s4980_s20 }
  0x30   :  { %1061 = vrot.lane.b32.xlu0 %v43_v0, %s4980_s20 }
  0x32   :  { %1237 = vrot.lane.b32.xlu1 %v52_v2, %s4981_s23 }
  0x34   :  { %1069 = vrot.lane.b32.xlu0 %v45_v6, %s4980_s20 }
  0x36   :  { %1235 = vrot.lane.b32.xlu1 %v43_v0, %s4981_s23 }
  0x38   :  { %1239 = vrot.lane.b32.xlu0 %v5045_v1, %s4981_s23 }
  0x3a   :  { %1243 = vrot.lane.b32.xlu1 %v45_v6, %s4981_s23 }
  0x3c   :  { %1241 = vrot.lane.b32.xlu0 %v5050_v3, %s4981_s23 }
  0x3e   :  { %1413 = vrot.lane.b32.xlu1 %v5045_v1, %s4982_s24 }
  0x40   :  { %1411 = vrot.lane.b32.xlu0 %v52_v2, %s4982_s24 }
  0x42   :  { %1415 = vrot.lane.b32.xlu1 %v5050_v3, %s4982_s24 }
  0x44   :  { %1409 = vrot.lane.b32.xlu0 %v43_v0, %s4982_s24  ;;  %v4610_v0 = vld [vmem:[%s6019_s1 + $0x38] sm:$0xff] }
  0x46   :  { %1583 = vperm.xlu1 %4882, %v46_v8  }
  0x48   :  { %1417 = vrot.lane.b32.xlu0 %v45_v6, %s4982_s24 }
  0x74   :  { %v55_v9 = vpop.permute.xlu1 %54 }
  0x76   :  { %v57_v10 = vpop.permute.xlu0 %56 }
  0x77   :  { %v63_v16 = vsel %vm62_vm2, %v55_v9, %v57_v10 }
  0x78   :  { %v61_v11 = vpop.permute.xlu1 %60 }
  0x7a   :  { %v59_v12 = vpop.permute.xlu0 %58 }
  0x7b   :  { %v64_v13 = vsel %vm62_vm2, %v57_v10, %v59_v12  ;;  %v65_v17 = vsel %vm62_vm2, %v59_v12, %v61_v11 }
  0x7c   :  { %4563 = vmatprep.subr.msk.mxu1 %vm70_vm0, %v64_v13  ;;  %v381_v15 = vpop.permute.xlu1 %380 }
  0x7d   :  { %4564 = vmatpush1.msk.msra.mxu1 %vm70_vm0, %v63_v16 }
  0x7e   :  { %4565 = vmatmul.mubr.msk.f32.vlgmr.msra.gmra.mrb[0].mxu1 %vm66_vm1, %v4562_v14  ;;  %4566 = vmatprep.subr.msk.mxu1 %vm70_vm0, %v61_v11  ;;  %v379_v18 = vpop.permute.xlu0 %378  ;;  %v4617_v11 = vld [vmem:[%s6019_s1 + $0x40] sm:$0xff] }
  0x7f   :  { %v386_v19 = vsel %vm384_vm3, %v379_v18, %v381_v15  ;;  %4567 = vmatpush1.msk.msra.mxu1 %vm70_vm0, %v65_v17  ;;  %214 = vmatprep.mubr.f32.mxu1 %v4975_v4 }
  0x80   :  { %4576 = vmatprep.subr.msk.mxu0 %vm70_vm0, %v386_v19  ;;  %v383_v20 = vpop.permute.xlu1 %382  ;;  %4572 = vmatprep.subr.msk.mxu1 %vm70_vm0, %v5050_v3 }
  0x81   :  { %v387_v28 = vsel %vm384_vm3, %v381_v15, %v383_v20 }
  0x82   :  { %4568 = vmatmul.mubr.msk.f32.vlgmr.msra.gmra.mrb[2].mxu1 %vm66_vm1, %v4562_v14  ;;  %v377_v21 = vpop.permute.xlu0 %376 }
  0x83   :  { %v385_v23 = vsel %vm384_vm3, %v377_v21, %v379_v18  ;;  %4573 = vmatpush1.msk.msra.mxu1 %vm70_vm0, %v5045_v1  ;;  %367 = vmatprep.mubr.f32.mxu1 %v4975_v4 }
  0x84   :  { %4577 = vmatpush1.msk.msra.mxu0 %vm70_vm0, %v385_v23  ;;  %v552_v24 = vpop.permute.xlu1 %551  ;;  %4579 = vmatprep.subr.msk.mxu1 %vm70_vm0, %v383_v20 }
  0x85   :  { %4578 = vmatmul.mubr.msk.f32.vlgmr.msra.gmra.mrb[0].mxu0 %vm66_vm1, %v4575_v22 }
  0x86   :  { %v550_v25 = vpop.permute.xlu0 %549  ;;  %634 = vmatprep.mubr.f32.mxu0 %v4975_v4 }
  0x87   :  { %v557_v26 = vsel %vm555_vm4, %v550_v25, %v552_v24 }
  0x88   :  { %4583 = vmatprep.subr.msk.mxu0 %vm70_vm0, %v557_v26  ;;  %v554_v27 = vpop.permute.xlu1 %553 }
  0x89   :  { %v558_v36 = vsel %vm555_vm4, %v552_v24, %v554_v27 }
  0x8a   :  { %4574 = vmatmul.mubr.msk.f32.vlgmr.msra.gmra.mrb[2].mxu1 %vm66_vm1, %v5057_v5  ;;  %v548_v29 = vpop.permute.xlu0 %547 }
  0x8b   :  { %4580 = vmatpush1.msk.msra.mxu1 %vm70_vm0, %v387_v28  ;;  %v556_v31 = vsel %vm555_vm4, %v548_v29, %v550_v25  ;;  %534 = vmatprep.mubr.f32.mxu1 %v4975_v4  ;;  %v5247_v28 = vld [vmem:[%s6021_s3] sm:$0xff] }
  0x8c   :  { %4584 = vmatpush1.msk.msra.mxu0 %vm70_vm0, %v556_v31  ;;  %v723_v32 = vpop.permute.xlu1 %722  ;;  %4586 = vmatprep.subr.msk.mxu1 %vm70_vm0, %v554_v27 }
  0x8d   :  { %4585 = vmatmul.mubr.msk.f32.vlgmr.msra.gmra.mrb[0].mxu0 %vm66_vm1, %v4582_v30 }
  0x8e   :  { %v721_v33 = vpop.permute.xlu0 %720  ;;  %805 = vmatprep.mubr.f32.mxu0 %v4975_v4 }
  0x8f   :  { %v728_v34 = vsel %vm726_vm5, %v721_v33, %v723_v32 }
  0x90   :  { %4590 = vmatprep.subr.msk.mxu0 %vm70_vm0, %v728_v34  ;;  %v725_v35 = vpop.permute.xlu1 %724 }
  0x91   :  { %v729_v44 = vsel %vm726_vm5, %v723_v32, %v725_v35  ;;  %v5256_v32 = vld [vmem:[%s6021_s3 + $0x8] sm:$0xff] }
  0x92   :  { %4581 = vmatmul.mubr.msk.f32.vlgmr.msra.gmra.mrb[2].mxu1 %vm66_vm1, %v4575_v22  ;;  %v719_v37 = vpop.permute.xlu0 %718 }
  0x93   :  { %4587 = vmatpush1.msk.msra.mxu1 %vm70_vm0, %v558_v36  ;;  %v727_v39 = vsel %vm726_vm5, %v719_v37, %v721_v33  ;;  %705 = vmatprep.mubr.f32.mxu1 %v4975_v4  ;;  %v1595_v36 = vld [vmem:[%s6022_s4 + $0x8] sm:$0xff]  ;;  %v1594_v37 = vld [vmem:[%s6022_s4] sm:$0xff] }
  0x94   :  { %4591 = vmatpush1.msk.msra.mxu0 %vm70_vm0, %v727_v39  ;;  %v894_v40 = vpop.permute.xlu1 %893  ;;  %4593 = vmatprep.subr.msk.mxu1 %vm70_vm0, %v725_v35 }
  0x95   :  { %4592 = vmatmul.mubr.msk.f32.vlgmr.msra.gmra.mrb[0].mxu0 %vm66_vm1, %v4589_v38 }
  0x96   :  { %v892_v41 = vpop.permute.xlu0 %891  ;;  %976 = vmatprep.mubr.f32.mxu0 %v4975_v4 }
  0x97   :  { %v899_v42 = vsel %vm897_vm6, %v892_v41, %v894_v40 }
  0x98   :  { %4597 = vmatprep.subr.msk.mxu0 %vm70_vm0, %v899_v42  ;;  %v896_v43 = vpop.permute.xlu1 %895  ;;  %v4624_v42 = vld [vmem:[%s6021_s3 + $0x10] sm:$0xff] }
  0x99   :  { %v900_v52 = vsel %vm897_vm6, %v894_v40, %v896_v43 }
  0x9a   :  { %4588 = vmatmul.mubr.msk.f32.vlgmr.msra.gmra.mrb[2].mxu1 %vm66_vm1, %v4582_v30  ;;  %v890_v45 = vpop.permute.xlu0 %889 }
  0x9b   :  { %4594 = vmatpush1.msk.msra.mxu1 %vm70_vm0, %v729_v44  ;;  %v898_v47 = vsel %vm897_vm6, %v890_v45, %v892_v41  ;;  %876 = vmatprep.mubr.f32.mxu1 %v4975_v4 }
  0x9c   :  { %4598 = vmatpush1.msk.msra.mxu0 %vm70_vm0, %v898_v47  ;;  %v1066_v48 = vpop.permute.xlu1 %1065  ;;  %4600 = vmatprep.subr.msk.mxu1 %vm70_vm0, %v896_v43  ;;  %v4625_v47 = vld [vmem:[%s6021_s3 + $0x18] sm:$0xff] }
  0x9d   :  { %4599 = vmatmul.mubr.msk.f32.vlgmr.msra.gmra.mrb[0].mxu0 %vm66_vm1, %v4596_v46 }
  0x9e   :  { %v1064_v49 = vpop.permute.xlu0 %1063  ;;  %1151 = vmatprep.mubr.f32.mxu0 %v4975_v4 }
  0x9f   :  { %v1073_v50 = vsel %vm1071_vm7, %v1064_v49, %v1066_v48 }
  0xa0   :  { %4604 = vmatprep.subr.msk.mxu0 %vm70_vm0, %v1073_v50  ;;  %v1068_v51 = vpop.permute.xlu1 %1067 }
  0xa1   :  { %v1074_v60 = vsel %vm1071_vm7, %v1066_v48, %v1068_v51 }
  0xa2   :  { %4595 = vmatmul.mubr.msk.f32.vlgmr.msra.gmra.mrb[2].mxu1 %vm66_vm1, %v4589_v38  ;;  %v1062_v53 = vpop.permute.xlu0 %1061 }
  0xa3   :  { %4601 = vmatpush1.msk.msra.mxu1 %vm70_vm0, %v900_v52  ;;  %v1072_v55 = vsel %vm1071_vm7, %v1062_v53, %v1064_v49  ;;  %1047 = vmatprep.mubr.f32.mxu1 %v4975_v4 }
  0xa4   :  { %4605 = vmatpush1.msk.msra.mxu0 %vm70_vm0, %v1072_v55  ;;  %v1238_v56 = vpop.permute.xlu1 %1237  ;;  %v4635_v55 = vld [vmem:[%s6021_s3 + $0x28] sm:$0xff] }
  0xa5   :  { %4606 = vmatmul.mubr.msk.f32.vlgmr.msra.gmra.mrb[0].mxu0 %vm66_vm1, %v4603_v54 }
  0xa6   :  { %v1070_v57 = vpop.permute.xlu0 %1069  ;;  %1325 = vmatprep.mubr.f32.mxu0 %v4975_v4 }
  0xa7   :  { %v1075_v58 = vsel %vm1071_vm7, %v1068_v51, %v1070_v57  ;;  %v4634_v51 = vld [vmem:[%s6021_s3 + $0x20] sm:$0xff] }
  0xa8   :  { %4607 = vmatprep.subr.msk.mxu1 %vm70_vm0, %v1075_v58  ;;  %v1236_v59 = vpop.permute.xlu1 %1235 }
  0xa9   :  { %v1246_v61 = vsel %vm1245_vm8, %v1236_v59, %v1238_v56  ;;  %v4640_v59 = vld [vmem:[%s6021_s3 + $0x30] sm:$0xff] }
  0xaa   :  { %4602 = vmatmul.mubr.msk.f32.vlgmr.msra.gmra.mrb[2].mxu1 %vm66_vm1, %v4596_v46  ;;  %v1240_v62 = vpop.permute.xlu0 %1239 }
  0xab   :  { %4608 = vmatpush1.msk.msra.mxu1 %vm70_vm0, %v1074_v60  ;;  %v1247_v63 = vsel %vm1245_vm8, %v1238_v56, %v1240_v62  ;;  %1222 = vmatprep.mubr.f32.mxu1 %v4975_v4 }
  0xac   :  { %4611 = vmatprep.subr.msk.mxu0 %vm70_vm0, %v1247_v63  ;;  %v1244_v1 = vpop.permute.xlu1 %1243 }
  0xad   :  { %4612 = vmatpush1.msk.msra.mxu0 %vm70_vm0, %v1246_v61 }
  0xae   :  { %v1242_v2 = vpop.permute.xlu0 %1241  ;;  %4613 = vmatmul.mubr.msk.f32.vlgmr.msra.gmra.mrb[0].mxu0 %vm66_vm1, %v4610_v0 }
  0xaf   :  { %v1249_v3 = vsel %vm1245_vm8, %v1242_v2, %v1244_v1  ;;  %1499 = vmatprep.mubr.f32.mxu0 %v4975_v4  ;;  %v1248_v6 = vsel %vm1245_vm8, %v1240_v62, %v1242_v2 }
  0xb0   :  { %4614 = vmatprep.subr.msk.mxu1 %vm70_vm0, %v1249_v3  ;;  %v1414_v5 = vpop.permute.xlu1 %1413 }
  0xb2   :  { %4609 = vmatmul.mubr.msk.f32.vlgmr.msra.gmra.mrb[2].mxu1 %vm66_vm1, %v4603_v54  ;;  %v1412_v8 = vpop.permute.xlu0 %1411 }
  0xb3   :  { %4615 = vmatpush1.msk.msra.mxu1 %vm70_vm0, %v1248_v6  ;;  %v1421_v9 = vsel %vm1419_vm9, %v1412_v8, %v1414_v5  ;;  %1396 = vmatprep.mubr.f32.mxu1 %v4975_v4 }
  0xb4   :  { %4618 = vmatprep.subr.msk.mxu0 %vm70_vm0, %v1421_v9  ;;  %v1416_v13 = vpop.permute.xlu1 %1415 }
  0xb5   :  { %v1422_v16 = vsel %vm1419_vm9, %v1414_v5, %v1416_v13  ;;  %v4646_v5 = vld [vmem:[%s6021_s3 + $0x40] sm:$0xff] }
  0xb6   :  { %v1410_v10 = vpop.permute.xlu0 %1409 }
  0xb7   :  { %v1420_v12 = vsel %vm1419_vm9, %v1410_v10, %v1412_v8 }
  0xb8   :  { %4619 = vmatpush1.msk.msra.mxu0 %vm70_vm0, %v1420_v12 }
  0xb9   :  { %4620 = vmatmul.mubr.msk.f32.vlgmr.msra.gmra.mrb[0].mxu0 %vm66_vm1, %v4617_v11 }
  0xba   :  { %4616 = vmatmul.mubr.msk.f32.vlgmr.msra.gmra.mrb[2].mxu1 %vm66_vm1, %v4610_v0  ;;  %v1418_v14 = vpop.permute.xlu0 %1417  ;;  %1851 = vmatprep.mubr.f32.mxu0 %v4975_v4  ;;  %v4641_v0 = vld [vmem:[%s6021_s3 + $0x38] sm:$0xff] }
  0xbb   :  { %v1423_v15 = vsel %vm1419_vm9, %v1416_v13, %v1418_v14  ;;  %1570 = vmatprep.mubr.f32.mxu1 %v4975_v4 }
  0xbc   :  { %4621 = vmatprep.subr.msk.mxu1 %vm70_vm0, %v1423_v15  ;;  %v4652_v15 = vld [vmem:[%s6021_s3 + $0x50] sm:$0xff] }
  0xbd   :  { %4622 = vmatpush1.msk.msra.mxu1 %vm70_vm0, %v1422_v16 }
  0xc2   :  { %4623 = vmatmul.mubr.msk.f32.vlgmr.msra.gmra.mrb[2].mxu1 %vm66_vm1, %v4617_v11  ;;  %v4647_v11 = vld [vmem:[%s6021_s3 + $0x48] sm:$0xff] }
  0xc3   :  { %1691 = vmatprep.mubr.f32.mxu1 %v4975_v4 }
  0xc5   :  { %v1584_v20 = vpop.permute.xlu1 %1583 }
 0x151   :  { %v145_v17 = vpop.f32.mrb[0].mxu1 }
 0x152   :  { %v147_v18 = vpop.f32.mrb[1].mxu1 }
 0x18c   :  { %v1501_v19 = vpop.f32.mrb[0].mxu0 }
 0x18d   :  { %v4771_v21 = vadd.f32 %v1501_v19, %v145_v17  ;;  %v1503_v22 = vpop.f32.mrb[1].mxu0 }
 0x18e   :  { %v4772_v23 = vadd.f32 %v1503_v22, %v147_v18 }
 0x18f   :  { %v1586_v24 = vadd.f32 %v4771_v21, %v1584_v20 }
 0x190   :  { %v1587_v25 = vadd.f32 %v4772_v23, %v1584_v20 }
 0x191   :  { %v1590_v27 = vmax.f32 %v1586_v24, 0.0  ;;  %v4658_v24 = vld [vmem:[%s6021_s3 + $0x60] sm:$0xff] }
 0x192   :  { %v1591_v26 = vmax.f32 %v1587_v25, 0.0 }
 0x194   :  { %1607 = vrot.lane.b32.xlu0 %v1591_v26, %s4974_s13  ;;  %1787 = vmatprep.subr.mxu0 %v1591_v26 }
 0x195   :  { %v1572_v29 = vpop.f32.mrb[2].mxu1  ;;  %1788 = vmatpush1.msra.mxu0 %v1590_v27 }
 0x196   :  { %v1588_v30 = vadd.f32 %v1584_v20, %v1572_v29  ;;  %v1574_v31 = vpop.f32.mrb[3].mxu1  ;;  %4630 = vmatmul.mubr.msk.f32.vlgmr.msra.gmra.mrb[2].mxu0 %vm1620_vm10, %v5247_v28  ;;  %v4659_v29 = vld [vmem:[%s6021_s3 + $0x68] sm:$0xff] }
 0x197   :  { %1857 = vmatprep.mubr.f32.mxu0 %v4975_v4  ;;  %v1589_v34 = vadd.f32 %v1584_v20, %v1574_v31  ;;  %v4653_v20 = vld [vmem:[%s6021_s3 + $0x58] sm:$0xff] }
 0x198   :  { %v5258_v33 = vmax.f32 %v1588_v30, 0.0  ;;  %1605 = vrot.lane.b32.xlu0 %v1590_v27, %s4974_s13 }
 0x199   :  { %v1593_v35 = vmax.f32 %v1589_v34, 0.0 }
 0x19a   :  { %1609 = vrot.lane.b32.xlu1 %v5258_v33, %s4974_s13  ;;  %4631 = vmatmul.mubr.msk.f32.gmra.mrb[4].mxu0 %vm1620_vm10, %v5256_v32 }
 0x19b   :  { %2029 = vmatprep.mubr.f32.mxu0 %v4975_v4 }
 0x19c   :  { %1946 = vrot.lane.b32.xlu0 %v1591_v26, %s4976_s16 }
 0x19e   :  { %1611 = vrot.lane.b32.xlu1 %v1593_v35, %s4974_s13 }
 0x1a0   :  { %1944 = vrot.lane.b32.xlu0 %v1590_v27, %s4976_s16 }
 0x1a2   :  { %1948 = vrot.lane.b32.xlu1 %v5258_v33, %s4976_s16 }
 0x1a4   :  { %2132 = vrot.lane.b32.xlu0 %v1591_v26, %s4977_s17 }
 0x1a6   :  { %1950 = vrot.lane.b32.xlu1 %v1593_v35, %s4976_s16 }
 0x1a8   :  { %2130 = vrot.lane.b32.xlu0 %v1590_v27, %s4977_s17 }
 0x1aa   :  { %2134 = vrot.lane.b32.xlu1 %v5258_v33, %s4977_s17 }
 0x1ac   :  { %2318 = vrot.lane.b32.xlu0 %v1591_v26, %s4978_s18 }
 0x1ae   :  { %2136 = vrot.lane.b32.xlu1 %v1593_v35, %s4977_s17 }
 0x1b0   :  { %2316 = vrot.lane.b32.xlu0 %v1590_v27, %s4978_s18 }
 0x1b2   :  { %2320 = vrot.lane.b32.xlu1 %v5258_v33, %s4978_s18 }
 0x1b4   :  { %2504 = vrot.lane.b32.xlu0 %v1591_v26, %s4979_s19 }
 0x1b6   :  { %2322 = vrot.lane.b32.xlu1 %v1593_v35, %s4978_s18 }
 0x1b8   :  { %2502 = vrot.lane.b32.xlu0 %v1590_v27, %s4979_s19 }
 0x1ba   :  { %2506 = vrot.lane.b32.xlu1 %v5258_v33, %s4979_s19 }
 0x1bc   :  { %2690 = vrot.lane.b32.xlu0 %v1591_v26, %s4980_s20 }
 0x1be   :  { %2508 = vrot.lane.b32.xlu1 %v1593_v35, %s4979_s19 }
 0x1c0   :  { %2688 = vrot.lane.b32.xlu0 %v1590_v27, %s4980_s20 }
 0x1c2   :  { %2692 = vrot.lane.b32.xlu1 %v5258_v33, %s4980_s20 }
 0x1c4   :  { %2876 = vrot.lane.b32.xlu0 %v1591_v26, %s4981_s23 }
 0x1c6   :  { %2694 = vrot.lane.b32.xlu1 %v1593_v35, %s4980_s20 }
 0x1c8   :  { %2874 = vrot.lane.b32.xlu0 %v1590_v27, %s4981_s23 }
 0x1ca   :  { %2878 = vrot.lane.b32.xlu1 %v5258_v33, %s4981_s23 }
 0x1cc   :  { %3062 = vrot.lane.b32.xlu0 %v1591_v26, %s4982_s24 }
 0x1ce   :  { %2880 = vrot.lane.b32.xlu1 %v1593_v35, %s4981_s23 }
 0x1d0   :  { %3060 = vrot.lane.b32.xlu0 %v1590_v27, %s4982_s24 }
 0x1d2   :  { %3064 = vrot.lane.b32.xlu1 %v5258_v33, %s4982_s24 }
 0x1d4   :  { %3245 = vperm.xlu0 %4883, %v1594_v37  }
 0x1d6   :  { %3066 = vrot.lane.b32.xlu1 %v1593_v35, %s4982_s24 }
 0x1da   :  { %3250 = vperm.xlu1 %4882, %v1595_v36  }
 0x206   :  { %v1608_v38 = vpop.permute.xlu0 %1607 }
 0x20a   :  { %v1606_v39 = vpop.permute.xlu0 %1605 }
 0x20b   :  { %v1613_v43 = vsel %vm62_vm2, %v1606_v39, %v1608_v38 }
 0x20c   :  { %v1610_v40 = vpop.permute.xlu1 %1609 }
 0x20d   :  { %v1614_v41 = vsel %vm62_vm2, %v1608_v38, %v1610_v40  ;;  %v4665_v38 = vld [vmem:[%s6021_s3 + $0x78] sm:$0xff] }
 0x20e   :  { %1627 = vmatprep.subr.mxu1 %v1614_v41  ;;  %v1947_v44 = vpop.permute.xlu0 %1946 }
 0x20f   :  { %1628 = vmatpush1.msra.mxu1 %v1613_v43 }
 0x210   :  { %v1612_v45 = vpop.permute.xlu1 %1611  ;;  %4626 = vmatmul.mubr.msk.f32.vlgmr.msra.gmra.mrb[4].mxu1 %vm1620_vm10, %v4624_v42 }
 0x211   :  { %v1615_v46 = vsel %vm62_vm2, %v1610_v40, %v1612_v45  ;;  %1704 = vmatprep.subr.mxu1 %v1612_v45  ;;  %1697 = vmatprep.mubr.f32.mxu1 %v4975_v4 }
 0x212   :  { %1705 = vmatpush1.msra.mxu1 %v1615_v46  ;;  %v1945_v48 = vpop.permute.xlu0 %1944  ;;  %v4671_v46 = vld [vmem:[%s6021_s3 + $0x88] sm:$0xff] }
 0x213   :  { %1864 = vmatprep.subr.mxu1 %v1593_v35  ;;  %v1952_v52 = vsel %vm384_vm3, %v1945_v48, %v1947_v44 }
 0x214   :  { %v1949_v49 = vpop.permute.xlu1 %1948  ;;  %4627 = vmatmul.mubr.msk.f32.gmra.mrb[6].mxu1 %vm1620_vm10, %v4625_v47 }
 0x215   :  { %v1953_v50 = vsel %vm384_vm3, %v1947_v44, %v1949_v49  ;;  %1768 = vmatprep.mubr.f32.mxu1 %v4975_v4 }
 0x216   :  { %v2133_v53 = vpop.permute.xlu0 %2132  ;;  %1965 = vmatprep.subr.mxu0 %v1953_v50 }
 0x217   :  { %1966 = vmatpush1.msra.mxu0 %v1952_v52 }
 0x218   :  { %v1951_v54 = vpop.permute.xlu1 %1950  ;;  %4628 = vmatmul.mubr.msk.f32.vlgmr.msra.gmra.mrb[8].mxu1 %vm1620_vm10, %v4624_v42  ;;  %4636 = vmatmul.mubr.msk.f32.vlgmr.msra.gmra.mrb[2].mxu0 %vm1620_vm10, %v4634_v51  ;;  %v4670_v42 = vld [vmem:[%s6021_s3 + $0x80] sm:$0xff] }
 0x219   :  { %1865 = vmatpush1.msra.mxu1 %v5258_v33  ;;  %1774 = vmatprep.mubr.f32.mxu1 %v4975_v4  ;;  %v1954_v62 = vsel %vm384_vm3, %v1949_v49, %v1951_v54  ;;  %v4664_v33 = vld [vmem:[%s6021_s3 + $0x70] sm:$0xff]  ;;  %s4984_s3 = smov [#allocation2]  }
 0x21a   :  { %2042 = vmatprep.subr.mxu1 %v1951_v54  ;;  %v2131_v56 = vpop.permute.xlu0 %2130  ;;  %2035 = vmatprep.mubr.f32.mxu0 %v4975_v4  ;;  %s39_s10 = sshll.u32 %s4984_s3, 4  ;;  %s40_s10 = int_to_ptr.vmem [resolvable:$true] %s39_s10 }
 0x21b   :  { %v2138_v60 = vsel %vm555_vm4, %v2131_v56, %v2133_v53 }
 0x21c   :  { %v2135_v57 = vpop.permute.xlu1 %2134  ;;  %4629 = vmatmul.mubr.msk.f32.gmra.mrb[10].mxu1 %vm1620_vm10, %v4625_v47  ;;  %4637 = vmatmul.mubr.msk.f32.gmra.mrb[4].mxu0 %vm1620_vm10, %v4635_v55 }
 0x21d   :  { %v2139_v58 = vsel %vm555_vm4, %v2133_v53, %v2135_v57  ;;  %1928 = vmatprep.mubr.f32.mxu1 %v4975_v4  ;;  %2215 = vmatprep.mubr.f32.mxu0 %v4975_v4 }
 0x21e   :  { %v2319_v61 = vpop.permute.xlu0 %2318  ;;  %2151 = vmatprep.subr.mxu0 %v2139_v58 }
 0x21f   :  { %2152 = vmatpush1.msra.mxu0 %v2138_v60 }
 0x220   :  { %v2137_v63 = vpop.permute.xlu1 %2136  ;;  %4632 = vmatmul.mubr.msk.f32.vlgmr.msra.gmra.mrb[8].mxu1 %vm1620_vm10, %v5247_v28  ;;  %4642 = vmatmul.mubr.msk.f32.vlgmr.msra.gmra.mrb[2].mxu0 %vm1620_vm10, %v4640_v59 }
 0x221   :  { %2043 = vmatpush1.msra.mxu1 %v1954_v62  ;;  %1934 = vmatprep.mubr.f32.mxu1 %v4975_v4  ;;  %v2140_v9 = vsel %vm555_vm4, %v2135_v57, %v2137_v63 }
 0x222   :  { %2228 = vmatprep.subr.mxu1 %v2137_v63  ;;  %v2317_v1 = vpop.permute.xlu0 %2316  ;;  %2221 = vmatprep.mubr.f32.mxu0 %v4975_v4 }
 0x223   :  { %v2324_v6 = vsel %vm726_vm5, %v2317_v1, %v2319_v61 }
 0x224   :  { %v2321_v2 = vpop.permute.xlu1 %2320  ;;  %4633 = vmatmul.mubr.msk.f32.gmra.mrb[10].mxu1 %vm1620_vm10, %v5256_v32  ;;  %4643 = vmatmul.mubr.msk.f32.gmra.mrb[4].mxu0 %vm1620_vm10, %v4641_v0 }
 0x225   :  { %v2325_v3 = vsel %vm726_vm5, %v2319_v61, %v2321_v2  ;;  %2106 = vmatprep.mubr.f32.mxu1 %v4975_v4  ;;  %2401 = vmatprep.mubr.f32.mxu0 %v4975_v4 }
 0x226   :  { %v2505_v8 = vpop.permute.xlu0 %2504  ;;  %2337 = vmatprep.subr.mxu0 %v2325_v3 }
 0x227   :  { %2338 = vmatpush1.msra.mxu0 %v2324_v6 }
 0x228   :  { %v2323_v10 = vpop.permute.xlu1 %2322  ;;  %4638 = vmatmul.mubr.msk.f32.vlgmr.msra.gmra.mrb[8].mxu1 %vm1620_vm10, %v4634_v51  ;;  %4648 = vmatmul.mubr.msk.f32.vlgmr.msra.gmra.mrb[2].mxu0 %vm1620_vm10, %v4646_v5 }
 0x229   :  { %2229 = vmatpush1.msra.mxu1 %v2140_v9  ;;  %2112 = vmatprep.mubr.f32.mxu1 %v4975_v4  ;;  %v2326_v18 = vsel %vm726_vm5, %v2321_v2, %v2323_v10 }
 0x22a   :  { %2414 = vmatprep.subr.mxu1 %v2323_v10  ;;  %v2503_v12 = vpop.permute.xlu0 %2502  ;;  %2407 = vmatprep.mubr.f32.mxu0 %v4975_v4 }
 0x22b   :  { %v2510_v16 = vsel %vm897_vm6, %v2503_v12, %v2505_v8 }
 0x22c   :  { %v2507_v13 = vpop.permute.xlu1 %2506  ;;  %4639 = vmatmul.mubr.msk.f32.gmra.mrb[10].mxu1 %vm1620_vm10, %v4635_v55  ;;  %4649 = vmatmul.mubr.msk.f32.gmra.mrb[4].mxu0 %vm1620_vm10, %v4647_v11 }
 0x22d   :  { %v2511_v14 = vsel %vm897_vm6, %v2505_v8, %v2507_v13  ;;  %2292 = vmatprep.mubr.f32.mxu1 %v4975_v4  ;;  %2587 = vmatprep.mubr.f32.mxu0 %v4975_v4 }
 0x22e   :  { %v2691_v17 = vpop.permute.xlu0 %2690  ;;  %2523 = vmatprep.subr.mxu0 %v2511_v14 }
 0x22f   :  { %2524 = vmatpush1.msra.mxu0 %v2510_v16 }
 0x230   :  { %v2509_v19 = vpop.permute.xlu1 %2508  ;;  %4644 = vmatmul.mubr.msk.f32.vlgmr.msra.gmra.mrb[8].mxu1 %vm1620_vm10, %v4640_v59  ;;  %4654 = vmatmul.mubr.msk.f32.vlgmr.msra.gmra.mrb[2].mxu0 %vm1620_vm10, %v4652_v15 }
 0x231   :  { %2415 = vmatpush1.msra.mxu1 %v2326_v18  ;;  %2298 = vmatprep.mubr.f32.mxu1 %v4975_v4  ;;  %v2512_v27 = vsel %vm897_vm6, %v2507_v13, %v2509_v19 }
 0x232   :  { %2600 = vmatprep.subr.mxu1 %v2509_v19  ;;  %v2689_v21 = vpop.permute.xlu0 %2688  ;;  %2593 = vmatprep.mubr.f32.mxu0 %v4975_v4 }
 0x233   :  { %v2696_v25 = vsel %vm1071_vm7, %v2689_v21, %v2691_v17 }
 0x234   :  { %v2693_v22 = vpop.permute.xlu1 %2692  ;;  %4645 = vmatmul.mubr.msk.f32.gmra.mrb[10].mxu1 %vm1620_vm10, %v4641_v0  ;;  %4655 = vmatmul.mubr.msk.f32.gmra.mrb[4].mxu0 %vm1620_vm10, %v4653_v20 }
 0x235   :  { %v2697_v23 = vsel %vm1071_vm7, %v2691_v17, %v2693_v22  ;;  %2478 = vmatprep.mubr.f32.mxu1 %v4975_v4  ;;  %2773 = vmatprep.mubr.f32.mxu0 %v4975_v4 }
 0x236   :  { %v2877_v26 = vpop.permute.xlu0 %2876  ;;  %2709 = vmatprep.subr.mxu0 %v2697_v23 }
 0x237   :  { %2710 = vmatpush1.msra.mxu0 %v2696_v25 }
 0x238   :  { %v2695_v28 = vpop.permute.xlu1 %2694  ;;  %4650 = vmatmul.mubr.msk.f32.vlgmr.msra.gmra.mrb[8].mxu1 %vm1620_vm10, %v4646_v5  ;;  %4660 = vmatmul.mubr.msk.f32.vlgmr.msra.gmra.mrb[2].mxu0 %vm1620_vm10, %v4658_v24 }
 0x239   :  { %2601 = vmatpush1.msra.mxu1 %v2512_v27  ;;  %2484 = vmatprep.mubr.f32.mxu1 %v4975_v4  ;;  %v2698_v36 = vsel %vm1071_vm7, %v2693_v22, %v2695_v28 }
 0x23a   :  { %2786 = vmatprep.subr.mxu1 %v2695_v28  ;;  %v2875_v30 = vpop.permute.xlu0 %2874  ;;  %2779 = vmatprep.mubr.f32.mxu0 %v4975_v4 }
 0x23b   :  { %v2882_v34 = vsel %vm1245_vm8, %v2875_v30, %v2877_v26 }
 0x23c   :  { %v2879_v31 = vpop.permute.xlu1 %2878  ;;  %4651 = vmatmul.mubr.msk.f32.gmra.mrb[10].mxu1 %vm1620_vm10, %v4647_v11  ;;  %4661 = vmatmul.mubr.msk.f32.gmra.mrb[4].mxu0 %vm1620_vm10, %v4659_v29 }
 0x23d   :  { %v2883_v32 = vsel %vm1245_vm8, %v2877_v26, %v2879_v31  ;;  %2664 = vmatprep.mubr.f32.mxu1 %v4975_v4  ;;  %2959 = vmatprep.mubr.f32.mxu0 %v4975_v4 }
 0x23e   :  { %v3063_v35 = vpop.permute.xlu0 %3062  ;;  %2895 = vmatprep.subr.mxu0 %v2883_v32 }
 0x23f   :  { %2896 = vmatpush1.msra.mxu0 %v2882_v34 }
 0x240   :  { %v2881_v37 = vpop.permute.xlu1 %2880  ;;  %4656 = vmatmul.mubr.msk.f32.vlgmr.msra.gmra.mrb[8].mxu1 %vm1620_vm10, %v4652_v15  ;;  %4666 = vmatmul.mubr.msk.f32.vlgmr.msra.gmra.mrb[2].mxu0 %vm1620_vm10, %v4664_v33 }
 0x241   :  { %2787 = vmatpush1.msra.mxu1 %v2698_v36  ;;  %2670 = vmatprep.mubr.f32.mxu1 %v4975_v4  ;;  %v2884_v44 = vsel %vm1245_vm8, %v2879_v31, %v2881_v37 }
 0x242   :  { %2972 = vmatprep.subr.mxu1 %v2881_v37  ;;  %2965 = vmatprep.mubr.f32.mxu0 %v4975_v4  ;;  %v3061_v39 = vpop.permute.xlu0 %3060 }
 0x243   :  { %v3068_v43 = vsel %vm1419_vm9, %v3061_v39, %v3063_v35 }
 0x244   :  { %v3065_v40 = vpop.permute.xlu1 %3064  ;;  %4657 = vmatmul.mubr.msk.f32.gmra.mrb[10].mxu1 %vm1620_vm10, %v4653_v20  ;;  %4667 = vmatmul.mubr.msk.f32.gmra.mrb[4].mxu0 %vm1620_vm10, %v4665_v38 }
 0x245   :  { %v3069_v41 = vsel %vm1419_vm9, %v3063_v35, %v3065_v40  ;;  %2850 = vmatprep.mubr.f32.mxu1 %v4975_v4  ;;  %3145 = vmatprep.mubr.f32.mxu0 %v4975_v4 }
 0x246   :  { %3081 = vmatprep.subr.mxu0 %v3069_v41 }
 0x247   :  { %3082 = vmatpush1.msra.mxu0 %v3068_v43 }
 0x248   :  { %v3067_v45 = vpop.permute.xlu1 %3066  ;;  %4662 = vmatmul.mubr.msk.f32.vlgmr.msra.gmra.mrb[8].mxu1 %vm1620_vm10, %v4658_v24  ;;  %4672 = vmatmul.mubr.msk.f32.vlgmr.msra.gmra.mrb[2].mxu0 %vm1620_vm10, %v4670_v42 }
 0x249   :  { %2973 = vmatpush1.msra.mxu1 %v2884_v44  ;;  %2856 = vmatprep.mubr.f32.mxu1 %v4975_v4  ;;  %v3070_v47 = vsel %vm1419_vm9, %v3065_v40, %v3067_v45 }
 0x24a   :  { %3158 = vmatprep.subr.mxu1 %v3067_v45  ;;  %3151 = vmatprep.mubr.f32.mxu0 %v4975_v4 }
 0x24c   :  { %4663 = vmatmul.mubr.msk.f32.gmra.mrb[10].mxu1 %vm1620_vm10, %v4659_v29  ;;  %4673 = vmatmul.mubr.msk.f32.gmra.mrb[4].mxu0 %vm1620_vm10, %v4671_v46 }
 0x24d   :  { %3036 = vmatprep.mubr.f32.mxu1 %v4975_v4 }
 0x250   :  { %4668 = vmatmul.mubr.msk.f32.vlgmr.msra.gmra.mrb[8].mxu1 %vm1620_vm10, %v4664_v33 }
 0x251   :  { %3159 = vmatpush1.msra.mxu1 %v3070_v47  ;;  %3042 = vmatprep.mubr.f32.mxu1 %v4975_v4 }
 0x254   :  { %4669 = vmatmul.mubr.msk.f32.gmra.mrb[10].mxu1 %vm1620_vm10, %v4665_v38 }
 0x255   :  { %3222 = vmatprep.mubr.f32.mxu1 %v4975_v4 }
 0x258   :  { %4674 = vmatmul.mubr.msk.f32.vlgmr.msra.gmra.mrb[8].mxu1 %vm1620_vm10, %v4670_v42 }
 0x259   :  { %3228 = vmatprep.mubr.f32.mxu1 %v4975_v4 }
 0x25c   :  { %4675 = vmatmul.mubr.msk.f32.gmra.mrb[10].mxu1 %vm1620_vm10, %v4671_v46 }
 0x25d   :  { %4935 = shalt.err (!%p4932_p2)  }
 0x25e   :  { %s4936_s25 = scalar_lea.vmem %s40_s10, 24576  ;;  %p4941_p4 = scmp.lt.s32.totalorder %s40_s10, %s40_s10 }
 0x25f   :  { %p4937_p3 = scmp.ne.s32.totalorder %s40_s10, %s4936_s25  ;;  %p4942_p5 = scmp.lt.s32.totalorder %s4936_s25, %s4936_s25 }
 0x261   :  { %p4943_p6 = por %p4942_p5, %p4941_p4 }
 0x263   :  { %p4944_p7 = pnand %p4943_p6, %p4937_p3 }
 0x265   :  { %4947 = shalt.err (!%p4944_p7)  }
 0x266   :  { %42 = dma.hbm_to_vmem [thread:$0]  %s6023_s5, 24576, %s40_s10, [#allocation3]  ;;  %v3246_v56 = vpop.permute.xlu0 %3245  ;;  %v3251_v61 = vpop.permute.xlu1 %3250  ;;  %3345 = vmatprep.subr.bf16.mxu0 %v4983_v7  ;;  %3388 = vmatprep.subr.bf16.mxu1 %v4983_v7 }
 0x267   :  { %s4985_s5 = smov 124  }
 0x2e3   :  { %v1693_v48 = vpop.f32.mrb[4].mxu1 }
 0x2e4   :  { %v1695_v49 = vpop.f32.mrb[5].mxu1 }
 0x2e7   :  { %v1699_v50 = vpop.f32.mrb[6].mxu1 }
 0x2e8   :  { %v1701_v51 = vpop.f32.mrb[7].mxu1 }
 0x31b   :  { %v3147_v52 = vpop.f32.mrb[2].mxu0 }
 0x31c   :  { %v4773_v53 = vadd.f32 %v3147_v52, %v1693_v48  ;;  %v3149_v54 = vpop.f32.mrb[3].mxu0 }
 0x31d   :  { %v4774_v55 = vadd.f32 %v3149_v54, %v1695_v49 }
 0x31e   :  { %v3253_v58 = vadd.f32 %v4773_v53, %v3246_v56 }
 0x31f   :  { %v3153_v57 = vpop.f32.mrb[4].mxu0  ;;  %v3254_v62 = vadd.f32 %v4774_v55, %v3246_v56 }
 0x320   :  { %v4775_v59 = vadd.f32 %v3153_v57, %v1699_v50  ;;  %v3155_v60 = vpop.f32.mrb[5].mxu0  ;;  %v3261_v2 = vmax.f32 %v3253_v58, 0.0 }
 0x321   :  { %v4776_v63 = vadd.f32 %v3155_v60, %v1701_v51  ;;  %v3262_v5 = vmax.f32 %v3254_v62, 0.0 }
 0x322   :  { %v3257_v0 = vadd.f32 %v4775_v59, %v3251_v61 }
 0x323   :  { %v3258_v1 = vadd.f32 %v4776_v63, %v3251_v61 }
 0x324   :  { %v3265_v3 = vmax.f32 %v3257_v0, 0.0 }
 0x325   :  { %v3266_v6 = vmax.f32 %v3258_v1, 0.0 }
 0x326   :  { %v5461_v8 = vpack.c.bf16 %v3265_v3, %v3261_v2 }
 0x327   :  { %v5463_v9 = vpack.c.bf16 %v3266_v6, %v3262_v5 }
 0x32b   :  { %v3224_v10 = vpop.f32.mrb[8].mxu1 }
 0x32c   :  { %v3226_v11 = vpop.f32.mrb[9].mxu1  ;;  %v3255_v12 = vadd.f32 %v3246_v56, %v3224_v10 }
 0x32d   :  { %v3256_v13 = vadd.f32 %v3246_v56, %v3226_v11 }
 0x32e   :  { %v3263_v18 = vmax.f32 %v3255_v12, 0.0 }
 0x32f   :  { %v3230_v14 = vpop.f32.mrb[10].mxu1  ;;  %v3264_v20 = vmax.f32 %v3256_v13, 0.0 }
 0x330   :  { %v3259_v15 = vadd.f32 %v3251_v61, %v3230_v14  ;;  %v3232_v16 = vpop.f32.mrb[11].mxu1 }
 0x331   :  { %v3260_v17 = vadd.f32 %v3251_v61, %v3232_v16 }
 0x332   :  { %v3267_v19 = vmax.f32 %v3259_v15, 0.0 }
 0x333   :  { %v3268_v21 = vmax.f32 %v3260_v17, 0.0 }
 0x334   :  { %v5465_v22 = vpack.c.bf16 %v3267_v19, %v3263_v18 }
 0x335   :  { %v5467_v23 = vpack.c.bf16 %v3268_v21, %v3264_v20 }
 0x336   :  { %v5470_v24 = vshll.u32 %v5465_v22, 16  ;;  %3319 = vrot.lane.b32.xlu0 %v5465_v22, %s4985_s5 }
 0x337   :  { %v5473_v25 = vshll.u32 %v5467_v23, 16 }
 0x338   :  { %4970 = dma.done.wait [#allocation3], 24576 }
 0x339   :  { %4971 = vsyncadd [#allocation3], 4294942720  ;;  %v4886_v26 = vpack.i.bf16 %v5473_v25, %v5470_v24  ;;  %v3434_v27 = vrot.slane %v5470_v24, 1  ;;  %v3435_v28 = vrot.slane %v5473_v25, 1  ;;  %v3506_v30 = vrot.slane %v5465_v22, 1  ;;  %v3329_v34 = vld [vmem:[#allocation2 + $0x60] sm:$0xff] }
 0x33a   :  { %3321 = vrot.lane.b32.xlu0 %v5467_v23, %s4985_s5  ;;  %v3578_v31 = vrot.slane %v5470_v24, 2  ;;  %v3579_v32 = vrot.slane %v5473_v25, 2  ;;  %v3507_v33 = vrot.slane %v5467_v23, 1  ;;  %v3297_v35 = vld [vmem:[#allocation2] sm:$0xff]  ;;  %3346 = vmatpush1.bf16.msra.mxu0 %v3329_v34  ;;  %v3330_v37 = vld [vmem:[#allocation2 + $0x68] sm:$0xff]  ;;  %v3650_v39 = vrot.slane %v5465_v22, 2 }
 0x33b   :  { %4887 = vrot.lane.b32.xlu1 %v4886_v26, %s4985_s5  ;;  %v4891_v29 = vpack.i.bf16 %v3435_v28, %v3434_v27  ;;  %3389 = vmatpush1.bf16.msra.mxu1 %v3297_v35  ;;  %v3298_v38 = vld [vmem:[#allocation2 + $0x8] sm:$0xff]  ;;  %v3651_v40 = vrot.slane %v5467_v23, 2  ;;  %v3331_v41 = vld [vmem:[#allocation2 + $0x70] sm:$0xff]  ;;  %v3722_v42 = vrot.slane %v5470_v24, 3  ;;  %v3723_v43 = vrot.slane %v5473_v25, 3  ;;  %v3332_v46 = vld [vmem:[#allocation2 + $0x78] sm:$0xff] }
 0x33c   :  { %v4896_v36 = vpack.i.bf16 %v3579_v32, %v3578_v31  ;;  %3347 = vmatprep.subr.bf16.mxu0 %v4983_v7  ;;  %3390 = vmatprep.subr.bf16.mxu1 %v4983_v7  ;;  %v3299_v44 = vld [vmem:[#allocation2 + $0x10] sm:$0xff]  ;;  %v3300_v47 = vld [vmem:[#allocation2 + $0x18] sm:$0xff]  ;;  %v3794_v48 = vrot.slane %v5465_v22, 3  ;;  %v3795_v49 = vrot.slane %v5467_v23, 3  ;;  %v3333_v50 = vld [vmem:[#allocation2 + $0x80] sm:$0xff]  ;;  %v3866_v2 = vrot.slane %v5470_v24, 4 }
 0x33d   :  { %v4901_v45 = vpack.i.bf16 %v3723_v43, %v3722_v42  ;;  %v3301_v51 = vld [vmem:[#allocation2 + $0x20] sm:$0xff]  ;;  %v3334_v52 = vld [vmem:[#allocation2 + $0x88] sm:$0xff]  ;;  %v3335_v54 = vld [vmem:[#allocation2 + $0x90] sm:$0xff]  ;;  %v3867_v3 = vrot.slane %v5473_v25, 4  ;;  %v3939_v6 = vrot.slane %v5467_v23, 4  ;;  %v3938_v10 = vrot.slane %v5465_v22, 4 }
 0x33e   :  { %3508 = vrot.lane.b32.xlu0 %v3506_v30, %s4985_s5  ;;  %3348 = vmatpush1.bf16.msra.mxu0 %v3330_v37  ;;  %v3302_v53 = vld [vmem:[#allocation2 + $0x28] sm:$0xff]  ;;  %v3303_v55 = vld [vmem:[#allocation2 + $0x30] sm:$0xff]  ;;  %v3336_v56 = vld [vmem:[#allocation2 + $0x98] sm:$0xff]  ;;  %v4010_v11 = vrot.slane %v5470_v24, 5  ;;  %v4011_v12 = vrot.slane %v5473_v25, 5  ;;  %vm3292_vm11 = vcmask 1040384  }
 0x33f   :  { %4892 = vrot.lane.b32.xlu1 %v4891_v29, %s4985_s5  ;;  %3391 = vmatpush1.bf16.msra.mxu1 %v3298_v38  ;;  %v3304_v57 = vld [vmem:[#allocation2 + $0x38] sm:$0xff]  ;;  %v3337_v58 = vld [vmem:[#allocation2 + $0xa0] sm:$0xff]  ;;  %v3338_v60 = vld [vmem:[#allocation2 + $0xa8] sm:$0xff]  ;;  %v4906_v5 = vpack.i.bf16 %v3867_v3, %v3866_v2  ;;  %vm3293_vm12 = vsmask.f32 256  ;;  %v5540_v15 = vshrl.u32 %v5463_v9, 16 }
 0x340   :  { %3349 = vmatprep.subr.bf16.mxu0 %v4983_v7  ;;  %3392 = vmatprep.subr.bf16.mxu1 %v4983_v7  ;;  %v3305_v59 = vld [vmem:[#allocation2 + $0x40] sm:$0xff]  ;;  %v3306_v61 = vld [vmem:[#allocation2 + $0x48] sm:$0xff]  ;;  %v3339_v62 = vld [vmem:[#allocation2 + $0xb0] sm:$0xff]  ;;  %v4911_v13 = vpack.i.bf16 %v4011_v12, %v4010_v11  ;;  %v4082_v16 = vrot.slane %v5465_v22, 5  ;;  %v4083_v17 = vrot.slane %v5467_v23, 5  ;;  %vm3288_vm13 = vcmask 1014784  }
 0x341   :  { %v3307_v63 = vld [vmem:[#allocation2 + $0x50] sm:$0xff]  ;;  %v3340_v0 = vld [vmem:[#allocation2 + $0xb8] sm:$0xff]  ;;  %vm5544_vm14 = vmand %vm3292_vm11, %vm3293_vm12  ;;  %v5549_v19 = vshrl.u32 %v5461_v8, 16  ;;  %vm3341_vm15 = vcmask 523264   ;;  %v3431_v35 = vrot.slane %v5463_v9, 1  ;;  %vm4987_vm0 = vmmov 0  }
 0x342   :  { %4897 = vrot.lane.b32.xlu0 %v4896_v36, %s4985_s5  ;;  %3350 = vmatpush1.bf16.msra.mxu0 %v3331_v41  ;;  %v3308_v1 = vld [vmem:[#allocation2 + $0x58] sm:$0xff]  ;;  %v3446_v30 = vld [vmem:[#allocation2 + $0xc0] sm:$0xff]  ;;  %v3519_v41 = vld [vmem:[#allocation2 + $0x128] sm:$0xff]  ;;  %s4988_s20 = smov [#allocation4]   ;;  %vm4540_vm1 = vcmask 41984  }
 0x343   :  { %3510 = vrot.lane.b32.xlu1 %v3507_v33, %s4985_s5  ;;  %3393 = vmatpush1.bf16.msra.mxu1 %v3299_v44  ;;  %v3518_v34 = vld [vmem:[#allocation2 + $0x120] sm:$0xff]  ;;  %v3528_v3 = vld [vmem:[#allocation2 + $0x170] sm:$0xff]  ;;  %v3502_v12 = vrot.slane %v5549_v19, 1  ;;  %v4448_v18 = vld [vmem:[%s6025_s7 + $0x8] sm:$0xff]  ;;  %s4548_s4 = sshll.u32 %s4988_s20, 4  ;;  %s4549_s4 = int_to_ptr.vmem [resolvable:$true] %s4548_s4 }
 0x344   :  { %3351 = vmatprep.subr.bf16.mxu0 %v4983_v7  ;;  %3394 = vmatprep.subr.bf16.mxu1 %v4983_v7  ;;  %p4953_p9 = scmp.lt.s32.totalorder %s4549_s4, %s4549_s4 }
 0x346   :  { %3654 = vrot.lane.b32.xlu0 %v3651_v40, %s4985_s5  ;;  %3352 = vmatpush1.bf16.msra.mxu0 %v3332_v46  ;;  %v3447_v40 = vld [vmem:[#allocation2 + $0xc8] sm:$0xff]  ;;  %v3520_v46 = vld [vmem:[#allocation2 + $0x130] sm:$0xff] }
 0x347   :  { %3652 = vrot.lane.b32.xlu1 %v3650_v39, %s4985_s5  ;;  %3395 = vmatpush1.bf16.msra.mxu1 %v3300_v47  ;;  %v3503_v39 = vrot.slane %v5540_v15, 1  ;;  %v3449_v47 = vld [vmem:[#allocation2 + $0xd8] sm:$0xff] }
 0x348   :  { %3353 = vmatprep.subr.bf16.mxu0 %v4983_v7  ;;  %3396 = vmatprep.subr.bf16.mxu1 %v4983_v7 }
 0x34a   :  { %3796 = vrot.lane.b32.xlu0 %v3794_v48, %s4985_s5  ;;  %3354 = vmatpush1.bf16.msra.mxu0 %v3333_v50  ;;  %v3521_v48 = vld [vmem:[#allocation2 + $0x138] sm:$0xff]  ;;  %v3522_v50 = vld [vmem:[#allocation2 + $0x140] sm:$0xff] }
 0x34b   :  { %4902 = vrot.lane.b32.xlu1 %v4901_v45, %s4985_s5  ;;  %3397 = vmatpush1.bf16.msra.mxu1 %v3301_v51  ;;  %v3448_v45 = vld [vmem:[#allocation2 + $0xd0] sm:$0xff]  ;;  %v3451_v51 = vld [vmem:[#allocation2 + $0xe8] sm:$0xff] }
 0x34c   :  { %3355 = vmatprep.subr.bf16.mxu0 %v4983_v7  ;;  %3398 = vmatprep.subr.bf16.mxu1 %v4983_v7 }
 0x34e   :  { %3356 = vmatpush1.bf16.msra.mxu0 %v3334_v52  ;;  %4907 = vrot.lane.b32.xlu0 %v4906_v5, %s4985_s5  ;;  %v3523_v52 = vld [vmem:[#allocation2 + $0x148] sm:$0xff] }
 0x34f   :  { %3798 = vrot.lane.b32.xlu1 %v3795_v49, %s4985_s5  ;;  %3399 = vmatpush1.bf16.msra.mxu1 %v3302_v53  ;;  %v3450_v49 = vld [vmem:[#allocation2 + $0xe0] sm:$0xff]  ;;  %v3452_v53 = vld [vmem:[#allocation2 + $0xf0] sm:$0xff] }
 0x350   :  { %3357 = vmatprep.subr.bf16.mxu0 %v4983_v7  ;;  %3400 = vmatprep.subr.bf16.mxu1 %v4983_v7 }
 0x352   :  { %3358 = vmatpush1.bf16.msra.mxu0 %v3335_v54  ;;  %3942 = vrot.lane.b32.xlu0 %v3939_v6, %s4985_s5  ;;  %v3524_v54 = vld [vmem:[#allocation2 + $0x150] sm:$0xff]  ;;  %v3430_v6 = vrot.slane %v5461_v8, 1 }
 0x353   :  { %3401 = vmatpush1.bf16.msra.mxu1 %v3303_v55  ;;  %3359 = vmatprep.subr.bf16.mxu0 %v4983_v7  ;;  %v3453_v55 = vld [vmem:[#allocation2 + $0xf8] sm:$0xff] }
 0x354   :  { %3402 = vmatprep.subr.bf16.mxu1 %v4983_v7  ;;  %3940 = vrot.lane.b32.xlu1 %v3938_v10, %s4985_s5  ;;  %v3457_v10 = vld [vmem:[#allocation2 + $0x118] sm:$0xff] }
 0x356   :  { %3360 = vmatpush1.bf16.msra.mxu0 %v3336_v56  ;;  %4084 = vrot.lane.b32.xlu0 %v4082_v16, %s4985_s5  ;;  %v3525_v56 = vld [vmem:[#allocation2 + $0x158] sm:$0xff] }
 0x357   :  { %3403 = vmatpush1.bf16.msra.mxu1 %v3304_v57  ;;  %3361 = vmatprep.subr.bf16.mxu0 %v4983_v7  ;;  %v3454_v57 = vld [vmem:[#allocation2 + $0x100] sm:$0xff] }
 0x358   :  { %3404 = vmatprep.subr.bf16.mxu1 %v4983_v7  ;;  %4912 = vrot.lane.b32.xlu1 %v4911_v13, %s4985_s5  ;;  %v4227_v13 = vrot.slane %v5467_v23, 6 }
 0x35a   :  { %3362 = vmatpush1.bf16.msra.mxu0 %v3337_v58  ;;  %v3526_v58 = vld [vmem:[#allocation2 + $0x160] sm:$0xff] }
 0x35b   :  { %3405 = vmatpush1.bf16.msra.mxu1 %v3305_v59  ;;  %3363 = vmatprep.subr.bf16.mxu0 %v4983_v7  ;;  %v3455_v59 = vld [vmem:[#allocation2 + $0x108] sm:$0xff] }
 0x35c   :  { %3406 = vmatprep.subr.bf16.mxu1 %v4983_v7  ;;  %4086 = vrot.lane.b32.xlu1 %v4083_v17, %s4985_s5  ;;  %v3529_v17 = vld [vmem:[#allocation2 + $0x178] sm:$0xff] }
 0x35e   :  { %3364 = vmatpush1.bf16.msra.mxu0 %v3338_v60  ;;  %v3527_v60 = vld [vmem:[#allocation2 + $0x168] sm:$0xff] }
 0x35f   :  { %3407 = vmatpush1.bf16.msra.mxu1 %v3306_v61  ;;  %3365 = vmatprep.subr.bf16.mxu0 %v4983_v7 }
 0x360   :  { %3408 = vmatprep.subr.bf16.mxu1 %v4983_v7 }
 0x362   :  { %3366 = vmatpush1.bf16.msra.mxu0 %v3339_v62  ;;  %v4154_v62 = vrot.slane %v5470_v24, 6 }
 0x363   :  { %3409 = vmatpush1.bf16.msra.mxu1 %v3307_v63  ;;  %3367 = vmatprep.subr.bf16.mxu0 %v4983_v7  ;;  %v4155_v63 = vrot.slane %v5473_v25, 6 }
 0x364   :  { %3410 = vmatprep.subr.bf16.mxu1 %v4983_v7 }
 0x365   :  { %v4916_v2 = vpack.i.bf16 %v4155_v63, %v4154_v62  ;;  %v4370_v62 = vrot.slane %v5465_v22, 7  ;;  %v4371_v63 = vrot.slane %v5467_v23, 7  ;;  %v3791_v23 = vrot.slane %v5540_v15, 3 }
 0x366   :  { %3368 = vmatpush1.bf16.msra.mxu0 %v3340_v0  ;;  %v3456_v0 = vld [vmem:[#allocation2 + $0x110] sm:$0xff] }
 0x367   :  { %3411 = vmatpush1.bf16.msra.mxu1 %v3308_v1  ;;  %3461 = vmatprep.subr.bf16.mxu0 %v4983_v7 }
 0x368   :  { %3533 = vmatprep.subr.bf16.mxu1 %v4983_v7  ;;  %4917 = vrot.lane.b32.xlu0 %v4916_v2, %s4985_s5 }
 0x36c   :  { %4230 = vrot.lane.b32.xlu0 %v4227_v13, %s4985_s5 }
 0x370   :  { %4372 = vrot.lane.b32.xlu0 %v4370_v62, %s4985_s5  ;;  %v3881_v62 = vld [vmem:[#allocation2 + $0x318] sm:$0xff] }
 0x3a8   :  { %v3320_v14 = vpop.permute.xlu0 %3319 }
 0x3ac   :  { %v3322_v27 = vpop.permute.xlu0 %3321 }
 0x3ad   :  { %v4888_v20 = vpop.permute.xlu1 %4887  ;;  %v3323_v28 = vsel %vm3288_vm13, %v3320_v14, %v3322_v27  ;;  %v3327_v29 = vsel %vm5544_vm14, %v5540_v15, %v3322_v27  ;;  %v4226_v14 = vrot.slane %v5465_v22, 6  ;;  %v3647_v27 = vrot.slane %v5540_v15, 2 }
 0x3ae   :  { %v4890_v21 = vunpack.i.h.bf16 %v4888_v20  ;;  %v4889_v26 = vunpack.i.l.bf16 %v4888_v20  ;;  %4676 = vmatprep.mubr.msk.bf16.mxu0 %vm3341_vm15, %v3327_v29  ;;  %v3326_v31 = vsel %vm5544_vm14, %v5549_v19, %v3323_v28  ;;  %v3590_v29 = vld [vmem:[#allocation2 + $0x180] sm:$0xff] }
 0x3af   :  { %3378 = vmatmul.mubr.bf16.vlgmr.msra.gmra.mrb[8].mxu0 %v3326_v31  ;;  %4228 = vrot.lane.b32.xlu1 %v4226_v14, %s4985_s5  ;;  %v3662_v31 = vld [vmem:[#allocation2 + $0x1e0] sm:$0xff]  ;;  %v3735_v14 = vld [vmem:[#allocation2 + $0x248] sm:$0xff] }
 0x3b0   :  { %v3296_v32 = vsel %vm5544_vm14, %v5463_v9, %v4890_v21  ;;  %v3289_v33 = vsel %vm3288_vm13, %v4889_v26, %v4890_v21  ;;  %3462 = vmatpush1.bf16.msra.mxu0 %v3446_v30  ;;  %v3509_v61 = vpop.permute.xlu0 %3508  ;;  %v3575_v21 = vrot.slane %v5463_v9, 2 }
 0x3b1   :  { %4677 = vmatprep.mubr.msk.bf16.mxu1 %vm3341_vm15, %v3296_v32  ;;  %v3295_v36 = vsel %vm5544_vm14, %v5461_v8, %v3289_v33  ;;  %v5570_v37 = vpop.permute.xlu1 %4892  ;;  %3463 = vmatprep.subr.bf16.mxu0 %v4983_v7 }
 0x3b2   :  { %3421 = vmatmul.mubr.bf16.vlgmr.msra.gmra.mrb[12].mxu1 %v3295_v36  ;;  %v4895_v38 = vunpack.i.h.bf16 %v5570_v37  ;;  %v4894_v1 = vunpack.i.l.bf16 %v5570_v37  ;;  %v3592_v36 = vld [vmem:[#allocation2 + $0x190] sm:$0xff] }
 0x3b3   :  { %3534 = vmatpush1.bf16.msra.mxu1 %v3518_v34  ;;  %v3591_v34 = vld [vmem:[#allocation2 + $0x188] sm:$0xff]  ;;  %v3664_v37 = vld [vmem:[#allocation2 + $0x1f0] sm:$0xff] }
 0x3b4   :  { %3535 = vmatprep.subr.bf16.mxu1 %v4983_v7  ;;  %v3444_v42 = vsel %vm5544_vm14, %v3431_v35, %v4895_v38  ;;  %3464 = vmatpush1.bf16.msra.mxu0 %v3447_v40  ;;  %v5608_v5 = vpop.permute.xlu0 %4897  ;;  %v3440_v11 = vsel %vm3288_vm13, %v4894_v1, %v4895_v38  ;;  %v3663_v35 = vld [vmem:[#allocation2 + $0x1e8] sm:$0xff]  ;;  %v3593_v38 = vld [vmem:[#allocation2 + $0x198] sm:$0xff]  ;;  %v3594_v40 = vld [vmem:[#allocation2 + $0x1a0] sm:$0xff] }
 0x3b5   :  { %v5580_v43 = vpop.permute.xlu1 %3510  ;;  %4678 = vmatprep.mubr.msk.bf16.mxu0 %vm3341_vm15, %v3444_v42  ;;  %3465 = vmatprep.subr.bf16.mxu0 %v4983_v7  ;;  %v4900_v20 = vunpack.i.h.bf16 %v5608_v5  ;;  %v3443_v26 = vsel %vm5544_vm14, %v3430_v6, %v3440_v11  ;;  %v3595_v42 = vld [vmem:[#allocation2 + $0x1a8] sm:$0xff]  ;;  %v3673_v1 = vld [vmem:[#allocation2 + $0x238] sm:$0xff]  ;;  %v3734_v6 = vld [vmem:[#allocation2 + $0x240] sm:$0xff] }
 0x3b6   :  { %v3516_v44 = vsel %vm5544_vm14, %v3503_v39, %v5580_v43  ;;  %v3512_v16 = vsel %vm3288_vm13, %v3509_v61, %v5580_v43  ;;  %v3665_v39 = vld [vmem:[#allocation2 + $0x1f8] sm:$0xff]  ;;  %v3667_v43 = vld [vmem:[#allocation2 + $0x208] sm:$0xff]  ;;  %v3646_v61 = vrot.slane %v5549_v19, 2  ;;  %v3806_v11 = vld [vmem:[#allocation2 + $0x2a0] sm:$0xff] }
 0x3b7   :  { %3536 = vmatpush1.bf16.msra.mxu1 %v3519_v41  ;;  %4679 = vmatprep.mubr.msk.bf16.mxu1 %vm3341_vm15, %v3516_v44  ;;  %v3515_v28 = vsel %vm5544_vm14, %v3502_v12, %v3512_v16  ;;  %v3588_v32 = vsel %vm5544_vm14, %v3575_v21, %v4900_v20  ;;  %v3666_v41 = vld [vmem:[#allocation2 + $0x200] sm:$0xff]  ;;  %v3596_v44 = vld [vmem:[#allocation2 + $0x1b0] sm:$0xff]  ;;  %v3807_v16 = vld [vmem:[#allocation2 + $0x2a8] sm:$0xff] }
 0x3b8   :  { %3537 = vmatprep.subr.bf16.mxu1 %v4983_v7  ;;  %3466 = vmatpush1.bf16.msra.mxu0 %v3448_v45  ;;  %v5632_v30 = vpop.permute.xlu0 %3654  ;;  %v3668_v45 = vld [vmem:[#allocation2 + $0x210] sm:$0xff]  ;;  %v3737_v21 = vld [vmem:[#allocation2 + $0x258] sm:$0xff] }
 0x3b9   :  { %3467 = vmatprep.subr.bf16.mxu0 %v4983_v7  ;;  %v3660_v33 = vsel %vm5544_vm14, %v3647_v27, %v5632_v30  ;;  %v3738_v27 = vld [vmem:[#allocation2 + $0x260] sm:$0xff] }
 0x3bb   :  { %3538 = vmatpush1.bf16.msra.mxu1 %v3520_v46  ;;  %v3597_v46 = vld [vmem:[#allocation2 + $0x1b8] sm:$0xff] }
 0x3bc   :  { %3539 = vmatprep.subr.bf16.mxu1 %v4983_v7  ;;  %3468 = vmatpush1.bf16.msra.mxu0 %v3449_v47  ;;  %v3669_v47 = vld [vmem:[#allocation2 + $0x218] sm:$0xff] }
 0x3bd   :  { %3469 = vmatprep.subr.bf16.mxu0 %v4983_v7 }
 0x3bf   :  { %3540 = vmatpush1.bf16.msra.mxu1 %v3521_v48  ;;  %v3598_v48 = vld [vmem:[#allocation2 + $0x1c0] sm:$0xff] }
 0x3c0   :  { %3541 = vmatprep.subr.bf16.mxu1 %v4983_v7  ;;  %3470 = vmatpush1.bf16.msra.mxu0 %v3450_v49  ;;  %v3670_v49 = vld [vmem:[#allocation2 + $0x220] sm:$0xff] }
 0x3c1   :  { %3471 = vmatprep.subr.bf16.mxu0 %v4983_v7 }
 0x3c3   :  { %3542 = vmatpush1.bf16.msra.mxu1 %v3522_v50  ;;  %v3599_v50 = vld [vmem:[#allocation2 + $0x1c8] sm:$0xff] }
 0x3c4   :  { %3543 = vmatprep.subr.bf16.mxu1 %v4983_v7  ;;  %3472 = vmatpush1.bf16.msra.mxu0 %v3451_v51  ;;  %v3671_v51 = vld [vmem:[#allocation2 + $0x228] sm:$0xff] }
 0x3c5   :  { %3473 = vmatprep.subr.bf16.mxu0 %v4983_v7 }
 0x3c7   :  { %3544 = vmatpush1.bf16.msra.mxu1 %v3523_v52  ;;  %v3653_v52 = vpop.permute.xlu1 %3652 }
 0x3c8   :  { %3545 = vmatprep.subr.bf16.mxu1 %v4983_v7  ;;  %3474 = vmatpush1.bf16.msra.mxu0 %v3452_v53  ;;  %v4298_v53 = vrot.slane %v5470_v24, 7  ;;  %v3574_v24 = vrot.slane %v5461_v8, 2 }
 0x3c9   :  { %3475 = vmatprep.subr.bf16.mxu0 %v4983_v7 }
 0x3cb   :  { %3546 = vmatpush1.bf16.msra.mxu1 %v3524_v54  ;;  %v4299_v54 = vrot.slane %v5473_v25, 7  ;;  %v3601_v25 = vld [vmem:[#allocation2 + $0x1d8] sm:$0xff] }
 0x3cc   :  { %3547 = vmatprep.subr.bf16.mxu1 %v4983_v7  ;;  %3476 = vmatpush1.bf16.msra.mxu0 %v3453_v55  ;;  %v3600_v55 = vld [vmem:[#allocation2 + $0x1d0] sm:$0xff] }
 0x3cd   :  { %3477 = vmatprep.subr.bf16.mxu0 %v4983_v7 }
 0x3cf   :  { %3548 = vmatpush1.bf16.msra.mxu1 %v3525_v56  ;;  %v4899_v56 = vunpack.i.l.bf16 %v5608_v5 }
 0x3d0   :  { %3549 = vmatprep.subr.bf16.mxu1 %v4983_v7  ;;  %3478 = vmatpush1.bf16.msra.mxu0 %v3454_v57  ;;  %v4921_v57 = vpack.i.bf16 %v4299_v54, %v4298_v53  ;;  %v3935_v53 = vrot.slane %v5540_v15, 4 }
 0x3d1   :  { %3479 = vmatprep.subr.bf16.mxu0 %v4983_v7 }
 0x3d2   :  { %4922 = vrot.lane.b32.xlu1 %v4921_v57, %s4985_s5  ;;  %v3950_v57 = vld [vmem:[#allocation2 + $0x360] sm:$0xff] }
 0x3d3   :  { %3550 = vmatpush1.bf16.msra.mxu1 %v3526_v58  ;;  %v3672_v58 = vld [vmem:[#allocation2 + $0x230] sm:$0xff] }
 0x3d4   :  { %3551 = vmatprep.subr.bf16.mxu1 %v4983_v7  ;;  %3480 = vmatpush1.bf16.msra.mxu0 %v3455_v59  ;;  %v5667_v59 = vpop.permute.xlu1 %4902 }
 0x3d5   :  { %3481 = vmatprep.subr.bf16.mxu0 %v4983_v7  ;;  %v4905_v2 = vunpack.i.h.bf16 %v5667_v59 }
 0x3d6   :  { %4374 = vrot.lane.b32.xlu1 %v4371_v63, %s4985_s5  ;;  %v3953_v63 = vld [vmem:[#allocation2 + $0x378] sm:$0xff] }
 0x3d7   :  { %3552 = vmatpush1.bf16.msra.mxu1 %v3527_v60  ;;  %v3584_v60 = vsel %vm3288_vm13, %v4899_v56, %v4900_v20  ;;  %v3808_v20 = vld [vmem:[#allocation2 + $0x2b0] sm:$0xff] }
 0x3d8   :  { %3553 = vmatprep.subr.bf16.mxu1 %v4983_v7  ;;  %3482 = vmatpush1.bf16.msra.mxu0 %v3456_v0  ;;  %v3656_v0 = vsel %vm3288_vm13, %v3653_v52, %v5632_v30  ;;  %v3587_v22 = vsel %vm5544_vm14, %v3574_v24, %v3584_v60  ;;  %v3811_v30 = vld [vmem:[#allocation2 + $0x2c8] sm:$0xff]  ;;  %v3880_v60 = vld [vmem:[#allocation2 + $0x310] sm:$0xff] }
 0x3d9   :  { %3483 = vmatprep.subr.bf16.mxu0 %v4983_v7  ;;  %v3659_v5 = vsel %vm5544_vm14, %v3646_v61, %v3656_v0  ;;  %v3879_v24 = vld [vmem:[#allocation2 + $0x308] sm:$0xff]  ;;  %v3952_v61 = vld [vmem:[#allocation2 + $0x370] sm:$0xff]  ;;  %v3882_v0 = vld [vmem:[#allocation2 + $0x320] sm:$0xff] }
 0x3db   :  { %3554 = vmatpush1.bf16.msra.mxu1 %v3528_v3  ;;  %v3719_v3 = vrot.slane %v5463_v9, 3 }
 0x3dc   :  { %3555 = vmatprep.subr.bf16.mxu1 %v4983_v7  ;;  %3484 = vmatpush1.bf16.msra.mxu0 %v3457_v10  ;;  %v5691_v10 = vpop.permute.xlu1 %3798 }
 0x3dd   :  { %3605 = vmatprep.subr.bf16.mxu0 %v4983_v7  ;;  %v3732_v12 = vsel %vm5544_vm14, %v3719_v3, %v4905_v2  ;;  %v3804_v13 = vsel %vm5544_vm14, %v3791_v23, %v5691_v10  ;;  %v3955_v3 = vld [vmem:[#allocation2 + $0x388] sm:$0xff]  ;;  %v3956_v23 = vld [vmem:[#allocation2 + $0x390] sm:$0xff] }
 0x3df   :  { %3556 = vmatpush1.bf16.msra.mxu1 %v3529_v17  ;;  %3494 = vmatmul.mubr.bf16.vlgmr.msra.gmra.mrb[12].mxu0 %v3443_v26  ;;  %v3736_v17 = vld [vmem:[#allocation2 + $0x250] sm:$0xff]  ;;  %v3809_v26 = vld [vmem:[#allocation2 + $0x2b8] sm:$0xff] }
 0x3e0   :  { %3677 = vmatprep.subr.bf16.mxu1 %v4983_v7  ;;  %3606 = vmatpush1.bf16.msra.mxu0 %v3590_v29  ;;  %v3739_v29 = vld [vmem:[#allocation2 + $0x268] sm:$0xff] }
 0x3e1   :  { %3607 = vmatprep.subr.bf16.mxu0 %v4983_v7  ;;  %4680 = vmatprep.mubr.msk.bf16.mxu0 %vm3341_vm15, %v3588_v32  ;;  %v3812_v32 = vld [vmem:[#allocation2 + $0x2d0] sm:$0xff] }
 0x3e2   :  { %3566 = vmatmul.mubr.bf16.vlgmr.msra.gmra.mrb[16].mxu1 %v3515_v28  ;;  %v3810_v28 = vld [vmem:[#allocation2 + $0x2c0] sm:$0xff] }
 0x3e3   :  { %3678 = vmatpush1.bf16.msra.mxu1 %v3662_v31  ;;  %4681 = vmatprep.mubr.msk.bf16.mxu1 %vm3341_vm15, %v3660_v33  ;;  %v3740_v31 = vld [vmem:[#allocation2 + $0x270] sm:$0xff]  ;;  %v3741_v33 = vld [vmem:[#allocation2 + $0x278] sm:$0xff] }
 0x3e4   :  { %3679 = vmatprep.subr.bf16.mxu1 %v4983_v7  ;;  %3608 = vmatpush1.bf16.msra.mxu0 %v3591_v34  ;;  %v3813_v34 = vld [vmem:[#allocation2 + $0x2d8] sm:$0xff] }
 0x3e5   :  { %3609 = vmatprep.subr.bf16.mxu0 %v4983_v7 }
 0x3e7   :  { %3680 = vmatpush1.bf16.msra.mxu1 %v3663_v35  ;;  %v3742_v35 = vld [vmem:[#allocation2 + $0x280] sm:$0xff] }
 0x3e8   :  { %3681 = vmatprep.subr.bf16.mxu1 %v4983_v7  ;;  %3610 = vmatpush1.bf16.msra.mxu0 %v3592_v36  ;;  %v3814_v36 = vld [vmem:[#allocation2 + $0x2e0] sm:$0xff] }
 0x3e9   :  { %3611 = vmatprep.subr.bf16.mxu0 %v4983_v7 }
 0x3eb   :  { %3682 = vmatpush1.bf16.msra.mxu1 %v3664_v37  ;;  %v3743_v37 = vld [vmem:[#allocation2 + $0x288] sm:$0xff] }
 0x3ec   :  { %3683 = vmatprep.subr.bf16.mxu1 %v4983_v7  ;;  %3612 = vmatpush1.bf16.msra.mxu0 %v3593_v38  ;;  %v3815_v38 = vld [vmem:[#allocation2 + $0x2e8] sm:$0xff] }
 0x3ed   :  { %3613 = vmatprep.subr.bf16.mxu0 %v4983_v7 }
 0x3ef   :  { %3684 = vmatpush1.bf16.msra.mxu1 %v3665_v39  ;;  %v3797_v39 = vpop.permute.xlu0 %3796 }
 0x3f0   :  { %3685 = vmatprep.subr.bf16.mxu1 %v4983_v7  ;;  %3614 = vmatpush1.bf16.msra.mxu0 %v3594_v40  ;;  %v3744_v40 = vld [vmem:[#allocation2 + $0x290] sm:$0xff] }
 0x3f1   :  { %3615 = vmatprep.subr.bf16.mxu0 %v4983_v7 }
 0x3f3   :  { %3686 = vmatpush1.bf16.msra.mxu1 %v3666_v41  ;;  %v4904_v41 = vunpack.i.l.bf16 %v5667_v59 }
 0x3f4   :  { %3687 = vmatprep.subr.bf16.mxu1 %v4983_v7  ;;  %3616 = vmatpush1.bf16.msra.mxu0 %v3595_v42  ;;  %v3816_v42 = vld [vmem:[#allocation2 + $0x2f0] sm:$0xff] }
 0x3f5   :  { %3617 = vmatprep.subr.bf16.mxu0 %v4983_v7 }
 0x3f7   :  { %3688 = vmatpush1.bf16.msra.mxu1 %v3667_v43  ;;  %v5724_v43 = vpop.permute.xlu0 %4907 }
 0x3f8   :  { %3689 = vmatprep.subr.bf16.mxu1 %v4983_v7  ;;  %3618 = vmatpush1.bf16.msra.mxu0 %v3596_v44  ;;  %v3718_v44 = vrot.slane %v5461_v8, 3 }
 0x3f9   :  { %3619 = vmatprep.subr.bf16.mxu0 %v4983_v7 }
 0x3fb   :  { %3690 = vmatpush1.bf16.msra.mxu1 %v3668_v45  ;;  %v3745_v45 = vld [vmem:[#allocation2 + $0x298] sm:$0xff]  ;;  %v5743_v56 = vpop.permute.xlu0 %3942 }
 0x3fc   :  { %3691 = vmatprep.subr.bf16.mxu1 %v4983_v7  ;;  %3620 = vmatpush1.bf16.msra.mxu0 %v3597_v46  ;;  %v3728_v46 = vsel %vm3288_vm13, %v4904_v41, %v4905_v2  ;;  %v3948_v59 = vsel %vm5544_vm14, %v3935_v53, %v5743_v56  ;;  %v3883_v2 = vld [vmem:[#allocation2 + $0x328] sm:$0xff] }
 0x3fd   :  { %3621 = vmatprep.subr.bf16.mxu0 %v4983_v7  ;;  %v3731_v52 = vsel %vm5544_vm14, %v3718_v44, %v3728_v46  ;;  %v4024_v44 = vld [vmem:[#allocation2 + $0x3d0] sm:$0xff]  ;;  %v4025_v46 = vld [vmem:[#allocation2 + $0x3d8] sm:$0xff] }
 0x3ff   :  { %3692 = vmatpush1.bf16.msra.mxu1 %v3669_v47  ;;  %v3790_v47 = vrot.slane %v5549_v19, 3 }
 0x400   :  { %3693 = vmatprep.subr.bf16.mxu1 %v4983_v7  ;;  %3622 = vmatpush1.bf16.msra.mxu0 %v3598_v48  ;;  %v3800_v48 = vsel %vm3288_vm13, %v3797_v39, %v5691_v10  ;;  %v3886_v10 = vld [vmem:[#allocation2 + $0x340] sm:$0xff] }
 0x401   :  { %3623 = vmatprep.subr.bf16.mxu0 %v4983_v7  ;;  %v3803_v54 = vsel %vm5544_vm14, %v3790_v47, %v3800_v48  ;;  %v4094_v39 = vld [vmem:[#allocation2 + $0x420] sm:$0xff]  ;;  %v4097_v47 = vld [vmem:[#allocation2 + $0x438] sm:$0xff] }
 0x402   :  { %v4026_v48 = vld [vmem:[#allocation2 + $0x3e0] sm:$0xff] }
 0x403   :  { %3694 = vmatpush1.bf16.msra.mxu1 %v3670_v49  ;;  %v3817_v49 = vld [vmem:[#allocation2 + $0x2f8] sm:$0xff] }
 0x404   :  { %3695 = vmatprep.subr.bf16.mxu1 %v4983_v7  ;;  %3624 = vmatpush1.bf16.msra.mxu0 %v3599_v50  ;;  %v4910_v50 = vunpack.i.h.bf16 %v5724_v43 }
 0x405   :  { %3625 = vmatprep.subr.bf16.mxu0 %v4983_v7 }
 0x407   :  { %3696 = vmatpush1.bf16.msra.mxu1 %v3671_v51  ;;  %v3863_v51 = vrot.slane %v5463_v9, 4 }
 0x408   :  { %3697 = vmatprep.subr.bf16.mxu1 %v4983_v7  ;;  %3626 = vmatpush1.bf16.msra.mxu0 %v3600_v55  ;;  %v3878_v55 = vld [vmem:[#allocation2 + $0x300] sm:$0xff] }
 0x409   :  { %3627 = vmatprep.subr.bf16.mxu0 %v4983_v7 }
 0x40b   :  { %3698 = vmatpush1.bf16.msra.mxu1 %v3672_v58  ;;  %v3876_v58 = vsel %vm5544_vm14, %v3863_v51, %v4910_v50 }
 0x40c   :  { %3699 = vmatprep.subr.bf16.mxu1 %v4983_v7  ;;  %3628 = vmatpush1.bf16.msra.mxu0 %v3601_v25  ;;  %v3951_v25 = vld [vmem:[#allocation2 + $0x368] sm:$0xff] }
 0x40d   :  { %3749 = vmatprep.subr.bf16.mxu0 %v4983_v7 }
 0x40f   :  { %3700 = vmatpush1.bf16.msra.mxu1 %v3673_v1  ;;  %3638 = vmatmul.mubr.bf16.vlgmr.msra.gmra.mrb[16].mxu0 %v3587_v22  ;;  %v3954_v1 = vld [vmem:[#allocation2 + $0x380] sm:$0xff]  ;;  %v3884_v22 = vld [vmem:[#allocation2 + $0x330] sm:$0xff] }
 0x410   :  { %3821 = vmatprep.subr.bf16.mxu1 %v4983_v7  ;;  %3750 = vmatpush1.bf16.msra.mxu0 %v3734_v6  ;;  %v3957_v6 = vld [vmem:[#allocation2 + $0x398] sm:$0xff] }
 0x411   :  { %3751 = vmatprep.subr.bf16.mxu0 %v4983_v7  ;;  %4682 = vmatprep.mubr.msk.bf16.mxu0 %vm3341_vm15, %v3732_v12  ;;  %v3887_v12 = vld [vmem:[#allocation2 + $0x348] sm:$0xff] }
 0x412   :  { %3710 = vmatmul.mubr.bf16.vlgmr.msra.gmra.mrb[20].mxu1 %v3659_v5  ;;  %v3885_v5 = vld [vmem:[#allocation2 + $0x338] sm:$0xff] }
 0x413   :  { %3822 = vmatpush1.bf16.msra.mxu1 %v3806_v11  ;;  %4683 = vmatprep.mubr.msk.bf16.mxu1 %vm3341_vm15, %v3804_v13  ;;  %v3958_v11 = vld [vmem:[#allocation2 + $0x3a0] sm:$0xff]  ;;  %v3959_v13 = vld [vmem:[#allocation2 + $0x3a8] sm:$0xff] }
 0x414   :  { %3823 = vmatprep.subr.bf16.mxu1 %v4983_v7  ;;  %3752 = vmatpush1.bf16.msra.mxu0 %v3735_v14  ;;  %v3941_v14 = vpop.permute.xlu1 %3940 }
 0x415   :  { %3753 = vmatprep.subr.bf16.mxu0 %v4983_v7 }
 0x417   :  { %3824 = vmatpush1.bf16.msra.mxu1 %v3807_v16  ;;  %v3888_v16 = vld [vmem:[#allocation2 + $0x350] sm:$0xff] }
 0x418   :  { %3825 = vmatprep.subr.bf16.mxu1 %v4983_v7  ;;  %3754 = vmatpush1.bf16.msra.mxu0 %v3736_v17  ;;  %v4909_v17 = vunpack.i.l.bf16 %v5724_v43  ;;  %v4095_v43 = vld [vmem:[#allocation2 + $0x428] sm:$0xff] }
 0x419   :  { %3755 = vmatprep.subr.bf16.mxu0 %v4983_v7 }
 0x41b   :  { %3826 = vmatpush1.bf16.msra.mxu1 %v3808_v20  ;;  %v3960_v20 = vld [vmem:[#allocation2 + $0x3b0] sm:$0xff] }
 0x41c   :  { %3827 = vmatprep.subr.bf16.mxu1 %v4983_v7  ;;  %3756 = vmatpush1.bf16.msra.mxu0 %v3737_v21  ;;  %v5776_v21 = vpop.permute.xlu1 %4912 }
 0x41d   :  { %3757 = vmatprep.subr.bf16.mxu0 %v4983_v7 }
 0x41f   :  { %3828 = vmatpush1.bf16.msra.mxu1 %v3809_v26  ;;  %v3862_v26 = vrot.slane %v5461_v8, 4 }
 0x420   :  { %3829 = vmatprep.subr.bf16.mxu1 %v4983_v7  ;;  %3758 = vmatpush1.bf16.msra.mxu0 %v3738_v27  ;;  %v3889_v27 = vld [vmem:[#allocation2 + $0x358] sm:$0xff] }
 0x421   :  { %3759 = vmatprep.subr.bf16.mxu0 %v4983_v7 }
 0x423   :  { %3830 = vmatpush1.bf16.msra.mxu1 %v3810_v28  ;;  %v3872_v28 = vsel %vm3288_vm13, %v4909_v17, %v4910_v50  ;;  %v4027_v50 = vld [vmem:[#allocation2 + $0x3e8] sm:$0xff] }
 0x424   :  { %3831 = vmatprep.subr.bf16.mxu1 %v4983_v7  ;;  %3760 = vmatpush1.bf16.msra.mxu0 %v3739_v29  ;;  %v3934_v29 = vrot.slane %v5549_v19, 4 }
 0x425   :  { %3761 = vmatprep.subr.bf16.mxu0 %v4983_v7 }
 0x427   :  { %3832 = vmatpush1.bf16.msra.mxu1 %v3811_v30  ;;  %v3944_v30 = vsel %vm3288_vm13, %v3941_v14, %v5743_v56 }
 0x428   :  { %3833 = vmatprep.subr.bf16.mxu1 %v4983_v7  ;;  %3762 = vmatpush1.bf16.msra.mxu0 %v3740_v31  ;;  %v3961_v31 = vld [vmem:[#allocation2 + $0x3b8] sm:$0xff] }
 0x429   :  { %3763 = vmatprep.subr.bf16.mxu0 %v4983_v7 }
 0x42b   :  { %3834 = vmatpush1.bf16.msra.mxu1 %v3812_v32  ;;  %v4915_v32 = vunpack.i.h.bf16 %v5776_v21 }
 0x42c   :  { %3835 = vmatprep.subr.bf16.mxu1 %v4983_v7  ;;  %3764 = vmatpush1.bf16.msra.mxu0 %v3741_v33  ;;  %v4007_v33 = vrot.slane %v5463_v9, 5 }
 0x42d   :  { %3765 = vmatprep.subr.bf16.mxu0 %v4983_v7 }
 0x42f   :  { %3836 = vmatpush1.bf16.msra.mxu1 %v3813_v34  ;;  %v3875_v34 = vsel %vm5544_vm14, %v3862_v26, %v3872_v28  ;;  %v4166_v28 = vld [vmem:[#allocation2 + $0x480] sm:$0xff] }
 0x430   :  { %3837 = vmatprep.subr.bf16.mxu1 %v4983_v7  ;;  %3766 = vmatpush1.bf16.msra.mxu0 %v3742_v35  ;;  %v4079_v35 = vrot.slane %v5540_v15, 5 }
 0x431   :  { %3767 = vmatprep.subr.bf16.mxu0 %v4983_v7 }
 0x433   :  { %3838 = vmatpush1.bf16.msra.mxu1 %v3814_v36  ;;  %v3947_v36 = vsel %vm5544_vm14, %v3934_v29, %v3944_v30  ;;  %v4238_v30 = vld [vmem:[#allocation2 + $0x4e0] sm:$0xff] }
 0x434   :  { %3839 = vmatprep.subr.bf16.mxu1 %v4983_v7  ;;  %3768 = vmatpush1.bf16.msra.mxu0 %v3743_v37  ;;  %v4022_v37 = vld [vmem:[#allocation2 + $0x3c0] sm:$0xff] }
 0x435   :  { %3769 = vmatprep.subr.bf16.mxu0 %v4983_v7 }
 0x437   :  { %3840 = vmatpush1.bf16.msra.mxu1 %v3815_v38  ;;  %v5795_v38 = vpop.permute.xlu1 %4086 }
 0x438   :  { %3841 = vmatprep.subr.bf16.mxu1 %v4983_v7  ;;  %3770 = vmatpush1.bf16.msra.mxu0 %v3744_v40  ;;  %v4020_v40 = vsel %vm5544_vm14, %v4007_v33, %v4915_v32  ;;  %v4092_v41 = vsel %vm5544_vm14, %v4079_v35, %v5795_v38  ;;  %v4167_v33 = vld [vmem:[#allocation2 + $0x488] sm:$0xff]  ;;  %v4168_v35 = vld [vmem:[#allocation2 + $0x490] sm:$0xff] }
 0x439   :  { %3771 = vmatprep.subr.bf16.mxu0 %v4983_v7 }
 0x43b   :  { %3842 = vmatpush1.bf16.msra.mxu1 %v3816_v42  ;;  %v4023_v42 = vld [vmem:[#allocation2 + $0x3c8] sm:$0xff] }
 0x43c   :  { %3843 = vmatprep.subr.bf16.mxu1 %v4983_v7  ;;  %3772 = vmatpush1.bf16.msra.mxu0 %v3745_v45  ;;  %v4096_v45 = vld [vmem:[#allocation2 + $0x430] sm:$0xff] }
 0x43d   :  { %3893 = vmatprep.subr.bf16.mxu0 %v4983_v7 }
 0x43f   :  { %3844 = vmatpush1.bf16.msra.mxu1 %v3817_v49  ;;  %3782 = vmatmul.mubr.bf16.vlgmr.msra.gmra.mrb[20].mxu0 %v3731_v52  ;;  %v4098_v49 = vld [vmem:[#allocation2 + $0x440] sm:$0xff]  ;;  %v4099_v52 = vld [vmem:[#allocation2 + $0x448] sm:$0xff] }
 0x440   :  { %3965 = vmatprep.subr.bf16.mxu1 %v4983_v7  ;;  %3894 = vmatpush1.bf16.msra.mxu0 %v3878_v55 }
 0x441   :  { %3895 = vmatprep.subr.bf16.mxu0 %v4983_v7  ;;  %4684 = vmatprep.mubr.msk.bf16.mxu0 %vm3341_vm15, %v3876_v58 }
 0x442   :  { %3854 = vmatmul.mubr.bf16.vlgmr.msra.gmra.mrb[24].mxu1 %v3803_v54 }
 0x443   :  { %3966 = vmatpush1.bf16.msra.mxu1 %v3950_v57  ;;  %4685 = vmatprep.mubr.msk.bf16.mxu1 %vm3341_vm15, %v3948_v59 }
 0x444   :  { %3967 = vmatprep.subr.bf16.mxu1 %v4983_v7  ;;  %3896 = vmatpush1.bf16.msra.mxu0 %v3879_v24  ;;  %v4028_v24 = vld [vmem:[#allocation2 + $0x3f0] sm:$0xff] }
 0x445   :  { %3897 = vmatprep.subr.bf16.mxu0 %v4983_v7 }
 0x447   :  { %3968 = vmatpush1.bf16.msra.mxu1 %v3951_v25 }
 0x448   :  { %3969 = vmatprep.subr.bf16.mxu1 %v4983_v7  ;;  %3898 = vmatpush1.bf16.msra.mxu0 %v3880_v60  ;;  %v4100_v60 = vld [vmem:[#allocation2 + $0x450] sm:$0xff] }
 0x449   :  { %3899 = vmatprep.subr.bf16.mxu0 %v4983_v7 }
 0x44b   :  { %3970 = vmatpush1.bf16.msra.mxu1 %v3952_v61  ;;  %v4029_v61 = vld [vmem:[#allocation2 + $0x3f8] sm:$0xff] }
 0x44c   :  { %3971 = vmatprep.subr.bf16.mxu1 %v4983_v7  ;;  %3900 = vmatpush1.bf16.msra.mxu0 %v3881_v62  ;;  %v4101_v62 = vld [vmem:[#allocation2 + $0x458] sm:$0xff] }
 0x44d   :  { %3901 = vmatprep.subr.bf16.mxu0 %v4983_v7 }
 0x44f   :  { %3972 = vmatpush1.bf16.msra.mxu1 %v3953_v63  ;;  %v4030_v63 = vld [vmem:[#allocation2 + $0x400] sm:$0xff] }
 0x450   :  { %3973 = vmatprep.subr.bf16.mxu1 %v4983_v7  ;;  %3902 = vmatpush1.bf16.msra.mxu0 %v3882_v0  ;;  %v4102_v0 = vld [vmem:[#allocation2 + $0x460] sm:$0xff] }
 0x451   :  { %3903 = vmatprep.subr.bf16.mxu0 %v4983_v7 }
 0x453   :  { %3974 = vmatpush1.bf16.msra.mxu1 %v3954_v1  ;;  %v4031_v1 = vld [vmem:[#allocation2 + $0x408] sm:$0xff] }
 0x454   :  { %3975 = vmatprep.subr.bf16.mxu1 %v4983_v7  ;;  %3904 = vmatpush1.bf16.msra.mxu0 %v3883_v2  ;;  %v4103_v2 = vld [vmem:[#allocation2 + $0x468] sm:$0xff] }
 0x455   :  { %3905 = vmatprep.subr.bf16.mxu0 %v4983_v7 }
 0x457   :  { %3976 = vmatpush1.bf16.msra.mxu1 %v3955_v3  ;;  %v4085_v3 = vpop.permute.xlu0 %4084 }
 0x458   :  { %3977 = vmatprep.subr.bf16.mxu1 %v4983_v7  ;;  %3906 = vmatpush1.bf16.msra.mxu0 %v3884_v22  ;;  %v4032_v22 = vld [vmem:[#allocation2 + $0x410] sm:$0xff]  ;;  %v4088_v14 = vsel %vm3288_vm13, %v4085_v3, %v5795_v38  ;;  %v4241_v38 = vld [vmem:[#allocation2 + $0x4f8] sm:$0xff]  ;;  %v4222_v3 = vrot.slane %v5549_v19, 6 }
 0x459   :  { %3907 = vmatprep.subr.bf16.mxu0 %v4983_v7 }
 0x45b   :  { %3978 = vmatpush1.bf16.msra.mxu1 %v3956_v23  ;;  %v4914_v23 = vunpack.i.l.bf16 %v5776_v21  ;;  %v4223_v21 = vrot.slane %v5540_v15, 6 }
 0x45c   :  { %3979 = vmatprep.subr.bf16.mxu1 %v4983_v7  ;;  %3908 = vmatpush1.bf16.msra.mxu0 %v3885_v5  ;;  %v4104_v5 = vld [vmem:[#allocation2 + $0x470] sm:$0xff] }
 0x45d   :  { %3909 = vmatprep.subr.bf16.mxu0 %v4983_v7 }
 0x45f   :  { %3980 = vmatpush1.bf16.msra.mxu1 %v3957_v6  ;;  %v5830_v6 = vpop.permute.xlu0 %4917 }
 0x460   :  { %3981 = vmatprep.subr.bf16.mxu1 %v4983_v7  ;;  %3910 = vmatpush1.bf16.msra.mxu0 %v3886_v10  ;;  %v4006_v10 = vrot.slane %v5461_v8, 5  ;;  %v4920_v17 = vunpack.i.h.bf16 %v5830_v6 }
 0x461   :  { %3911 = vmatprep.subr.bf16.mxu0 %v4983_v7 }
 0x463   :  { %3982 = vmatpush1.bf16.msra.mxu1 %v3958_v11  ;;  %v4033_v11 = vld [vmem:[#allocation2 + $0x418] sm:$0xff]  ;;  %v5849_v29 = vpop.permute.xlu0 %4230 }
 0x464   :  { %3983 = vmatprep.subr.bf16.mxu1 %v4983_v7  ;;  %3912 = vmatpush1.bf16.msra.mxu0 %v3887_v12  ;;  %v4016_v12 = vsel %vm3288_vm13, %v4914_v23, %v4915_v32  ;;  %v4236_v32 = vsel %vm5544_vm14, %v4223_v21, %v5849_v29  ;;  %v4249_v23 = vld [vmem:[#allocation2 + $0x538] sm:$0xff]  ;;  %v4384_v21 = vld [vmem:[#allocation2 + $0x5b0] sm:$0xff] }
 0x465   :  { %3913 = vmatprep.subr.bf16.mxu0 %v4983_v7  ;;  %v4019_v26 = vsel %vm5544_vm14, %v4006_v10, %v4016_v12  ;;  %v4295_v10 = vrot.slane %v5463_v9, 7 }
 0x467   :  { %3984 = vmatpush1.bf16.msra.mxu1 %v3959_v13  ;;  %v4078_v13 = vrot.slane %v5549_v19, 5 }
 0x468   :  { %3985 = vmatprep.subr.bf16.mxu1 %v4983_v7  ;;  %3914 = vmatpush1.bf16.msra.mxu0 %v3888_v16  ;;  %v4105_v16 = vld [vmem:[#allocation2 + $0x478] sm:$0xff] }
 0x469   :  { %3915 = vmatprep.subr.bf16.mxu0 %v4983_v7 }
 0x46b   :  { %3986 = vmatpush1.bf16.msra.mxu1 %v3960_v20  ;;  %v4151_v20 = vrot.slane %v5463_v9, 6 }
 0x46c   :  { %3987 = vmatprep.subr.bf16.mxu1 %v4983_v7  ;;  %3916 = vmatpush1.bf16.msra.mxu0 %v3889_v27  ;;  %v4091_v27 = vsel %vm5544_vm14, %v4078_v13, %v4088_v14  ;;  %v4310_v13 = vld [vmem:[#allocation2 + $0x540] sm:$0xff] }
 0x46d   :  { %4037 = vmatprep.subr.bf16.mxu0 %v4983_v7 }
 0x46f   :  { %3988 = vmatpush1.bf16.msra.mxu1 %v3961_v31  ;;  %3926 = vmatmul.mubr.bf16.vlgmr.msra.gmra.mrb[24].mxu0 %v3875_v34  ;;  %v4164_v31 = vsel %vm5544_vm14, %v4151_v20, %v4920_v17  ;;  %v4239_v34 = vld [vmem:[#allocation2 + $0x4e8] sm:$0xff] }
 0x470   :  { %4109 = vmatprep.subr.bf16.mxu1 %v4983_v7  ;;  %4038 = vmatpush1.bf16.msra.mxu0 %v4022_v37  ;;  %v4169_v37 = vld [vmem:[#allocation2 + $0x498] sm:$0xff]  ;;  %v4383_v20 = vld [vmem:[#allocation2 + $0x5a8] sm:$0xff] }
 0x471   :  { %4039 = vmatprep.subr.bf16.mxu0 %v4983_v7  ;;  %4686 = vmatprep.mubr.msk.bf16.mxu0 %vm3341_vm15, %v4020_v40  ;;  %v4242_v40 = vld [vmem:[#allocation2 + $0x500] sm:$0xff] }
 0x472   :  { %3998 = vmatmul.mubr.bf16.vlgmr.msra.gmra.mrb[28].mxu1 %v3947_v36  ;;  %v4240_v36 = vld [vmem:[#allocation2 + $0x4f0] sm:$0xff] }
 0x473   :  { %4110 = vmatpush1.bf16.msra.mxu1 %v4094_v39  ;;  %4687 = vmatprep.mubr.msk.bf16.mxu1 %vm3341_vm15, %v4092_v41  ;;  %v4170_v39 = vld [vmem:[#allocation2 + $0x4a0] sm:$0xff]  ;;  %v4171_v41 = vld [vmem:[#allocation2 + $0x4a8] sm:$0xff] }
 0x474   :  { %4111 = vmatprep.subr.bf16.mxu1 %v4983_v7  ;;  %4040 = vmatpush1.bf16.msra.mxu0 %v4023_v42 }
 0x475   :  { %4041 = vmatprep.subr.bf16.mxu0 %v4983_v7 }
 0x477   :  { %4112 = vmatpush1.bf16.msra.mxu1 %v4095_v43  ;;  %v4243_v43 = vld [vmem:[#allocation2 + $0x508] sm:$0xff] }
 0x478   :  { %4113 = vmatprep.subr.bf16.mxu1 %v4983_v7  ;;  %4042 = vmatpush1.bf16.msra.mxu0 %v4024_v44 }
 0x479   :  { %4043 = vmatprep.subr.bf16.mxu0 %v4983_v7 }
 0x47b   :  { %4114 = vmatpush1.bf16.msra.mxu1 %v4096_v45 }
 0x47c   :  { %4115 = vmatprep.subr.bf16.mxu1 %v4983_v7  ;;  %4044 = vmatpush1.bf16.msra.mxu0 %v4025_v46 }
 0x47d   :  { %4045 = vmatprep.subr.bf16.mxu0 %v4983_v7 }
 0x47f   :  { %4116 = vmatpush1.bf16.msra.mxu1 %v4097_v47 }
 0x480   :  { %4117 = vmatprep.subr.bf16.mxu1 %v4983_v7  ;;  %4046 = vmatpush1.bf16.msra.mxu0 %v4026_v48 }
 0x481   :  { %4047 = vmatprep.subr.bf16.mxu0 %v4983_v7 }
 0x482   :  { %v3379_v51 = vpop.f32.mrb[8].mxu0 }
 0x483   :  { %4118 = vmatpush1.bf16.msra.mxu1 %v4098_v49  ;;  %v3381_v53 = vpop.f32.mrb[9].mxu0 }
 0x484   :  { %4119 = vmatprep.subr.bf16.mxu1 %v4983_v7  ;;  %4048 = vmatpush1.bf16.msra.mxu0 %v4027_v50  ;;  %v3382_v56 = vpop.f32.mrb[10].mxu0 }
 0x485   :  { %v3422_v54 = vpop.f32.mrb[12].mxu1  ;;  %v3383_v58 = vpop.f32.mrb[11].mxu0  ;;  %4049 = vmatprep.subr.bf16.mxu0 %v4983_v7  ;;  %v4245_v56 = vld [vmem:[#allocation2 + $0x518] sm:$0xff] }
 0x486   :  { %v5817_v55 = vadd.f32 %v3422_v54, %v3379_v51  ;;  %v3424_v57 = vpop.f32.mrb[13].mxu1  ;;  %v4244_v54 = vld [vmem:[#allocation2 + $0x510] sm:$0xff]  ;;  %v4246_v58 = vld [vmem:[#allocation2 + $0x520] sm:$0xff] }
 0x487   :  { %4120 = vmatpush1.bf16.msra.mxu1 %v4099_v52  ;;  %v3425_v59 = vpop.f32.mrb[14].mxu1  ;;  %v4172_v52 = vld [vmem:[#allocation2 + $0x4b0] sm:$0xff]  ;;  %v4174_v57 = vld [vmem:[#allocation2 + $0x4c0] sm:$0xff] }
 0x488   :  { %v3426_v25 = vpop.f32.mrb[15].mxu1  ;;  %4121 = vmatprep.subr.bf16.mxu1 %v4983_v7  ;;  %4050 = vmatpush1.bf16.msra.mxu0 %v4028_v24  ;;  %v4175_v59 = vld [vmem:[#allocation2 + $0x4c8] sm:$0xff] }
 0x489   :  { %4051 = vmatprep.subr.bf16.mxu0 %v4983_v7  ;;  %v4247_v24 = vld [vmem:[#allocation2 + $0x528] sm:$0xff]  ;;  %v4229_v25 = vpop.permute.xlu1 %4228 }
 0x48b   :  { %4122 = vmatpush1.bf16.msra.mxu1 %v4100_v60  ;;  %v4176_v60 = vld [vmem:[#allocation2 + $0x4d0] sm:$0xff] }
 0x48c   :  { %4123 = vmatprep.subr.bf16.mxu1 %v4983_v7  ;;  %4052 = vmatpush1.bf16.msra.mxu0 %v4029_v61  ;;  %v4919_v61 = vunpack.i.l.bf16 %v5830_v6  ;;  %v4367_v6 = vrot.slane %v5540_v15, 7 }
 0x48d   :  { %4053 = vmatprep.subr.bf16.mxu0 %v4983_v7 }
 0x48f   :  { %4124 = vmatpush1.bf16.msra.mxu1 %v4101_v62  ;;  %v4248_v62 = vld [vmem:[#allocation2 + $0x530] sm:$0xff] }
 0x490   :  { %4125 = vmatprep.subr.bf16.mxu1 %v4983_v7  ;;  %4054 = vmatpush1.bf16.msra.mxu0 %v4030_v63  ;;  %v5885_v63 = vpop.permute.xlu1 %4922 }
 0x491   :  { %4055 = vmatprep.subr.bf16.mxu0 %v4983_v7 }
 0x493   :  { %4126 = vmatpush1.bf16.msra.mxu1 %v4102_v0  ;;  %v4150_v0 = vrot.slane %v5461_v8, 6 }
 0x494   :  { %4127 = vmatprep.subr.bf16.mxu1 %v4983_v7  ;;  %4056 = vmatpush1.bf16.msra.mxu0 %v4031_v1  ;;  %v4177_v1 = vld [vmem:[#allocation2 + $0x4d8] sm:$0xff]  ;;  %v5904_v14 = vpop.permute.xlu1 %4374 }
 0x495   :  { %4057 = vmatprep.subr.bf16.mxu0 %v4983_v7  ;;  %v4380_v15 = vsel %vm5544_vm14, %v4367_v6, %v5904_v14 }
 0x497   :  { %4128 = vmatpush1.bf16.msra.mxu1 %v4103_v2  ;;  %v4160_v2 = vsel %vm3288_vm13, %v4919_v61, %v4920_v17  ;;  %v4311_v17 = vld [vmem:[#allocation2 + $0x548] sm:$0xff] }
 0x498   :  { %4129 = vmatprep.subr.bf16.mxu1 %v4983_v7  ;;  %4058 = vmatpush1.bf16.msra.mxu0 %v4032_v22  ;;  %v4232_v22 = vsel %vm3288_vm13, %v4229_v25, %v5849_v29  ;;  %v4314_v29 = vld [vmem:[#allocation2 + $0x560] sm:$0xff] }
 0x499   :  { %4059 = vmatprep.subr.bf16.mxu0 %v4983_v7  ;;  %v4235_v12 = vsel %vm5544_vm14, %v4222_v3, %v4232_v22  ;;  %v4447_v22 = vld [vmem:[%s6025_s7] sm:$0xff] }
 0x49b   :  { %4130 = vmatpush1.bf16.msra.mxu1 %v4104_v5  ;;  %v4925_v5 = vunpack.i.h.bf16 %v5885_v63 }
 0x49c   :  { %4131 = vmatprep.subr.bf16.mxu1 %v4983_v7  ;;  %4060 = vmatpush1.bf16.msra.mxu0 %v4033_v11  ;;  %v4163_v11 = vsel %vm5544_vm14, %v4150_v0, %v4160_v2 }
 0x49d   :  { %4181 = vmatprep.subr.bf16.mxu0 %v4983_v7  ;;  %v4308_v9 = vsel %vm5544_vm14, %v4295_v10, %v4925_v5  ;;  %v4748_v10 = vpack.c.bf16 %v4448_v18, %v4447_v22 }
 0x49f   :  { %4132 = vmatpush1.bf16.msra.mxu1 %v4105_v16  ;;  %4070 = vmatmul.mubr.bf16.vlgmr.msra.gmra.mrb[28].mxu0 %v4019_v26  ;;  %v4382_v16 = vld [vmem:[#allocation2 + $0x5a0] sm:$0xff]  ;;  %v4312_v26 = vld [vmem:[#allocation2 + $0x550] sm:$0xff] }
 0x4a0   :  { %4253 = vmatprep.subr.bf16.mxu1 %v4983_v7  ;;  %4182 = vmatpush1.bf16.msra.mxu0 %v4166_v28  ;;  %v4385_v28 = vld [vmem:[#allocation2 + $0x5b8] sm:$0xff] }
 0x4a1   :  { %4183 = vmatprep.subr.bf16.mxu0 %v4983_v7  ;;  %4688 = vmatprep.mubr.msk.bf16.mxu0 %vm3341_vm15, %v4164_v31  ;;  %v4315_v31 = vld [vmem:[#allocation2 + $0x568] sm:$0xff] }
 0x4a2   :  { %4142 = vmatmul.mubr.bf16.vlgmr.msra.gmra.mrb[32].mxu1 %v4091_v27  ;;  %v4313_v27 = vld [vmem:[#allocation2 + $0x558] sm:$0xff] }
 0x4a3   :  { %4254 = vmatpush1.bf16.msra.mxu1 %v4238_v30  ;;  %4689 = vmatprep.mubr.msk.bf16.mxu1 %vm3341_vm15, %v4236_v32  ;;  %v4386_v30 = vld [vmem:[#allocation2 + $0x5c0] sm:$0xff] }
 0x4a4   :  { %4255 = vmatprep.subr.bf16.mxu1 %v4983_v7  ;;  %4184 = vmatpush1.bf16.msra.mxu0 %v4167_v33  ;;  %v4387_v33 = vld [vmem:[#allocation2 + $0x5c8] sm:$0xff] }
 0x4a5   :  { %4185 = vmatprep.subr.bf16.mxu0 %v4983_v7 }
 0x4a7   :  { %4256 = vmatpush1.bf16.msra.mxu1 %v4239_v34 }
 0x4a8   :  { %4257 = vmatprep.subr.bf16.mxu1 %v4983_v7  ;;  %4186 = vmatpush1.bf16.msra.mxu0 %v4168_v35 }
 0x4a9   :  { %4187 = vmatprep.subr.bf16.mxu0 %v4983_v7 }
 0x4ab   :  { %4258 = vmatpush1.bf16.msra.mxu1 %v4240_v36 }
 0x4ac   :  { %4259 = vmatprep.subr.bf16.mxu1 %v4983_v7  ;;  %4188 = vmatpush1.bf16.msra.mxu0 %v4169_v37 }
 0x4ad   :  { %4189 = vmatprep.subr.bf16.mxu0 %v4983_v7 }
 0x4af   :  { %4260 = vmatpush1.bf16.msra.mxu1 %v4241_v38 }
 0x4b0   :  { %4261 = vmatprep.subr.bf16.mxu1 %v4983_v7  ;;  %4190 = vmatpush1.bf16.msra.mxu0 %v4170_v39 }
 0x4b1   :  { %4191 = vmatprep.subr.bf16.mxu0 %v4983_v7 }
 0x4b2   :  { %v3495_v42 = vpop.f32.mrb[12].mxu0 }
 0x4b3   :  { %4262 = vmatpush1.bf16.msra.mxu1 %v4242_v40  ;;  %v3501_v44 = vadd.f32 %v3495_v42, %v5817_v55  ;;  %v3497_v45 = vpop.f32.mrb[13].mxu0  ;;  %v4173_v55 = vld [vmem:[#allocation2 + $0x4b8] sm:$0xff]  ;;  %v4316_v42 = vld [vmem:[#allocation2 + $0x570] sm:$0xff] }
 0x4b4   :  { %4263 = vmatprep.subr.bf16.mxu1 %v4983_v7  ;;  %v3498_v47 = vpop.f32.mrb[14].mxu0  ;;  %4192 = vmatpush1.bf16.msra.mxu0 %v4171_v41  ;;  %v4317_v45 = vld [vmem:[#allocation2 + $0x578] sm:$0xff] }
 0x4b5   :  { %v3567_v46 = vpop.f32.mrb[16].mxu1  ;;  %v3499_v50 = vpop.f32.mrb[15].mxu0  ;;  %4193 = vmatprep.subr.bf16.mxu0 %v4983_v7  ;;  %v4318_v47 = vld [vmem:[#allocation2 + $0x580] sm:$0xff] }
 0x4b6   :  { %v3569_v48 = vpop.f32.mrb[17].mxu1  ;;  %v5872_v49 = vadd.f32 %v3567_v46, %v3501_v44  ;;  %v4388_v44 = vld [vmem:[#allocation2 + $0x5d0] sm:$0xff]  ;;  %v4389_v46 = vld [vmem:[#allocation2 + $0x5d8] sm:$0xff]  ;;  %v4391_v50 = vld [vmem:[#allocation2 + $0x5e8] sm:$0xff] }
 0x4b7   :  { %v3570_v51 = vpop.f32.mrb[18].mxu1  ;;  %4264 = vmatpush1.bf16.msra.mxu1 %v4243_v43  ;;  %v4390_v48 = vld [vmem:[#allocation2 + $0x5e0] sm:$0xff] }
 0x4b8   :  { %v3571_v53 = vpop.f32.mrb[19].mxu1  ;;  %4265 = vmatprep.subr.bf16.mxu1 %v4983_v7  ;;  %4194 = vmatpush1.bf16.msra.mxu0 %v4172_v52  ;;  %v4320_v51 = vld [vmem:[#allocation2 + $0x590] sm:$0xff]  ;;  %v4924_v52 = vunpack.i.l.bf16 %v5885_v63 }
 0x4b9   :  { %4195 = vmatprep.subr.bf16.mxu0 %v4983_v7  ;;  %v4392_v53 = vld [vmem:[#allocation2 + $0x5f0] sm:$0xff] }
 0x4bb   :  { %4266 = vmatpush1.bf16.msra.mxu1 %v4244_v54  ;;  %v4373_v54 = vpop.permute.xlu0 %4372 }
 0x4bc   :  { %4267 = vmatprep.subr.bf16.mxu1 %v4983_v7  ;;  %4196 = vmatpush1.bf16.msra.mxu0 %v4173_v55  ;;  %v4294_v55 = vrot.slane %v5461_v8, 7 }
 0x4bd   :  { %4197 = vmatprep.subr.bf16.mxu0 %v4983_v7 }
 0x4bf   :  { %4268 = vmatpush1.bf16.msra.mxu1 %v4245_v56  ;;  %v4321_v56 = vld [vmem:[#allocation2 + $0x598] sm:$0xff] }
 0x4c0   :  { %4269 = vmatprep.subr.bf16.mxu1 %v4983_v7  ;;  %4198 = vmatpush1.bf16.msra.mxu0 %v4174_v57  ;;  %v4304_v57 = vsel %vm3288_vm13, %v4924_v52, %v4925_v5  ;;  %v4986_v5 = vmov 0.0|0.0  }
 0x4c1   :  { %4199 = vmatprep.subr.bf16.mxu0 %v4983_v7  ;;  %v4307_v8 = vsel %vm5544_vm14, %v4294_v55, %v4304_v57 }
 0x4c3   :  { %4270 = vmatpush1.bf16.msra.mxu1 %v4246_v58  ;;  %v4366_v58 = vrot.slane %v5549_v19, 7 }
 0x4c4   :  { %4271 = vmatprep.subr.bf16.mxu1 %v4983_v7  ;;  %4200 = vmatpush1.bf16.msra.mxu0 %v4175_v59  ;;  %v4376_v59 = vsel %vm3288_vm13, %v4373_v54, %v5904_v14 }
 0x4c5   :  { %4201 = vmatprep.subr.bf16.mxu0 %v4983_v7  ;;  %v4379_v25 = vsel %vm5544_vm14, %v4366_v58, %v4376_v59 }
 0x4c7   :  { %4272 = vmatpush1.bf16.msra.mxu1 %v4247_v24  ;;  %v4393_v24 = vld [vmem:[#allocation2 + $0x5f8] sm:$0xff] }
 0x4c8   :  { %4273 = vmatprep.subr.bf16.mxu1 %v4983_v7  ;;  %4202 = vmatpush1.bf16.msra.mxu0 %v4176_v60 }
 0x4c9   :  { %4203 = vmatprep.subr.bf16.mxu0 %v4983_v7 }
 0x4cb   :  { %4274 = vmatpush1.bf16.msra.mxu1 %v4248_v62 }
 0x4cc   :  { %4275 = vmatprep.subr.bf16.mxu1 %v4983_v7  ;;  %4204 = vmatpush1.bf16.msra.mxu0 %v4177_v1 }
 0x4cd   :  { %4325 = vmatprep.subr.bf16.mxu0 %v4983_v7 }
 0x4cf   :  { %4276 = vmatpush1.bf16.msra.mxu1 %v4249_v23  ;;  %4214 = vmatmul.mubr.bf16.vlgmr.msra.gmra.mrb[32].mxu0 %v4163_v11  ;;  %v4449_v23 = vld [vmem:[%s6025_s7 + $0x10] sm:$0xff]  ;;  %v4450_v11 = vld [vmem:[%s6025_s7 + $0x18] sm:$0xff] }
 0x4d0   :  { %4397 = vmatprep.subr.bf16.mxu1 %v4983_v7  ;;  %4326 = vmatpush1.bf16.msra.mxu0 %v4310_v13  ;;  %v4751_v6 = vpack.c.bf16 %v4450_v11, %v4449_v23  ;;  %v4452_v13 = vld [vmem:[%s6025_s7 + $0x28] sm:$0xff] }
 0x4d1   :  { %4327 = vmatprep.subr.bf16.mxu0 %v4983_v7  ;;  %4690 = vmatprep.mubr.msk.bf16.mxu0 %vm3341_vm15, %v4308_v9  ;;  %v4454_v9 = vld [vmem:[%s6025_s7 + $0x38] sm:$0xff] }
 0x4d2   :  { %4286 = vmatmul.mubr.bf16.vlgmr.msra.gmra.mrb[36].mxu1 %v4235_v12  ;;  %v4451_v12 = vld [vmem:[%s6025_s7 + $0x20] sm:$0xff] }
 0x4d3   :  { %4398 = vmatpush1.bf16.msra.mxu1 %v4382_v16  ;;  %4691 = vmatprep.mubr.msk.bf16.mxu1 %vm3341_vm15, %v4380_v15  ;;  %v4754_v14 = vpack.c.bf16 %v4452_v13, %v4451_v12  ;;  %v4453_v16 = vld [vmem:[%s6025_s7 + $0x30] sm:$0xff] }
 0x4d4   :  { %4399 = vmatprep.subr.bf16.mxu1 %v4983_v7  ;;  %4328 = vmatpush1.bf16.msra.mxu0 %v4311_v17  ;;  %v4757_v15 = vpack.c.bf16 %v4454_v9, %v4453_v16  ;;  %v4455_v17 = vld [vmem:[%s6025_s7 + $0x40] sm:$0xff] }
 0x4d5   :  { %4329 = vmatprep.subr.bf16.mxu0 %v4983_v7 }
 0x4d7   :  { %4400 = vmatpush1.bf16.msra.mxu1 %v4383_v20  ;;  %v4456_v20 = vld [vmem:[%s6025_s7 + $0x48] sm:$0xff] }
 0x4d8   :  { %4401 = vmatprep.subr.bf16.mxu1 %v4983_v7  ;;  %4330 = vmatpush1.bf16.msra.mxu0 %v4312_v26  ;;  %v4760_v26 = vpack.c.bf16 %v4456_v20, %v4455_v17 }
 0x4d9   :  { %4331 = vmatprep.subr.bf16.mxu0 %v4983_v7 }
 0x4db   :  { %4402 = vmatpush1.bf16.msra.mxu1 %v4384_v21  ;;  %v4457_v21 = vld [vmem:[%s6025_s7 + $0x50] sm:$0xff] }
 0x4dc   :  { %4403 = vmatprep.subr.bf16.mxu1 %v4983_v7  ;;  %4332 = vmatpush1.bf16.msra.mxu0 %v4313_v27  ;;  %v4458_v27 = vld [vmem:[%s6025_s7 + $0x58] sm:$0xff] }
 0x4dd   :  { %4333 = vmatprep.subr.bf16.mxu0 %v4983_v7 }
 0x4df   :  { %4404 = vmatpush1.bf16.msra.mxu1 %v4385_v28  ;;  %v4763_v28 = vpack.c.bf16 %v4458_v27, %v4457_v21 }
 0x4e0   :  { %4405 = vmatprep.subr.bf16.mxu1 %v4983_v7  ;;  %4334 = vmatpush1.bf16.msra.mxu0 %v4314_v29 }
 0x4e1   :  { %4335 = vmatprep.subr.bf16.mxu0 %v4983_v7 }
 0x4e2   :  { %v3639_v32 = vpop.f32.mrb[16].mxu0 }
 0x4e3   :  { %4406 = vmatpush1.bf16.msra.mxu1 %v4386_v30  ;;  %v3645_v34 = vadd.f32 %v3639_v32, %v5872_v49  ;;  %v3641_v35 = vpop.f32.mrb[17].mxu0  ;;  %v4319_v49 = vld [vmem:[#allocation2 + $0x588] sm:$0xff] }
 0x4e4   :  { %4407 = vmatprep.subr.bf16.mxu1 %v4983_v7  ;;  %v3642_v37 = vpop.f32.mrb[18].mxu0  ;;  %4336 = vmatpush1.bf16.msra.mxu0 %v4315_v31 }
 0x4e5   :  { %v3711_v36 = vpop.f32.mrb[20].mxu1  ;;  %v3643_v40 = vpop.f32.mrb[19].mxu0  ;;  %4337 = vmatprep.subr.bf16.mxu0 %v4983_v7 }
 0x4e6   :  { %v3713_v38 = vpop.f32.mrb[21].mxu1  ;;  %v3717_v39 = vadd.f32 %v3711_v36, %v3645_v34  ;;  %v4460_v40 = vld [vmem:[%s6025_s7 + $0x68] sm:$0xff] }
 0x4e7   :  { %v3714_v41 = vpop.f32.mrb[22].mxu1  ;;  %4408 = vmatpush1.bf16.msra.mxu1 %v4387_v33 }
 0x4e8   :  { %v3715_v43 = vpop.f32.mrb[23].mxu1  ;;  %4409 = vmatprep.subr.bf16.mxu1 %v4983_v7  ;;  %4338 = vmatpush1.bf16.msra.mxu0 %v4316_v42  ;;  %v4461_v42 = vld [vmem:[%s6025_s7 + $0x70] sm:$0xff] }
 0x4e9   :  { %4339 = vmatprep.subr.bf16.mxu0 %v4983_v7  ;;  %v4462_v43 = vld [vmem:[%s6025_s7 + $0x78] sm:$0xff] }
 0x4eb   :  { %4410 = vmatpush1.bf16.msra.mxu1 %v4388_v44  ;;  %v4769_v44 = vpack.c.bf16 %v4462_v43, %v4461_v42 }
 0x4ec   :  { %4411 = vmatprep.subr.bf16.mxu1 %v4983_v7  ;;  %4340 = vmatpush1.bf16.msra.mxu0 %v4317_v45 }
 0x4ed   :  { %4341 = vmatprep.subr.bf16.mxu0 %v4983_v7 }
 0x4ef   :  { %4412 = vmatpush1.bf16.msra.mxu1 %v4389_v46 }
 0x4f0   :  { %4413 = vmatprep.subr.bf16.mxu1 %v4983_v7  ;;  %4342 = vmatpush1.bf16.msra.mxu0 %v4318_v47 }
 0x4f1   :  { %4343 = vmatprep.subr.bf16.mxu0 %v4983_v7 }
 0x4f3   :  { %4414 = vmatpush1.bf16.msra.mxu1 %v4390_v48 }
 0x4f4   :  { %4415 = vmatprep.subr.bf16.mxu1 %v4983_v7  ;;  %4344 = vmatpush1.bf16.msra.mxu0 %v4319_v49 }
 0x4f5   :  { %4345 = vmatprep.subr.bf16.mxu0 %v4983_v7 }
 0x4f7   :  { %4416 = vmatpush1.bf16.msra.mxu1 %v4391_v50 }
 0x4f8   :  { %4417 = vmatprep.subr.bf16.mxu1 %v4983_v7  ;;  %4346 = vmatpush1.bf16.msra.mxu0 %v4320_v51 }
 0x4f9   :  { %4347 = vmatprep.subr.bf16.mxu0 %v4983_v7 }
 0x4fb   :  { %4418 = vmatpush1.bf16.msra.mxu1 %v4392_v53 }
 0x4fc   :  { %4419 = vmatprep.subr.bf16.mxu1 %v4983_v7  ;;  %4348 = vmatpush1.bf16.msra.mxu0 %v4321_v56 }
 0x4fd   :  { %4747 = vmatprep.subr.bf16.mxu0 %v4986_v5 }
 0x4ff   :  { %4420 = vmatpush1.bf16.msra.mxu1 %v4393_v24  ;;  %4358 = vmatmul.mubr.bf16.vlgmr.msra.gmra.mrb[36].mxu0 %v4307_v8 }
 0x500   :  { %4749 = vmatpush3.bf16.msra.mxu0 %v4748_v10  ;;  %4744 = vmatprep.mubr.msk.f32.mxu0 %vm4987_vm0, %v4975_v4  ;;  %v4693_v10 = vld [vmem:[%s6026_s8] ss:$0 sm:$0xff] }
 0x501   :  { %4750 = vmatprep.subr.bf16.mxu0 %v4986_v5 }
 0x502   :  { %4430 = vmatmul.mubr.bf16.vlgmr.msra.gmra.mrb[40].mxu1 %v4379_v25 }
 0x504   :  { %4752 = vmatpush3.bf16.msra.mxu0 %v4751_v6 }
 0x505   :  { %4753 = vmatprep.subr.bf16.mxu0 %v4986_v5 }
 0x508   :  { %4755 = vmatpush3.bf16.msra.mxu0 %v4754_v14 }
 0x509   :  { %4756 = vmatprep.subr.bf16.mxu0 %v4986_v5 }
 0x50c   :  { %4758 = vmatpush3.bf16.msra.mxu0 %v4757_v15 }
 0x50d   :  { %4759 = vmatprep.subr.bf16.mxu0 %v4986_v5 }
 0x510   :  { %4761 = vmatpush3.bf16.msra.mxu0 %v4760_v26 }
 0x511   :  { %4762 = vmatprep.subr.bf16.mxu0 %v4986_v5 }
 0x512   :  { %v3783_v60 = vpop.f32.mrb[20].mxu0 }
 0x513   :  { %v3789_v61 = vadd.f32 %v3783_v60, %v3717_v39  ;;  %v3785_v62 = vpop.f32.mrb[21].mxu0  ;;  %v4459_v39 = vld [vmem:[%s6025_s7 + $0x60] sm:$0xff] }
 0x514   :  { %v3786_v63 = vpop.f32.mrb[22].mxu0  ;;  %4764 = vmatpush3.bf16.msra.mxu0 %v4763_v28  ;;  %v4766_v41 = vpack.c.bf16 %v4460_v40, %v4459_v39 }
 0x515   :  { %v3855_v19 = vpop.f32.mrb[24].mxu1  ;;  %v3787_v1 = vpop.f32.mrb[23].mxu0  ;;  %4765 = vmatprep.subr.bf16.mxu0 %v4986_v5 }
 0x516   :  { %v3857_v7 = vpop.f32.mrb[25].mxu1  ;;  %v3861_v0 = vadd.f32 %v3855_v19, %v3789_v61 }
 0x517   :  { %v3858_v2 = vpop.f32.mrb[26].mxu1  ;;  %v4692_v7 = vld [vmem:[%s6024_s6] ss:$0 sm:$0xff]  ;;  %s4948_s6 = scalar_lea.vmem %s4549_s4, 32 }
 0x518   :  { %v3859_v3 = vpop.f32.mrb[27].mxu1  ;;  %4767 = vmatpush3.bf16.msra.mxu0 %v4766_v41  ;;  %p4949_p8 = scmp.ne.s32.totalorder %s4549_s4, %s4948_s6  ;;  %p4954_p10 = scmp.lt.s32.totalorder %s4948_s6, %s4948_s6 }
 0x519   :  { %4768 = vmatprep.subr.bf16.mxu0 %v4986_v5 }
 0x51a   :  { %p4955_p11 = por %p4954_p10, %p4953_p9 }
 0x51c   :  { %4770 = vmatpush3.bf16.msra.mxu0 %v4769_v44  ;;  %p4956_p12 = pnand %p4955_p11, %p4949_p8 }
 0x542   :  { %v3927_v29 = vpop.f32.mrb[24].mxu0 }
 0x543   :  { %v3933_v30 = vadd.f32 %v3927_v29, %v3861_v0  ;;  %v3929_v31 = vpop.f32.mrb[25].mxu0 }
 0x544   :  { %v3930_v33 = vpop.f32.mrb[26].mxu0 }
 0x545   :  { %v3999_v32 = vpop.f32.mrb[28].mxu1  ;;  %v3931_v36 = vpop.f32.mrb[27].mxu0 }
 0x546   :  { %v4001_v34 = vpop.f32.mrb[29].mxu1  ;;  %v4005_v35 = vadd.f32 %v3999_v32, %v3933_v30 }
 0x547   :  { %v4002_v37 = vpop.f32.mrb[30].mxu1 }
 0x548   :  { %v4003_v38 = vpop.f32.mrb[31].mxu1 }
 0x572   :  { %v4071_v45 = vpop.f32.mrb[28].mxu0 }
 0x573   :  { %v4077_v46 = vadd.f32 %v4071_v45, %v4005_v35  ;;  %v4073_v47 = vpop.f32.mrb[29].mxu0 }
 0x574   :  { %v4074_v49 = vpop.f32.mrb[30].mxu0 }
 0x575   :  { %v4143_v48 = vpop.f32.mrb[32].mxu1  ;;  %v4075_v52 = vpop.f32.mrb[31].mxu0 }
 0x576   :  { %v4145_v50 = vpop.f32.mrb[33].mxu1  ;;  %v4149_v51 = vadd.f32 %v4143_v48, %v4077_v46 }
 0x577   :  { %v4146_v53 = vpop.f32.mrb[34].mxu1 }
 0x578   :  { %v4147_v54 = vpop.f32.mrb[35].mxu1 }
 0x5a2   :  { %v4215_v55 = vpop.f32.mrb[32].mxu0 }
 0x5a3   :  { %v4221_v56 = vadd.f32 %v4215_v55, %v4149_v51  ;;  %v4217_v57 = vpop.f32.mrb[33].mxu0 }
 0x5a4   :  { %v4218_v59 = vpop.f32.mrb[34].mxu0 }
 0x5a5   :  { %v4287_v58 = vpop.f32.mrb[36].mxu1  ;;  %v4219_v25 = vpop.f32.mrb[35].mxu0 }
 0x5a6   :  { %v4289_v24 = vpop.f32.mrb[37].mxu1  ;;  %v4293_v8 = vadd.f32 %v4287_v58, %v4221_v56 }
 0x5a7   :  { %v4290_v60 = vpop.f32.mrb[38].mxu1 }
 0x5a8   :  { %v4291_v4 = vpop.f32.mrb[39].mxu1 }
 0x5d2   :  { %v4359_v61 = vpop.f32.mrb[36].mxu0 }
 0x5d3   :  { %v4365_v62 = vadd.f32 %v4359_v61, %v4293_v8  ;;  %v4361_v19 = vpop.f32.mrb[37].mxu0 }
 0x5d4   :  { %v4362_v0 = vpop.f32.mrb[38].mxu0 }
 0x5d5   :  { %v4431_v63 = vpop.f32.mrb[40].mxu1  ;;  %v4363_v3 = vpop.f32.mrb[39].mxu0 }
 0x5d6   :  { %v4433_v1 = vpop.f32.mrb[41].mxu1  ;;  %v4437_v2 = vadd.f32 %v4431_v63, %v4365_v62 }
 0x5d7   :  { %v4434_v22 = vpop.f32.mrb[42].mxu1 }
 0x5d8   :  { %v4435_v18 = vpop.f32.mrb[43].mxu1  ;;  %v4445_v23 = vadd.f32 %v4692_v7, %v4437_v2 }
 0x5da   :  { %v4446_v5 = vmax.f32 %v4445_v23, 0.0 }
 0x5dc   :  { %4745 = vmatmul.mubr.f32.vlgmr.msra.gmra.mrb[6].mxu0 %v4446_v5 }
 0x6af   :  { %v4536_v11 = vpop.f32.mrb[6].mxu0 }
 0x6b0   :  { %v4537_v6 = vadd.f32 %v4693_v10, %v4536_v11  ;;  %v4746_v12 = vpop.f32.mrb[7].mxu0 }
 0x6b2   :  { %4541 = vst.msk [vmem:[#allocation4] sm:$0x3] %vm4540_vm1, %v4537_v6 }
 0x6b3   :  { %4959 = shalt.err (!%p4956_p12)
}
 0x6b4   :  { %s4960_s29 = scalar_lea.hbm %s6027_s9, 32 }
 0x6b5   :  { %p4961_p13 = scmp.ne.s32.totalorder %s6027_s9, %s4960_s29  ;;  %p4964_p0 = scmp.lt.u32.totalorder %s4960_s29, %s6027_s9 }
 0x6b7   :  { %p4966_p1 = pnand %p4964_p0, %p4961_p13 }
 0x6b9   :  { %4969 = shalt.err (!%p4966_p1)
}
 0x6ba   :  { %4551 = dma.vmem_to_hbm [thread:$0]  %s4549_s4, 32, %s6027_s9, [#allocation5]  }
 0x6bb   :  { %4972 = dma.done.wait [#allocation5], 32  }
 0x6bc   :  { %4973 = vsyncadd [#allocation5], 4294967264 }
 0x6bd   :  { %4555 = vsyncpa [#allocation5], 1 }
 0x6be   :  { %4556 = vsyncmov [#allocation3] }
 0x6c1   :  { %s4557_s14 = vpop.sfrf %4556 }
 0x6c2   :  { %p4694_p2 = scmp.ne.s32.totalorder %s4557_s14, 0 }
 0x6c4   :  { %4561 = shalt.err (%p4694_p2)  }

</bundles_post_ra>
